<compile_context>
chip_gen: v7x
topology: tpu7x:2x2x1
jax: 0.10.0
libtpu: 0.0.40
codegen_flags: <defaults>
</compile_context>

<pallas_src>
import functools

import jax
import jax.numpy as jnp
from jax.experimental import pallas as pl
from jax.experimental.pallas import tpu as pltpu

LANE = 128


def _round_up(x, m):
    return ((x + m - 1) // m) * m


def _pad_dim(n):
    # v6e/v7x MXUs are 2x256^2: align wide dims to 256; otherwise 128 lanes.
    return _round_up(n, 256) if n >= 256 else _round_up(n, LANE)


# ----------------------------------------------------------------------------
# Fused kernel: one batch tile runs the entire network; the (bt, d_p)
# activation never leaves the core between layers.
# ----------------------------------------------------------------------------
def _fused_mlp_resnet_kernel(x_ref, w_in_ref, b_in_ref, w1s_ref, w2s_ref,
                             vecs_ref, w_out_ref, b_out_ref, o_ref,
                             *, num_blocks, d_valid, d_p, h_p, ffn_chunk, eps):
    f32 = jnp.float32
    cdt = w_in_ref.dtype          # matmul operand dtype (bf16 in the perf path)

    # Input linear: (bt, din_p) @ (din_p, d_p); K is small and full-extent.
    h = jnp.dot(x_ref[...].astype(cdt), w_in_ref[...],
                preferred_element_type=f32)
    h = h + b_in_ref[...]

    inv_d = f32(1.0 / d_valid)
    n_pad = f32(d_p - d_valid)

    def block_step(h, blk):
        vecs = vecs_ref[blk]                    # (4, vmax) f32 per-block vectors
        gamma = vecs[0:1, :d_p]
        beta = vecs[1:2, :d_p]
        b1 = vecs[2:3, :h_p]
        b2 = vecs[3:4, :d_p]
        w1 = w1s_ref.at[blk]                    # (d_p, h_p) ref view, no load yet
        w2 = w2s_ref.at[blk]                    # (h_p, d_p) ref view

        # LayerNorm over the true feature width.  Padded activation lanes are
        # exactly zero (all weight/vector padding is zero), so plain sums are
        # correct; the centered second moment gets an exact correction for the
        # n_pad lanes whose value is (0 - mu).
        mu = jnp.sum(h, axis=-1, keepdims=True) * inv_d
        c = h - mu
        var = (jnp.sum(c * c, axis=-1, keepdims=True) - n_pad * mu * mu) * inv_d
        var = jnp.maximum(var, 0.0)
        xh = c * jax.lax.rsqrt(var + eps)
        # gamma/beta are zero on padded lanes -> padded lanes return to exactly 0.
        xh = (xh * gamma + beta).astype(cdt)

        # dense1 -> relu -> dense2, chunked over the FFN axis so the (bt, chunk)
        # f32 intermediate stays small; accumulate the second matmul into y.
        y = jnp.zeros_like(h)
        for c0 in range(0, h_p, ffn_chunk):
            c1 = min(c0 + ffn_chunk, h_p)
            t = jnp.dot(xh, w1[:, c0:c1], preferred_element_type=f32)
            t = jnp.maximum(t + b1[:, c0:c1], 0.0).astype(cdt)
            y = y + jnp.dot(t, w2[c0:c1, :], preferred_element_type=f32)
        return h + y + b2                       # residual add, f32

    if num_blocks <= 4:
        for blk in range(num_blocks):           # small fixed depth: unroll
            h = block_step(h, blk)
    else:
        # Deep stacks: one tight loop body keeps vreg pressure / code size flat.
        h = jax.lax.fori_loop(0, num_blocks,
                              lambda i, hh: block_step(hh, i), h)

    # Final activation + output linear (lane-dense store).
    h = jnp.maximum(h, 0.0).astype(cdt)
    out = jnp.dot(h, w_out_ref[...], preferred_element_type=f32)
    out = out + b_out_ref[...]
    o_ref[...] = out.astype(o_ref.dtype)


# ----------------------------------------------------------------------------
# One-time parameter preparation: pad to lane-dense shapes, pack per-block
# vectors, cast matmul weights to bf16.  Do NOT call this per forward.
# ----------------------------------------------------------------------------
def prepare_params(params, *, weight_dtype=jnp.bfloat16):
    in_dim, hidden = params["w_in"].shape
    out_dim = params["w_out"].shape[1]
    num_blocks = len(params["blocks"])
    assert num_blocks >= 1
    ffn = params["blocks"][0]["w1"].shape[1]

    din_p = _round_up(in_dim, 8)      # full-extent K dim: only sublane-align
    d_p = _pad_dim(hidden)
    h_p = _pad_dim(ffn)
    dout_p = _pad_dim(out_dim)
    vmax = max(d_p, h_p)

    def pad2(a, r, c, dt):
        return jnp.pad(a, ((0, r - a.shape[0]), (0, c - a.shape[1]))).astype(dt)

    def pad1(a, c):
        return jnp.pad(a, ((0, c - a.shape[0]),)).astype(jnp.float32)

    w_in = pad2(params["w_in"], din_p, d_p, weight_dtype)
    b_in = pad1(params["b_in"], d_p).reshape(1, d_p)
    w_out = pad2(params["w_out"], d_p, dout_p, weight_dtype)
    b_out = pad1(params["b_out"], dout_p).reshape(1, dout_p)
    w1s = jnp.stack([pad2(b["w1"], d_p, h_p, weight_dtype)
                     for b in params["blocks"]])
    w2s = jnp.stack([pad2(b["w2"], h_p, d_p, weight_dtype)
                     for b in params["blocks"]])
    # gamma/beta/b1/b2 packed into one (num_blocks, 4, vmax) f32 slab: one DMA,
    # padding is exactly zero (required for the padded-lane-zero invariant).
    vecs = jnp.stack([
        jnp.stack([pad1(b["gamma"], vmax), pad1(b["beta"], vmax),
                   pad1(b["b1"], vmax), pad1(b["b2"], vmax)])
        for b in params["blocks"]])

    meta = dict(in_dim=in_dim, hidden=hidden, out_dim=out_dim,
                num_blocks=num_blocks, din_p=din_p, d_p=d_p, h_p=h_p,
                dout_p=dout_p, vmax=vmax)
    arrays = dict(w_in=w_in, b_in=b_in, w1s=w1s, w2s=w2s, vecs=vecs,
                  w_out=w_out, b_out=b_out)
    return dict(meta=meta, arrays=arrays)


# ----------------------------------------------------------------------------
# Forward: pad the batch, launch one fused kernel over a 1-D "parallel" grid.
# ----------------------------------------------------------------------------
def mlp_resnet_forward(x, prepared, *, eps=1e-5, batch_tile=None):
    meta, a = prepared["meta"], prepared["arrays"]
    B, in_dim = x.shape
    assert in_dim == meta["in_dim"]
    din_p, d_p, h_p = meta["din_p"], meta["d_p"], meta["h_p"]
    dout_p, vmax = meta["dout_p"], meta["vmax"]
    num_blocks = meta["num_blocks"]

    if batch_tile is None:
        # Large tiles amortize the ~0.35us per-grid-step cost and keep the MXU
        # fed; for big batches keep >=2 grid steps so v7x megacore splits them.
        if B <= 512:
            batch_tile = _round_up(B, 8)
        else:
            batch_tile = min(512, _round_up((B + 1) // 2, 8))
    batch_tile = max(8, _round_up(batch_tile, 8))
    Bp = _round_up(B, batch_tile)
    x_p = jnp.pad(x, ((0, Bp - B), (0, din_p - in_dim)))

    ffn_chunk = min(512, h_p)

    kernel = functools.partial(
        _fused_mlp_resnet_kernel, num_blocks=num_blocks,
        d_valid=meta["hidden"], d_p=d_p, h_p=h_p, ffn_chunk=ffn_chunk, eps=eps)

    # Explicit VMEM budget: weight slabs (x2 worst-case double-buffering),
    # double-buffered IO tiles, plus in-kernel intermediates; clamp to 64 MiB
    # so the request is valid on every chip (v7x has 64 MiB per TC).
    wbytes = sum(int(v.size) * v.dtype.itemsize
                 for v in (a["w_in"], a["w1s"], a["w2s"], a["w_out"]))
    vbytes = sum(int(v.size) * v.dtype.itemsize
                 for v in (a["b_in"], a["b_out"], a["vecs"]))
    io_bytes = 2 * batch_tile * (din_p + dout_p) * x.dtype.itemsize
    scr_bytes = batch_tile * (4 * d_p + 2 * ffn_chunk) * 4
    vmem_limit = int(min(max(2 * (wbytes + vbytes) + io_bytes + scr_bytes
                             + (8 << 20), 32 << 20), 64 << 20))

    def run(single_buffer_weights):
        def const_spec(shape):
            n = len(shape)
            idx = lambda i: (0,) * n          # same block every step: loaded once
            if single_buffer_weights:
                # Weights dominate VMEM; one buffer is enough for constants.
                return pl.BlockSpec(shape, idx, pipeline_mode=pl.Buffered(1))
            return pl.BlockSpec(shape, idx)

        return pl.pallas_call(
            kernel,
            out_shape=jax.ShapeDtypeStruct((Bp, dout_p), x.dtype),
            grid_spec=pltpu.PrefetchScalarGridSpec(
                num_scalar_prefetch=0,
                grid=(Bp // batch_tile,),
                in_specs=[
                    pl.BlockSpec((batch_tile, din_p), lambda i: (i, 0)),
                    const_spec((din_p, d_p)),              # input linear weight
                    const_spec((1, d_p)),                  # input linear bias
                    const_spec((num_blocks, d_p, h_p)),    # stacked dense1 weights
                    const_spec((num_blocks, h_p, d_p)),    # stacked dense2 weights
                    const_spec((num_blocks, 4, vmax)),     # gamma/beta/b1/b2 slab
                    const_spec((d_p, dout_p)),             # output linear weight
                    const_spec((1, dout_p)),               # output linear bias
                ],
                out_specs=pl.BlockSpec((batch_tile, dout_p), lambda i: (i, 0)),
            ),
            compiler_params=pltpu.CompilerParams(
                dimension_semantics=("parallel",),
                vmem_limit_bytes=vmem_limit),
        )(x_p, a["w_in"], a["b_in"], a["w1s"], a["w2s"], a["vecs"],
          a["w_out"], a["b_out"])

    try:
        out_p = run(single_buffer_weights=True)
    except Exception:
        # pipeline_mode=pl.Buffered(1) not supported by this jax build:
        # fall back to the default (double-buffered) constant specs.
        out_p = run(single_buffer_weights=False)

    return out_p[:B, :meta["out_dim"]]


# ----------------------------------------------------------------------------
# Pure-JAX reference (for correctness check)
# ----------------------------------------------------------------------------
def mlp_resnet_reference(x, params, eps=1e-5):
    h = x @ params["w_in"] + params["b_in"]
    for blk in params["blocks"]:
        res = h
        mu = jnp.mean(h, axis=-1, keepdims=True)
        var = jnp.mean((h - mu) ** 2, axis=-1, keepdims=True)
        xh = (h - mu) * jax.lax.rsqrt(var + eps)
        xh = xh * blk["gamma"] + blk["beta"]
        y = jnp.maximum(xh @ blk["w1"] + blk["b1"], 0.0)
        y = y @ blk["w2"] + blk["b2"]
        h = res + y
    h = jnp.maximum(h, 0.0)
    return h @ params["w_out"] + params["b_out"]


# ----------------------------------------------------------------------------
# Deterministic parameter init (weights stored as (in_features, out_features))
# ----------------------------------------------------------------------------
def init_params(key, num_blocks, in_dim, hidden_dim, out_dim):
    def dense(k, din, dout):
        kw, kb = jax.random.split(k)
        scale = 1.0 / jnp.sqrt(jnp.float32(din))
        w = jax.random.uniform(kw, (din, dout), jnp.float32, -scale, scale)
        b = jax.random.uniform(kb, (dout,), jnp.float32, -scale, scale)
        return w, b

    keys = jax.random.split(key, 2 + num_blocks)
    w_in, b_in = dense(keys[0], in_dim, hidden_dim)
    w_out, b_out = dense(keys[1], hidden_dim, out_dim)
    blocks = []
    for i in range(num_blocks):
        k1, k2 = jax.random.split(keys[2 + i])
        w1, b1 = dense(k1, hidden_dim, hidden_dim * 4)
        w2, b2 = dense(k2, hidden_dim * 4, hidden_dim)
        blocks.append(dict(
            gamma=jnp.ones((hidden_dim,), jnp.float32),
            beta=jnp.zeros((hidden_dim,), jnp.float32),
            w1=w1, b1=b1, w2=w2, b2=b2,
        ))
    return dict(w_in=w_in, b_in=b_in, w_out=w_out, b_out=b_out, blocks=blocks)


# ----------------------------------------------------------------------------
if __name__ == "__main__":
    NUM_BLOCKS = 2
    IN_DIM = 16
    HIDDEN_DIM = 32
    OUT_DIM = 8
    BATCH = 256          # 2 grid steps of 128 rows -> both v7x TCs get work

    key = jax.random.PRNGKey(0)
    kx, kp = jax.random.split(key)
    x = jax.random.normal(kx, (BATCH, IN_DIM), jnp.float32)
    params = init_params(kp, NUM_BLOCKS, IN_DIM, HIDDEN_DIM, OUT_DIM)

    prepared = prepare_params(params)          # one-time pad / pack / bf16 cast
    out = mlp_resnet_forward(x, prepared, batch_tile=128)
    out = jax.block_until_ready(out)

    ref = mlp_resnet_reference(x, params)
    assert out.shape == (BATCH, OUT_DIM)
    err = float(jnp.max(jnp.abs(out - ref)))
    # bf16 weights + bf16 matmul operands vs an f32 reference -> loose tolerance.
    assert jnp.allclose(out, ref, atol=1e-1, rtol=1e-1), err

    # TODO(synk): dropout (training=True with a non-None dropout_rate) is not
    # implemented; this configuration uses dropout_rate=None (module default).
    print("KERNEL_OK")
</pallas_src>

<mosaic_0001>
module attributes {stable_mosaic.version = 11 : i64} {
  func.func @_fused_mlp_resnet_kernel(%arg0: i32, %arg1: memref<128x16xf32, #tpu.memory_space<vmem>>, %arg2: memref<16x128xbf16, #tpu.memory_space<vmem>>, %arg3: memref<1x128xf32, #tpu.memory_space<vmem>>, %arg4: memref<2x128x128xbf16, #tpu.memory_space<vmem>>, %arg5: memref<2x128x128xbf16, #tpu.memory_space<vmem>>, %arg6: memref<2x4x128xf32, #tpu.memory_space<vmem>>, %arg7: memref<128x128xbf16, #tpu.memory_space<vmem>>, %arg8: memref<1x128xf32, #tpu.memory_space<vmem>>, %arg9: memref<128x128xf32, #tpu.memory_space<vmem>>) attributes {dimension_semantics = [#tpu.dimension_semantics<parallel>], iteration_bounds = array<i64: 2>, scalar_prefetch = 0 : i64, scratch_operands = 0 : i64, tpu.core_type = #tpu.core_type<tc>, window_params = [{transform_indices = @transform_0, window_bounds = array<i64: 128, 16>}, {pipeline_mode = #tpu.pipeline_mode<synchronous>, transform_indices = @transform_1, window_bounds = array<i64: 16, 128>}, {pipeline_mode = #tpu.pipeline_mode<synchronous>, transform_indices = @transform_2, window_bounds = array<i64: 1, 128>}, {pipeline_mode = #tpu.pipeline_mode<synchronous>, transform_indices = @transform_3, window_bounds = array<i64: 2, 128, 128>}, {pipeline_mode = #tpu.pipeline_mode<synchronous>, transform_indices = @transform_4, window_bounds = array<i64: 2, 128, 128>}, {pipeline_mode = #tpu.pipeline_mode<synchronous>, transform_indices = @transform_5, window_bounds = array<i64: 2, 4, 128>}, {pipeline_mode = #tpu.pipeline_mode<synchronous>, transform_indices = @transform_6, window_bounds = array<i64: 128, 128>}, {pipeline_mode = #tpu.pipeline_mode<synchronous>, transform_indices = @transform_7, window_bounds = array<i64: 1, 128>}, {transform_indices = @transform_8, window_bounds = array<i64: 128, 128>}]} {
    %c0 = arith.constant 0 : index
    %c0_0 = arith.constant 0 : index
    %0 = vector.load %arg1[%c0, %c0_0] : memref<128x16xf32, #tpu.memory_space<vmem>>, vector<128x16xf32>
    %1 = arith.truncf %0 : vector<128x16xf32> to vector<128x16xbf16>
    %c0_1 = arith.constant 0 : index
    %c0_2 = arith.constant 0 : index
    %2 = vector.load %arg2[%c0_1, %c0_2] : memref<16x128xbf16, #tpu.memory_space<vmem>>, vector<16x128xbf16>
    %cst = arith.constant dense<0.000000e+00> : vector<128x128xf32>
    %3 = tpu.matmul %1, %2, %cst {dimension_numbers = #tpu.dot_dimension_numbers<[1], [0], [0], [1], [0, 0, 1, 1], [], []>} : vector<128x16xbf16>, vector<16x128xbf16>, vector<128x128xf32> -> vector<128x128xf32>
    %c0_3 = arith.constant 0 : index
    %c0_4 = arith.constant 0 : index
    %4 = vector.load %arg3[%c0_3, %c0_4] : memref<1x128xf32, #tpu.memory_space<vmem>>, vector<1x128xf32>
    %5 = vector.broadcast %4 : vector<1x128xf32> to vector<128x128xf32>
    %6 = arith.addf %3, %5 : vector<128x128xf32>
    %c0_5 = arith.constant 0 : index
    %c0_6 = arith.constant 0 : index
    %c0_7 = arith.constant 0 : index
    %7 = vector.load %arg6[%c0_5, %c0_6, %c0_7] : memref<2x4x128xf32, #tpu.memory_space<vmem>>, vector<1x4x128xf32>
    %8 = vector.shape_cast %7 : vector<1x4x128xf32> to vector<4x128xf32>
    %9 = vector.extract_strided_slice %8 {offsets = [0, 0], sizes = [1, 128], strides = [1, 1]} : vector<4x128xf32> to vector<1x128xf32>
    %10 = vector.extract_strided_slice %8 {offsets = [1, 0], sizes = [1, 128], strides = [1, 1]} : vector<4x128xf32> to vector<1x128xf32>
    %11 = vector.extract_strided_slice %8 {offsets = [2, 0], sizes = [1, 128], strides = [1, 1]} : vector<4x128xf32> to vector<1x128xf32>
    %12 = vector.extract_strided_slice %8 {offsets = [3, 0], sizes = [1, 128], strides = [1, 1]} : vector<4x128xf32> to vector<1x128xf32>
    %cst_8 = arith.constant dense<0.000000e+00> : vector<128xf32>
    %13 = vector.multi_reduction <add>, %6, %cst_8 [1] : vector<128x128xf32> to vector<128xf32>
    %14 = vector.shape_cast %13 : vector<128xf32> to vector<128x1xf32>
    %cst_9 = arith.constant 3.125000e-02 : f32
    %15 = vector.broadcast %cst_9 : f32 to vector<128x1xf32>
    %16 = arith.mulf %14, %15 : vector<128x1xf32>
    %17 = vector.broadcast %16 : vector<128x1xf32> to vector<128x128xf32>
    %18 = arith.subf %6, %17 : vector<128x128xf32>
    %19 = arith.mulf %18, %18 : vector<128x128xf32>
    %cst_10 = arith.constant dense<0.000000e+00> : vector<128xf32>
    %20 = vector.multi_reduction <add>, %19, %cst_10 [1] : vector<128x128xf32> to vector<128xf32>
    %21 = vector.shape_cast %20 : vector<128xf32> to vector<128x1xf32>
    %cst_11 = arith.constant 9.600000e+01 : f32
    %22 = vector.broadcast %cst_11 : f32 to vector<128x1xf32>
    %23 = arith.mulf %22, %16 : vector<128x1xf32>
    %24 = arith.mulf %23, %16 : vector<128x1xf32>
    %25 = arith.subf %21, %24 : vector<128x1xf32>
    %cst_12 = arith.constant 3.125000e-02 : f32
    %26 = vector.broadcast %cst_12 : f32 to vector<128x1xf32>
    %27 = arith.mulf %25, %26 : vector<128x1xf32>
    %cst_13 = arith.constant 0.000000e+00 : f32
    %28 = vector.broadcast %cst_13 : f32 to vector<128x1xf32>
    %29 = arith.maximumf %27, %28 : vector<128x1xf32>
    %cst_14 = arith.constant 9.99999974E-6 : f32
    %30 = vector.broadcast %cst_14 : f32 to vector<128x1xf32>
    %31 = arith.addf %29, %30 : vector<128x1xf32>
    %32 = math.rsqrt %31 : vector<128x1xf32>
    %33 = vector.broadcast %32 : vector<128x1xf32> to vector<128x128xf32>
    %34 = arith.mulf %18, %33 : vector<128x128xf32>
    %35 = vector.broadcast %9 : vector<1x128xf32> to vector<128x128xf32>
    %36 = arith.mulf %34, %35 : vector<128x128xf32>
    %37 = vector.broadcast %10 : vector<1x128xf32> to vector<128x128xf32>
    %38 = arith.addf %36, %37 : vector<128x128xf32>
    %39 = arith.truncf %38 : vector<128x128xf32> to vector<128x128xbf16>
    %cst_15 = arith.constant 0.000000e+00 : f32
    %40 = vector.broadcast %cst_15 : f32 to vector<128x128xf32>
    %c0_i32 = arith.constant 0 : i32
    %c0_i32_16 = arith.constant 0 : i32
    %c0_i32_17 = arith.constant 0 : i32
    %41 = tpu.memref_slice %arg4[%c0_i32, %c0_i32_16, %c0_i32_17] : memref<2x128x128xbf16, #tpu.memory_space<vmem>> -> memref<1x128x128xbf16, #tpu.memory_space<vmem>>
    %42 = tpu.memref_squeeze %41 : memref<1x128x128xbf16, #tpu.memory_space<vmem>> -> memref<128x128xbf16, #tpu.memory_space<vmem>>
    %c0_18 = arith.constant 0 : index
    %c0_19 = arith.constant 0 : index
    %43 = vector.load %42[%c0_18, %c0_19] : memref<128x128xbf16, #tpu.memory_space<vmem>>, vector<128x128xbf16>
    %cst_20 = arith.constant dense<0.000000e+00> : vector<128x128xf32>
    %44 = tpu.matmul %39, %43, %cst_20 {dimension_numbers = #tpu.dot_dimension_numbers<[1], [0], [0], [1], [0, 0, 1, 1], [], []>} : vector<128x128xbf16>, vector<128x128xbf16>, vector<128x128xf32> -> vector<128x128xf32>
    %45 = vector.broadcast %11 : vector<1x128xf32> to vector<128x128xf32>
    %46 = arith.addf %44, %45 : vector<128x128xf32>
    %cst_21 = arith.constant 0.000000e+00 : f32
    %47 = vector.broadcast %cst_21 : f32 to vector<128x128xf32>
    %48 = arith.maximumf %46, %47 : vector<128x128xf32>
    %49 = arith.truncf %48 : vector<128x128xf32> to vector<128x128xbf16>
    %c0_i32_22 = arith.constant 0 : i32
    %c0_i32_23 = arith.constant 0 : i32
    %c0_i32_24 = arith.constant 0 : i32
    %50 = tpu.memref_slice %arg5[%c0_i32_22, %c0_i32_23, %c0_i32_24] : memref<2x128x128xbf16, #tpu.memory_space<vmem>> -> memref<1x128x128xbf16, #tpu.memory_space<vmem>>
    %51 = tpu.memref_squeeze %50 : memref<1x128x128xbf16, #tpu.memory_space<vmem>> -> memref<128x128xbf16, #tpu.memory_space<vmem>>
    %c0_25 = arith.constant 0 : index
    %c0_26 = arith.constant 0 : index
    %52 = vector.load %51[%c0_25, %c0_26] : memref<128x128xbf16, #tpu.memory_space<vmem>>, vector<128x128xbf16>
    %cst_27 = arith.constant dense<0.000000e+00> : vector<128x128xf32>
    %53 = tpu.matmul %49, %52, %cst_27 {dimension_numbers = #tpu.dot_dimension_numbers<[1], [0], [0], [1], [0, 0, 1, 1], [], []>} : vector<128x128xbf16>, vector<128x128xbf16>, vector<128x128xf32> -> vector<128x128xf32>
    %54 = arith.addf %40, %53 : vector<128x128xf32>
    %55 = arith.addf %6, %54 : vector<128x128xf32>
    %56 = vector.broadcast %12 : vector<1x128xf32> to vector<128x128xf32>
    %57 = arith.addf %55, %56 : vector<128x128xf32>
    %c1 = arith.constant 1 : index
    %c0_28 = arith.constant 0 : index
    %c0_29 = arith.constant 0 : index
    %58 = vector.load %arg6[%c1, %c0_28, %c0_29] : memref<2x4x128xf32, #tpu.memory_space<vmem>>, vector<1x4x128xf32>
    %59 = vector.shape_cast %58 : vector<1x4x128xf32> to vector<4x128xf32>
    %60 = vector.extract_strided_slice %59 {offsets = [0, 0], sizes = [1, 128], strides = [1, 1]} : vector<4x128xf32> to vector<1x128xf32>
    %61 = vector.extract_strided_slice %59 {offsets = [1, 0], sizes = [1, 128], strides = [1, 1]} : vector<4x128xf32> to vector<1x128xf32>
    %62 = vector.extract_strided_slice %59 {offsets = [2, 0], sizes = [1, 128], strides = [1, 1]} : vector<4x128xf32> to vector<1x128xf32>
    %63 = vector.extract_strided_slice %59 {offsets = [3, 0], sizes = [1, 128], strides = [1, 1]} : vector<4x128xf32> to vector<1x128xf32>
    %cst_30 = arith.constant dense<0.000000e+00> : vector<128xf32>
    %64 = vector.multi_reduction <add>, %57, %cst_30 [1] : vector<128x128xf32> to vector<128xf32>
    %65 = vector.shape_cast %64 : vector<128xf32> to vector<128x1xf32>
    %cst_31 = arith.constant 3.125000e-02 : f32
    %66 = vector.broadcast %cst_31 : f32 to vector<128x1xf32>
    %67 = arith.mulf %65, %66 : vector<128x1xf32>
    %68 = vector.broadcast %67 : vector<128x1xf32> to vector<128x128xf32>
    %69 = arith.subf %57, %68 : vector<128x128xf32>
    %70 = arith.mulf %69, %69 : vector<128x128xf32>
    %cst_32 = arith.constant dense<0.000000e+00> : vector<128xf32>
    %71 = vector.multi_reduction <add>, %70, %cst_32 [1] : vector<128x128xf32> to vector<128xf32>
    %72 = vector.shape_cast %71 : vector<128xf32> to vector<128x1xf32>
    %cst_33 = arith.constant 9.600000e+01 : f32
    %73 = vector.broadcast %cst_33 : f32 to vector<128x1xf32>
    %74 = arith.mulf %73, %67 : vector<128x1xf32>
    %75 = arith.mulf %74, %67 : vector<128x1xf32>
    %76 = arith.subf %72, %75 : vector<128x1xf32>
    %cst_34 = arith.constant 3.125000e-02 : f32
    %77 = vector.broadcast %cst_34 : f32 to vector<128x1xf32>
    %78 = arith.mulf %76, %77 : vector<128x1xf32>
    %cst_35 = arith.constant 0.000000e+00 : f32
    %79 = vector.broadcast %cst_35 : f32 to vector<128x1xf32>
    %80 = arith.maximumf %78, %79 : vector<128x1xf32>
    %cst_36 = arith.constant 9.99999974E-6 : f32
    %81 = vector.broadcast %cst_36 : f32 to vector<128x1xf32>
    %82 = arith.addf %80, %81 : vector<128x1xf32>
    %83 = math.rsqrt %82 : vector<128x1xf32>
    %84 = vector.broadcast %83 : vector<128x1xf32> to vector<128x128xf32>
    %85 = arith.mulf %69, %84 : vector<128x128xf32>
    %86 = vector.broadcast %60 : vector<1x128xf32> to vector<128x128xf32>
    %87 = arith.mulf %85, %86 : vector<128x128xf32>
    %88 = vector.broadcast %61 : vector<1x128xf32> to vector<128x128xf32>
    %89 = arith.addf %87, %88 : vector<128x128xf32>
    %90 = arith.truncf %89 : vector<128x128xf32> to vector<128x128xbf16>
    %cst_37 = arith.constant 0.000000e+00 : f32
    %91 = vector.broadcast %cst_37 : f32 to vector<128x128xf32>
    %c1_i32 = arith.constant 1 : i32
    %c0_i32_38 = arith.constant 0 : i32
    %c0_i32_39 = arith.constant 0 : i32
    %92 = tpu.memref_slice %arg4[%c1_i32, %c0_i32_38, %c0_i32_39] : memref<2x128x128xbf16, #tpu.memory_space<vmem>> -> memref<1x128x128xbf16, #tpu.memory_space<vmem>>
    %93 = tpu.memref_squeeze %92 : memref<1x128x128xbf16, #tpu.memory_space<vmem>> -> memref<128x128xbf16, #tpu.memory_space<vmem>>
    %c0_40 = arith.constant 0 : index
    %c0_41 = arith.constant 0 : index
    %94 = vector.load %93[%c0_40, %c0_41] : memref<128x128xbf16, #tpu.memory_space<vmem>>, vector<128x128xbf16>
    %cst_42 = arith.constant dense<0.000000e+00> : vector<128x128xf32>
    %95 = tpu.matmul %90, %94, %cst_42 {dimension_numbers = #tpu.dot_dimension_numbers<[1], [0], [0], [1], [0, 0, 1, 1], [], []>} : vector<128x128xbf16>, vector<128x128xbf16>, vector<128x128xf32> -> vector<128x128xf32>
    %96 = vector.broadcast %62 : vector<1x128xf32> to vector<128x128xf32>
    %97 = arith.addf %95, %96 : vector<128x128xf32>
    %cst_43 = arith.constant 0.000000e+00 : f32
    %98 = vector.broadcast %cst_43 : f32 to vector<128x128xf32>
    %99 = arith.maximumf %97, %98 : vector<128x128xf32>
    %100 = arith.truncf %99 : vector<128x128xf32> to vector<128x128xbf16>
    %c1_i32_44 = arith.constant 1 : i32
    %c0_i32_45 = arith.constant 0 : i32
    %c0_i32_46 = arith.constant 0 : i32
    %101 = tpu.memref_slice %arg5[%c1_i32_44, %c0_i32_45, %c0_i32_46] : memref<2x128x128xbf16, #tpu.memory_space<vmem>> -> memref<1x128x128xbf16, #tpu.memory_space<vmem>>
    %102 = tpu.memref_squeeze %101 : memref<1x128x128xbf16, #tpu.memory_space<vmem>> -> memref<128x128xbf16, #tpu.memory_space<vmem>>
    %c0_47 = arith.constant 0 : index
    %c0_48 = arith.constant 0 : index
    %103 = vector.load %102[%c0_47, %c0_48] : memref<128x128xbf16, #tpu.memory_space<vmem>>, vector<128x128xbf16>
    %cst_49 = arith.constant dense<0.000000e+00> : vector<128x128xf32>
    %104 = tpu.matmul %100, %103, %cst_49 {dimension_numbers = #tpu.dot_dimension_numbers<[1], [0], [0], [1], [0, 0, 1, 1], [], []>} : vector<128x128xbf16>, vector<128x128xbf16>, vector<128x128xf32> -> vector<128x128xf32>
    %105 = arith.addf %91, %104 : vector<128x128xf32>
    %106 = arith.addf %57, %105 : vector<128x128xf32>
    %107 = vector.broadcast %63 : vector<1x128xf32> to vector<128x128xf32>
    %108 = arith.addf %106, %107 : vector<128x128xf32>
    %cst_50 = arith.constant 0.000000e+00 : f32
    %109 = vector.broadcast %cst_50 : f32 to vector<128x128xf32>
    %110 = arith.maximumf %108, %109 : vector<128x128xf32>
    %111 = arith.truncf %110 : vector<128x128xf32> to vector<128x128xbf16>
    %c0_51 = arith.constant 0 : index
    %c0_52 = arith.constant 0 : index
    %112 = vector.load %arg7[%c0_51, %c0_52] : memref<128x128xbf16, #tpu.memory_space<vmem>>, vector<128x128xbf16>
    %cst_53 = arith.constant dense<0.000000e+00> : vector<128x128xf32>
    %113 = tpu.matmul %111, %112, %cst_53 {dimension_numbers = #tpu.dot_dimension_numbers<[1], [0], [0], [1], [0, 0, 1, 1], [], []>} : vector<128x128xbf16>, vector<128x128xbf16>, vector<128x128xf32> -> vector<128x128xf32>
    %c0_54 = arith.constant 0 : index
    %c0_55 = arith.constant 0 : index
    %114 = vector.load %arg8[%c0_54, %c0_55] : memref<1x128xf32, #tpu.memory_space<vmem>>, vector<1x128xf32>
    %115 = vector.broadcast %114 : vector<1x128xf32> to vector<128x128xf32>
    %116 = arith.addf %113, %115 : vector<128x128xf32>
    %c0_56 = arith.constant 0 : index
    %c0_57 = arith.constant 0 : index
    %117 = vector.load %arg9[%c0_56, %c0_57] : memref<128x128xf32, #tpu.memory_space<vmem>>, vector<128x128xf32>
    tpu.vector_store %arg9[%c0_56, %c0_57], %116 {strides = array<i32>} : memref<128x128xf32, #tpu.memory_space<vmem>>, vector<128x128xf32>,
    return
  }
  func.func @transform_0(%arg0: i32) -> (i32, i32) {
    %c0_i32 = arith.constant 0 : i32
    %c0_i32_0 = arith.constant 0 : i32
    return %arg0, %c0_i32 : i32, i32
  }
  func.func @transform_1(%arg0: i32) -> (i32, i32) {
    %c0_i32 = arith.constant 0 : i32
    %c0_i32_0 = arith.constant 0 : i32
    %c0_i32_1 = arith.constant 0 : i32
    return %c0_i32, %c0_i32_0 : i32, i32
  }
  func.func @transform_2(%arg0: i32) -> (i32, i32) {
    %c0_i32 = arith.constant 0 : i32
    %c0_i32_0 = arith.constant 0 : i32
    %c0_i32_1 = arith.constant 0 : i32
    return %c0_i32, %c0_i32_0 : i32, i32
  }
  func.func @transform_3(%arg0: i32) -> (i32, i32, i32) {
    %c0_i32 = arith.constant 0 : i32
    %c0_i32_0 = arith.constant 0 : i32
    %c0_i32_1 = arith.constant 0 : i32
    %c0_i32_2 = arith.constant 0 : i32
    return %c0_i32, %c0_i32_0, %c0_i32_1 : i32, i32, i32
  }
  func.func @transform_4(%arg0: i32) -> (i32, i32, i32) {
    %c0_i32 = arith.constant 0 : i32
    %c0_i32_0 = arith.constant 0 : i32
    %c0_i32_1 = arith.constant 0 : i32
    %c0_i32_2 = arith.constant 0 : i32
    return %c0_i32, %c0_i32_0, %c0_i32_1 : i32, i32, i32
  }
  func.func @transform_5(%arg0: i32) -> (i32, i32, i32) {
    %c0_i32 = arith.constant 0 : i32
    %c0_i32_0 = arith.constant 0 : i32
    %c0_i32_1 = arith.constant 0 : i32
    %c0_i32_2 = arith.constant 0 : i32
    return %c0_i32, %c0_i32_0, %c0_i32_1 : i32, i32, i32
  }
  func.func @transform_6(%arg0: i32) -> (i32, i32) {
    %c0_i32 = arith.constant 0 : i32
    %c0_i32_0 = arith.constant 0 : i32
    %c0_i32_1 = arith.constant 0 : i32
    return %c0_i32, %c0_i32_0 : i32, i32
  }
  func.func @transform_7(%arg0: i32) -> (i32, i32) {
    %c0_i32 = arith.constant 0 : i32
    %c0_i32_0 = arith.constant 0 : i32
    %c0_i32_1 = arith.constant 0 : i32
    return %c0_i32, %c0_i32_0 : i32, i32
  }
  func.func @transform_8(%arg0: i32) -> (i32, i32) {
    %c0_i32 = arith.constant 0 : i32
    %c0_i32_0 = arith.constant 0 : i32
    return %arg0, %c0_i32 : i32, i32
  }
}

module attributes {stable_mosaic.version = 11 : i64} {
  func.func @_fused_mlp_resnet_kernel(%arg0: i32, %arg1: memref<128x16xf32, #tpu.memory_space<vmem>>, %arg2: memref<16x128xbf16, #tpu.memory_space<vmem>>, %arg3: memref<1x128xf32, #tpu.memory_space<vmem>>, %arg4: memref<2x128x128xbf16, #tpu.memory_space<vmem>>, %arg5: memref<2x128x128xbf16, #tpu.memory_space<vmem>>, %arg6: memref<2x4x128xf32, #tpu.memory_space<vmem>>, %arg7: memref<128x128xbf16, #tpu.memory_space<vmem>>, %arg8: memref<1x128xf32, #tpu.memory_space<vmem>>, %arg9: memref<128x128xf32, #tpu.memory_space<vmem>>) attributes {dimension_semantics = [#tpu.dimension_semantics<parallel>], iteration_bounds = array<i64: 2>, scalar_prefetch = 0 : i64, scratch_operands = 0 : i64, tpu.core_type = #tpu.core_type<tc>, window_params = [{transform_indices = @transform_0, window_bounds = array<i64: 128, 16>}, {pipeline_mode = #tpu.pipeline_mode<synchronous>, transform_indices = @transform_1, window_bounds = array<i64: 16, 128>}, {pipeline_mode = #tpu.pipeline_mode<synchronous>, transform_indices = @transform_2, window_bounds = array<i64: 1, 128>}, {pipeline_mode = #tpu.pipeline_mode<synchronous>, transform_indices = @transform_3, window_bounds = array<i64: 2, 128, 128>}, {pipeline_mode = #tpu.pipeline_mode<synchronous>, transform_indices = @transform_4, window_bounds = array<i64: 2, 128, 128>}, {pipeline_mode = #tpu.pipeline_mode<synchronous>, transform_indices = @transform_5, window_bounds = array<i64: 2, 4, 128>}, {pipeline_mode = #tpu.pipeline_mode<synchronous>, transform_indices = @transform_6, window_bounds = array<i64: 128, 128>}, {pipeline_mode = #tpu.pipeline_mode<synchronous>, transform_indices = @transform_7, window_bounds = array<i64: 1, 128>}, {transform_indices = @transform_8, window_bounds = array<i64: 128, 128>}]} {
    %c0 = arith.constant 0 : index
    %c0_0 = arith.constant 0 : index
    %0 = vector.load %arg1[%c0, %c0_0] : memref<128x16xf32, #tpu.memory_space<vmem>>, vector<128x16xf32>
    %1 = arith.truncf %0 : vector<128x16xf32> to vector<128x16xbf16>
    %c0_1 = arith.constant 0 : index
    %c0_2 = arith.constant 0 : index
    %2 = vector.load %arg2[%c0_1, %c0_2] : memref<16x128xbf16, #tpu.memory_space<vmem>>, vector<16x128xbf16>
    %cst = arith.constant dense<0.000000e+00> : vector<128x128xf32>
    %3 = tpu.matmul %1, %2, %cst {dimension_numbers = #tpu.dot_dimension_numbers<[1], [0], [0], [1], [0, 0, 1, 1], [], []>} : vector<128x16xbf16>, vector<16x128xbf16>, vector<128x128xf32> -> vector<128x128xf32>
    %c0_3 = arith.constant 0 : index
    %c0_4 = arith.constant 0 : index
    %4 = vector.load %arg3[%c0_3, %c0_4] : memref<1x128xf32, #tpu.memory_space<vmem>>, vector<1x128xf32>
    %5 = vector.broadcast %4 : vector<1x128xf32> to vector<128x128xf32>
    %6 = arith.addf %3, %5 : vector<128x128xf32>
    %c0_5 = arith.constant 0 : index
    %c0_6 = arith.constant 0 : index
    %c0_7 = arith.constant 0 : index
    %7 = vector.load %arg6[%c0_5, %c0_6, %c0_7] : memref<2x4x128xf32, #tpu.memory_space<vmem>>, vector<1x4x128xf32>
    %8 = vector.shape_cast %7 : vector<1x4x128xf32> to vector<4x128xf32>
    %9 = vector.extract_strided_slice %8 {offsets = [0, 0], sizes = [1, 128], strides = [1, 1]} : vector<4x128xf32> to vector<1x128xf32>
    %10 = vector.extract_strided_slice %8 {offsets = [1, 0], sizes = [1, 128], strides = [1, 1]} : vector<4x128xf32> to vector<1x128xf32>
    %11 = vector.extract_strided_slice %8 {offsets = [2, 0], sizes = [1, 128], strides = [1, 1]} : vector<4x128xf32> to vector<1x128xf32>
    %12 = vector.extract_strided_slice %8 {offsets = [3, 0], sizes = [1, 128], strides = [1, 1]} : vector<4x128xf32> to vector<1x128xf32>
    %cst_8 = arith.constant dense<0.000000e+00> : vector<128xf32>
    %13 = vector.multi_reduction <add>, %6, %cst_8 [1] : vector<128x128xf32> to vector<128xf32>
    %14 = vector.shape_cast %13 : vector<128xf32> to vector<128x1xf32>
    %cst_9 = arith.constant 3.125000e-02 : f32
    %15 = vector.broadcast %cst_9 : f32 to vector<128x1xf32>
    %16 = arith.mulf %14, %15 : vector<128x1xf32>
    %17 = vector.broadcast %16 : vector<128x1xf32> to vector<128x128xf32>
    %18 = arith.subf %6, %17 : vector<128x128xf32>
    %19 = arith.mulf %18, %18 : vector<128x128xf32>
    %cst_10 = arith.constant dense<0.000000e+00> : vector<128xf32>
    %20 = vector.multi_reduction <add>, %19, %cst_10 [1] : vector<128x128xf32> to vector<128xf32>
    %21 = vector.shape_cast %20 : vector<128xf32> to vector<128x1xf32>
    %cst_11 = arith.constant 9.600000e+01 : f32
    %22 = vector.broadcast %cst_11 : f32 to vector<128x1xf32>
    %23 = arith.mulf %22, %16 : vector<128x1xf32>
    %24 = arith.mulf %23, %16 : vector<128x1xf32>
    %25 = arith.subf %21, %24 : vector<128x1xf32>
    %cst_12 = arith.constant 3.125000e-02 : f32
    %26 = vector.broadcast %cst_12 : f32 to vector<128x1xf32>
    %27 = arith.mulf %25, %26 : vector<128x1xf32>
    %cst_13 = arith.constant 0.000000e+00 : f32
    %28 = vector.broadcast %cst_13 : f32 to vector<128x1xf32>
    %29 = arith.maximumf %27, %28 : vector<128x1xf32>
    %cst_14 = arith.constant 9.99999974E-6 : f32
    %30 = vector.broadcast %cst_14 : f32 to vector<128x1xf32>
    %31 = arith.addf %29, %30 : vector<128x1xf32>
    %32 = math.rsqrt %31 : vector<128x1xf32>
    %33 = vector.broadcast %32 : vector<128x1xf32> to vector<128x128xf32>
    %34 = arith.mulf %18, %33 : vector<128x128xf32>
    %35 = vector.broadcast %9 : vector<1x128xf32> to vector<128x128xf32>
    %36 = arith.mulf %34, %35 : vector<128x128xf32>
    %37 = vector.broadcast %10 : vector<1x128xf32> to vector<128x128xf32>
    %38 = arith.addf %36, %37 : vector<128x128xf32>
    %39 = arith.truncf %38 : vector<128x128xf32> to vector<128x128xbf16>
    %cst_15 = arith.constant 0.000000e+00 : f32
    %40 = vector.broadcast %cst_15 : f32 to vector<128x128xf32>
    %c0_i32 = arith.constant 0 : i32
    %c0_i32_16 = arith.constant 0 : i32
    %c0_i32_17 = arith.constant 0 : i32
    %41 = tpu.memref_slice %arg4[%c0_i32, %c0_i32_16, %c0_i32_17] : memref<2x128x128xbf16, #tpu.memory_space<vmem>> -> memref<1x128x128xbf16, #tpu.memory_space<vmem>>
    %42 = tpu.memref_squeeze %41 : memref<1x128x128xbf16, #tpu.memory_space<vmem>> -> memref<128x128xbf16, #tpu.memory_space<vmem>>
    %c0_18 = arith.constant 0 : index
    %c0_19 = arith.constant 0 : index
    %43 = vector.load %42[%c0_18, %c0_19] : memref<128x128xbf16, #tpu.memory_space<vmem>>, vector<128x128xbf16>
    %cst_20 = arith.constant dense<0.000000e+00> : vector<128x128xf32>
    %44 = tpu.matmul %39, %43, %cst_20 {dimension_numbers = #tpu.dot_dimension_numbers<[1], [0], [0], [1], [0, 0, 1, 1], [], []>} : vector<128x128xbf16>, vector<128x128xbf16>, vector<128x128xf32> -> vector<128x128xf32>
    %45 = vector.broadcast %11 : vector<1x128xf32> to vector<128x128xf32>
    %46 = arith.addf %44, %45 : vector<128x128xf32>
    %cst_21 = arith.constant 0.000000e+00 : f32
    %47 = vector.broadcast %cst_21 : f32 to vector<128x128xf32>
    %48 = arith.maximumf %46, %47 : vector<128x128xf32>
    %49 = arith.truncf %48 : vector<128x128xf32> to vector<128x128xbf16>
    %c0_i32_22 = arith.constant 0 : i32
    %c0_i32_23 = arith.constant 0 : i32
    %c0_i32_24 = arith.constant 0 : i32
    %50 = tpu.memref_slice %arg5[%c0_i32_22, %c0_i32_23, %c0_i32_24] : memref<2x128x128xbf16, #tpu.memory_space<vmem>> -> memref<1x128x128xbf16, #tpu.memory_space<vmem>>
    %51 = tpu.memref_squeeze %50 : memref<1x128x128xbf16, #tpu.memory_space<vmem>> -> memref<128x128xbf16, #tpu.memory_space<vmem>>
    %c0_25 = arith.constant 0 : index
    %c0_26 = arith.constant 0 : index
    %52 = vector.load %51[%c0_25, %c0_26] : memref<128x128xbf16, #tpu.memory_space<vmem>>, vector<128x128xbf16>
    %cst_27 = arith.constant dense<0.000000e+00> : vector<128x128xf32>
    %53 = tpu.matmul %49, %52, %cst_27 {dimension_numbers = #tpu.dot_dimension_numbers<[1], [0], [0], [1], [0, 0, 1, 1], [], []>} : vector<128x128xbf16>, vector<128x128xbf16>, vector<128x128xf32> -> vector<128x128xf32>
    %54 = arith.addf %40, %53 : vector<128x128xf32>
    %55 = arith.addf %6, %54 : vector<128x128xf32>
    %56 = vector.broadcast %12 : vector<1x128xf32> to vector<128x128xf32>
    %57 = arith.addf %55, %56 : vector<128x128xf32>
    %c1 = arith.constant 1 : index
    %c0_28 = arith.constant 0 : index
    %c0_29 = arith.constant 0 : index
    %58 = vector.load %arg6[%c1, %c0_28, %c0_29] : memref<2x4x128xf32, #tpu.memory_space<vmem>>, vector<1x4x128xf32>
    %59 = vector.shape_cast %58 : vector<1x4x128xf32> to vector<4x128xf32>
    %60 = vector.extract_strided_slice %59 {offsets = [0, 0], sizes = [1, 128], strides = [1, 1]} : vector<4x128xf32> to vector<1x128xf32>
    %61 = vector.extract_strided_slice %59 {offsets = [1, 0], sizes = [1, 128], strides = [1, 1]} : vector<4x128xf32> to vector<1x128xf32>
    %62 = vector.extract_strided_slice %59 {offsets = [2, 0], sizes = [1, 128], strides = [1, 1]} : vector<4x128xf32> to vector<1x128xf32>
    %63 = vector.extract_strided_slice %59 {offsets = [3, 0], sizes = [1, 128], strides = [1, 1]} : vector<4x128xf32> to vector<1x128xf32>
    %cst_30 = arith.constant dense<0.000000e+00> : vector<128xf32>
    %64 = vector.multi_reduction <add>, %57, %cst_30 [1] : vector<128x128xf32> to vector<128xf32>
    %65 = vector.shape_cast %64 : vector<128xf32> to vector<128x1xf32>
    %cst_31 = arith.constant 3.125000e-02 : f32
    %66 = vector.broadcast %cst_31 : f32 to vector<128x1xf32>
    %67 = arith.mulf %65, %66 : vector<128x1xf32>
    %68 = vector.broadcast %67 : vector<128x1xf32> to vector<128x128xf32>
    %69 = arith.subf %57, %68 : vector<128x128xf32>
    %70 = arith.mulf %69, %69 : vector<128x128xf32>
    %cst_32 = arith.constant dense<0.000000e+00> : vector<128xf32>
    %71 = vector.multi_reduction <add>, %70, %cst_32 [1] : vector<128x128xf32> to vector<128xf32>
    %72 = vector.shape_cast %71 : vector<128xf32> to vector<128x1xf32>
    %cst_33 = arith.constant 9.600000e+01 : f32
    %73 = vector.broadcast %cst_33 : f32 to vector<128x1xf32>
    %74 = arith.mulf %73, %67 : vector<128x1xf32>
    %75 = arith.mulf %74, %67 : vector<128x1xf32>
    %76 = arith.subf %72, %75 : vector<128x1xf32>
    %cst_34 = arith.constant 3.125000e-02 : f32
    %77 = vector.broadcast %cst_34 : f32 to vector<128x1xf32>
    %78 = arith.mulf %76, %77 : vector<128x1xf32>
    %cst_35 = arith.constant 0.000000e+00 : f32
    %79 = vector.broadcast %cst_35 : f32 to vector<128x1xf32>
    %80 = arith.maximumf %78, %79 : vector<128x1xf32>
    %cst_36 = arith.constant 9.99999974E-6 : f32
    %81 = vector.broadcast %cst_36 : f32 to vector<128x1xf32>
    %82 = arith.addf %80, %81 : vector<128x1xf32>
    %83 = math.rsqrt %82 : vector<128x1xf32>
    %84 = vector.broadcast %83 : vector<128x1xf32> to vector<128x128xf32>
    %85 = arith.mulf %69, %84 : vector<128x128xf32>
    %86 = vector.broadcast %60 : vector<1x128xf32> to vector<128x128xf32>
    %87 = arith.mulf %85, %86 : vector<128x128xf32>
    %88 = vector.broadcast %61 : vector<1x128xf32> to vector<128x128xf32>
    %89 = arith.addf %87, %88 : vector<128x128xf32>
    %90 = arith.truncf %89 : vector<128x128xf32> to vector<128x128xbf16>
    %cst_37 = arith.constant 0.000000e+00 : f32
    %91 = vector.broadcast %cst_37 : f32 to vector<128x128xf32>
    %c1_i32 = arith.constant 1 : i32
    %c0_i32_38 = arith.constant 0 : i32
    %c0_i32_39 = arith.constant 0 : i32
    %92 = tpu.memref_slice %arg4[%c1_i32, %c0_i32_38, %c0_i32_39] : memref<2x128x128xbf16, #tpu.memory_space<vmem>> -> memref<1x128x128xbf16, #tpu.memory_space<vmem>>
    %93 = tpu.memref_squeeze %92 : memref<1x128x128xbf16, #tpu.memory_space<vmem>> -> memref<128x128xbf16, #tpu.memory_space<vmem>>
    %c0_40 = arith.constant 0 : index
    %c0_41 = arith.constant 0 : index
    %94 = vector.load %93[%c0_40, %c0_41] : memref<128x128xbf16, #tpu.memory_space<vmem>>, vector<128x128xbf16>
    %cst_42 = arith.constant dense<0.000000e+00> : vector<128x128xf32>
    %95 = tpu.matmul %90, %94, %cst_42 {dimension_numbers = #tpu.dot_dimension_numbers<[1], [0], [0], [1], [0, 0, 1, 1], [], []>} : vector<128x128xbf16>, vector<128x128xbf16>, vector<128x128xf32> -> vector<128x128xf32>
    %96 = vector.broadcast %62 : vector<1x128xf32> to vector<128x128xf32>
    %97 = arith.addf %95, %96 : vector<128x128xf32>
    %cst_43 = arith.constant 0.000000e+00 : f32
    %98 = vector.broadcast %cst_43 : f32 to vector<128x128xf32>
    %99 = arith.maximumf %97, %98 : vector<128x128xf32>
    %100 = arith.truncf %99 : vector<128x128xf32> to vector<128x128xbf16>
    %c1_i32_44 = arith.constant 1 : i32
    %c0_i32_45 = arith.constant 0 : i32
    %c0_i32_46 = arith.constant 0 : i32
    %101 = tpu.memref_slice %arg5[%c1_i32_44, %c0_i32_45, %c0_i32_46] : memref<2x128x128xbf16, #tpu.memory_space<vmem>> -> memref<1x128x128xbf16, #tpu.memory_space<vmem>>
    %102 = tpu.memref_squeeze %101 : memref<1x128x128xbf16, #tpu.memory_space<vmem>> -> memref<128x128xbf16, #tpu.memory_space<vmem>>
    %c0_47 = arith.constant 0 : index
    %c0_48 = arith.constant 0 : index
    %103 = vector.load %102[%c0_47, %c0_48] : memref<128x128xbf16, #tpu.memory_space<vmem>>, vector<128x128xbf16>
    %cst_49 = arith.constant dense<0.000000e+00> : vector<128x128xf32>
    %104 = tpu.matmul %100, %103, %cst_49 {dimension_numbers = #tpu.dot_dimension_numbers<[1], [0], [0], [1], [0, 0, 1, 1], [], []>} : vector<128x128xbf16>, vector<128x128xbf16>, vector<128x128xf32> -> vector<128x128xf32>
    %105 = arith.addf %91, %104 : vector<128x128xf32>
    %106 = arith.addf %57, %105 : vector<128x128xf32>
    %107 = vector.broadcast %63 : vector<1x128xf32> to vector<128x128xf32>
    %108 = arith.addf %106, %107 : vector<128x128xf32>
    %cst_50 = arith.constant 0.000000e+00 : f32
    %109 = vector.broadcast %cst_50 : f32 to vector<128x128xf32>
    %110 = arith.maximumf %108, %109 : vector<128x128xf32>
    %111 = arith.truncf %110 : vector<128x128xf32> to vector<128x128xbf16>
    %c0_51 = arith.constant 0 : index
    %c0_52 = arith.constant 0 : index
    %112 = vector.load %arg7[%c0_51, %c0_52] : memref<128x128xbf16, #tpu.memory_space<vmem>>, vector<128x128xbf16>
    %cst_53 = arith.constant dense<0.000000e+00> : vector<128x128xf32>
    %113 = tpu.matmul %111, %112, %cst_53 {dimension_numbers = #tpu.dot_dimension_numbers<[1], [0], [0], [1], [0, 0, 1, 1], [], []>} : vector<128x128xbf16>, vector<128x128xbf16>, vector<128x128xf32> -> vector<128x128xf32>
    %c0_54 = arith.constant 0 : index
    %c0_55 = arith.constant 0 : index
    %114 = vector.load %arg8[%c0_54, %c0_55] : memref<1x128xf32, #tpu.memory_space<vmem>>, vector<1x128xf32>
    %115 = vector.broadcast %114 : vector<1x128xf32> to vector<128x128xf32>
    %116 = arith.addf %113, %115 : vector<128x128xf32>
    %c0_56 = arith.constant 0 : index
    %c0_57 = arith.constant 0 : index
    %117 = vector.load %arg9[%c0_56, %c0_57] : memref<128x128xf32, #tpu.memory_space<vmem>>, vector<128x128xf32>
    tpu.vector_store %arg9[%c0_56, %c0_57], %116 {strides = array<i32>} : memref<128x128xf32, #tpu.memory_space<vmem>>, vector<128x128xf32>,
    return
  }
  func.func @transform_0(%arg0: i32) -> (i32, i32) {
    %c0_i32 = arith.constant 0 : i32
    %c0_i32_0 = arith.constant 0 : i32
    return %arg0, %c0_i32 : i32, i32
  }
  func.func @transform_1(%arg0: i32) -> (i32, i32) {
    %c0_i32 = arith.constant 0 : i32
    %c0_i32_0 = arith.constant 0 : i32
    %c0_i32_1 = arith.constant 0 : i32
    return %c0_i32, %c0_i32_0 : i32, i32
  }
  func.func @transform_2(%arg0: i32) -> (i32, i32) {
    %c0_i32 = arith.constant 0 : i32
    %c0_i32_0 = arith.constant 0 : i32
    %c0_i32_1 = arith.constant 0 : i32
    return %c0_i32, %c0_i32_0 : i32, i32
  }
  func.func @transform_3(%arg0: i32) -> (i32, i32, i32) {
    %c0_i32 = arith.constant 0 : i32
    %c0_i32_0 = arith.constant 0 : i32
    %c0_i32_1 = arith.constant 0 : i32
    %c0_i32_2 = arith.constant 0 : i32
    return %c0_i32, %c0_i32_0, %c0_i32_1 : i32, i32, i32
  }
  func.func @transform_4(%arg0: i32) -> (i32, i32, i32) {
    %c0_i32 = arith.constant 0 : i32
    %c0_i32_0 = arith.constant 0 : i32
    %c0_i32_1 = arith.constant 0 : i32
    %c0_i32_2 = arith.constant 0 : i32
    return %c0_i32, %c0_i32_0, %c0_i32_1 : i32, i32, i32
  }
  func.func @transform_5(%arg0: i32) -> (i32, i32, i32) {
    %c0_i32 = arith.constant 0 : i32
    %c0_i32_0 = arith.constant 0 : i32
    %c0_i32_1 = arith.constant 0 : i32
    %c0_i32_2 = arith.constant 0 : i32
    return %c0_i32, %c0_i32_0, %c0_i32_1 : i32, i32, i32
  }
  func.func @transform_6(%arg0: i32) -> (i32, i32) {
    %c0_i32 = arith.constant 0 : i32
    %c0_i32_0 = arith.constant 0 : i32
    %c0_i32_1 = arith.constant 0 : i32
    return %c0_i32, %c0_i32_0 : i32, i32
  }
  func.func @transform_7(%arg0: i32) -> (i32, i32) {
    %c0_i32 = arith.constant 0 : i32
    %c0_i32_0 = arith.constant 0 : i32
    %c0_i32_1 = arith.constant 0 : i32
    return %c0_i32, %c0_i32_0 : i32, i32
  }
  func.func @transform_8(%arg0: i32) -> (i32, i32) {
    %c0_i32 = arith.constant 0 : i32
    %c0_i32_0 = arith.constant 0 : i32
    return %arg0, %c0_i32 : i32, i32
  }
}

</mosaic_0001>

<bundles_post_ra>
// kernel: tpu_custom_call.1
= control target key start
LH: loop header
LB: loop body
LE: loop exit
PB: predicated region body
PF: predicated region fallthrough
CT: control target
= control target key end

     0   :  { %13 = vsyncpa [#allocation3], 0  ;;  %s3746_s0 = inlined_call_operand.vmem [shape: f32[256,16], index: 0, kind: input, shape index: {}]   ;;  %s3747_s1 = inlined_call_operand.vmem [shape: bf16[16,128], index: 1, kind: input, shape index: {}]   ;;  %s3748_s2 = inlined_call_operand.vmem [shape: f32[1,128], index: 2, kind: input, shape index: {}]   ;;  %s3749_s3 = inlined_call_operand.vmem [shape: bf16[2,128,128], index: 3, kind: input, shape index: {}]   ;;  %s3750_s4 = inlined_call_operand.vmem [shape: bf16[2,128,128], index: 4, kind: input, shape index: {}]   ;;  %s3751_s5 = inlined_call_operand.vmem [shape: f32[2,4,128], index: 5, kind: input, shape index: {}]   ;;  %s3752_s6 = inlined_call_operand.hbm [shape: bf16[128,128], index: 6, kind: input, shape index: {}]   ;;  %s3753_s7 = inlined_call_operand.vmem [shape: f32[1,128], index: 7, kind: input, shape index: {}]   ;;  %s3754_s8 = inlined_call_operand.hbm [shape: f32[256,128], index: 8, kind: output, shape index: {}]  }
   0x1   :  { %14 = vsyncpa [#allocation4], 0 }
   0x2   :  { %16 = vsyncpa [#allocation4 + $0x1], 0  ;;  %s2821_s27 = smov 0   ;;  %s2823_s28 = smov 0  }
   0x3   :  { %s2825_s29 = smov 0   ;;  %s2827_s30 = smov 0  }
   0x4 LB: > { %s2842_s9 = sadd.s32 4294967295, %s2768_s30   ;;  %s2133_s10 = sadd.s32 4294967294, %s2768_s30   ;;  %s2768_s30 = sphi %s2827_s30, %s3805_s30   ;;  %s2764_s29 = sphi %s2825_s29, %s3804_s29   ;;  %s2760_s28 = sphi %s2823_s28, %s3803_s28   ;;  %s2756_s27 = sphi %s2821_s27, %s3802_s27  }
   0x5   : > { %s2846_s11 = sadd.s32 1, %s2768_s30   ;;  %s202_s12 = sadd.s32 1, %s2764_s29 }
   0x6   : > { %s199_s13 = ssub.s32 %s2768_s30, %s2846_s11  ;;  %p212_p0 = scmp.ne.s32.totalorder %s2764_s29, %s2760_s28 }
   0x7   : > { %p200_p1 = scmp.eq.s32.totalorder %s199_s13, 0  ;;  %p213_p2 = scmp.eq.s32.totalorder %s2842_s9, 1 }
   0x8   : > { %p218_p3 = scmp.ne.s32.totalorder %s2760_s28, %s2756_s27  ;;  %p219_p4 = scmp.eq.s32.totalorder %s2133_s10, 1 }
   0x9   : > { %s2857_s14 = scalar_select %p200_p1, %s2764_s29, %s202_s12  }
   0xa   : > { %p2859_p5 = por %p213_p2, %p212_p0  ;;  %p2863_p6 = por %p219_p4, %p218_p3 }
   0xb   : > { %p2134_p7 = scmp.ge.s32.totalorder %s2768_s30, 1  ;;  %p226_p8 = scmp.lt.s32.totalorder %s2768_s30, 3 }
   0xc   : > { %s3771_s15 = scalar_select %p2859_p5, 1, 0 }
   0xd   : > { %s3772_s16 = scalar_select %p2863_p6, 1, 0 }
   0xe   : > { %p3755_p9 = scmp.eq.s32.totalorder %s2842_s9, 0  ;;  %p2870_p10 = pnand %p2134_p7, %p226_p8 }
   0xf   : > { %s2770_s18 = smov [#allocation2]   ;;  %s2674_s23 = scalar_lea.hbm %s3752_s6, 1024 }
  0x10   : > { %s3773_s17 = scalar_select %p2870_p10, 1, 0 }
  0x11   : > { %s253_s19 = sshll.u32 %s2770_s18, 4  ;;  %p2521_p11 = pneg %p2870_p10  ;;  %s254_s19 = int_to_ptr.vmem [resolvable:$true] %s253_s19 }
  0x12   : > { %p2675_p13 = scmp.ne.s32.totalorder %s3752_s6, %s2674_s23  ;;  %p2681_p3 = scmp.lt.u32.totalorder %s2674_s23, %s3752_s6 }
  0x13   : > { %p2878_p12 = pnand %p3755_p9, %p2521_p11 }
  0x15   : > { %p2676_p0 = pneg %p2878_p12 }
  0x17   : > { %p2677_p1 = pnand %p2676_p0, %p2675_p13 }
  0x19   : > { %p2678_p2 = pneg %p2677_p1 }
  0x1b   : > { %p2683_p4 = pnand %p2681_p3, %p2678_p2 }
  0x1d   : > { %2686 = shalt.err (!%p2683_p4)
}
  0x1e   : > { %s2687_s12 = scalar_lea.vmem %s254_s19, 1024  ;;  %p2695_p9 = scmp.lt.s32.totalorder %s254_s19, %s254_s19 }
  0x1f   : > { %p2688_p7 = scmp.ne.s32.totalorder %s254_s19, %s2687_s12  ;;  %p2696_p6 = scmp.lt.s32.totalorder %s2687_s12, %s2687_s12 }
  0x21   : > { %p2690_p8 = pnand %p2688_p7, %p2676_p0  ;;  %p2697_p5 = por %p2696_p6, %p2695_p9 }
  0x23   : > { %p2691_p11 = pneg %p2690_p8 }
  0x25   : > { %p2698_p10 = pnand %p2697_p5, %p2691_p11 }
  0x27   : > { %2701 = shalt.err (!%p2698_p10)
}
  0x28   : > { %s2771_s13 = smov 64   ;;  %s2772_s18 = smov 4  }
  0x29   : > { %2524 = dma.hbm_to_vmem [thread:$0]  (!%p2878_p12), %s3752_s6, 1024, %s254_s19, [#allocation3], %s2771_s13, %s2771_s13, %s2772_s18  }
  0x2a   : > { %p3775_p13 = scmp.ne.s32.totalorder %s3773_s17, 0 }
  0x2c   : > { %281 = sbr.rel (%p3775_p13) target bundleno = 2069 (0x815), region = 52 }
  0x33   : > { %p3776_p1 = scmp.eq.s32.totalorder %s2842_s9, 0 }
  0x35   : > { %2747 = dma.done.wait (%p3776_p1), [#allocation3], 1024   ;;  %p3777_p0 = pmov %p3776_p1 }
  0x36   : > { %s2140_s23 = sshll.u32 %s2842_s9, 4  ;;  %v2569_v0 = vld [vmem:[%s3747_s1] sm:$0xff]   ;;  %vm362_vm0 = vcmask 130048   ;;  %s312_s22 = sand.u32 1, %s2760_s28  }
  0x37   : > { %2749 = vsyncadd (%p3777_p0), [#allocation3], 4294966272  ;;  %p316_p5 = scmp.lt.s32.totalorder %s2140_s23, 31  ;;  %2321 = vmatprep.subr.bf16.mxu0 %v2569_v0  ;;  %v2142_v25 = vld [vmem:[%s3748_s2] ss:$0 sm:$0xff]  ;;  %p3800_p9 = scmp.ne.s32.totalorder %s3771_s15, 0 }
  0x38   : > { %2322 = vmatpush3.bf16.msra.mxu0 %v2569_v0  ;;  %s2773_s18 = smov [#allocation5]  }
  0x39   : > { %s3807_s23 = smov (!%p316_p5, %s2140_s23), 31  ;;  %s2706_s21 = sshll.u32 %s2773_s18, 4  ;;  %s2707_s21 = int_to_ptr.vmem [resolvable:$false] %s2706_s21 }
  0x3a   : > { %s2141_s24 = sshll.u32 %s3807_s23, 3  ;;  %s2139_s23 = sshll.u32 %s312_s22, 7 }
  0x3b   : > { %s2908_s26 = scalar_lea.vmem %s3746_s0, %s2141_s24  ;;  %s3676_s20 = scalar_lea.vmem [#allocation5], %s2139_s23 }
  0x3c   : > { %v323_v1 = vld [vmem:[%s2908_s26] sm:$0xff]  ;;  %v324_v2 = vld [vmem:[%s2908_s26 + $0x8] sm:$0xff]  ;;  %v325_v3 = vld [vmem:[%s2908_s26 + $0x10] sm:$0xff]  ;;  %s2059_s19 = sshll.u32 %s3676_s20, 4  ;;  %s2708_s23 = scalar_lea.vmem %s2707_s21, 4096  ;;  %s3698_s19 = int_to_ptr.vmem [resolvable:$true] %s2059_s19 }
  0x3d   : > { %v339_v4 = vpack.c.bf16 %v324_v2, %v323_v1  ;;  %v326_v5 = vld [vmem:[%s2908_s26 + $0x18] sm:$0xff]  ;;  %v327_v6 = vld [vmem:[%s2908_s26 + $0x20] sm:$0xff]  ;;  %v328_v7 = vld [vmem:[%s2908_s26 + $0x28] sm:$0xff]  ;;  %s2702_s13 = scalar_lea.vmem %s3698_s19, 2048  ;;  %p2709_p2 = scmp.lt.s32.totalorder %s3698_s19, %s2707_s21 }
  0x3e   : > { %v340_v8 = vpack.c.bf16 %v326_v5, %v325_v3  ;;  %v341_v9 = vpack.c.bf16 %v328_v7, %v327_v6  ;;  %v329_v10 = vld [vmem:[%s2908_s26 + $0x30] sm:$0xff]  ;;  %v330_v11 = vld [vmem:[%s2908_s26 + $0x38] sm:$0xff]  ;;  %v331_v12 = vld [vmem:[%s2908_s26 + $0x40] sm:$0xff]  ;;  %p2703_p6 = scmp.ne.s32.totalorder %s3698_s19, %s2702_s13  ;;  %p2710_p3 = scmp.lt.s32.totalorder %s2708_s23, %s2702_s13 }
  0x3f   : > { %2323 = vmatprep.mubr.msk.bf16.mxu0 %vm362_vm0, %v339_v4  ;;  %v332_v13 = vld [vmem:[%s2908_s26 + $0x48] sm:$0xff]  ;;  %v342_v14 = vpack.c.bf16 %v330_v11, %v329_v10  ;;  %v333_v16 = vld [vmem:[%s2908_s26 + $0x50] sm:$0xff]  ;;  %v334_v17 = vld [vmem:[%s2908_s26 + $0x58] sm:$0xff] }
  0x40   : > { %2324 = vmatmul.mubr.msk.bf16.vlgmr.msra.gmra.mrb[0].mxu0 %vm362_vm0, %v340_v8  ;;  %v343_v15 = vpack.c.bf16 %v332_v13, %v331_v12  ;;  %v335_v18 = vld [vmem:[%s2908_s26 + $0x60] sm:$0xff]  ;;  %v336_v19 = vld [vmem:[%s2908_s26 + $0x68] sm:$0xff]  ;;  %v344_v20 = vpack.c.bf16 %v334_v17, %v333_v16  ;;  %v337_v22 = vld [vmem:[%s2908_s26 + $0x70] sm:$0xff]  ;;  %p2704_p10 = pnand %p2703_p6, %p3800_p9  ;;  %p2711_p4 = por %p2710_p3, %p2709_p2 }
  0x41   : > { %2327 = vmatprep.mubr.msk.bf16.mxu0 %vm362_vm0, %v341_v9  ;;  %v345_v21 = vpack.c.bf16 %v336_v19, %v335_v18  ;;  %v338_v23 = vld [vmem:[%s2908_s26 + $0x78] sm:$0xff]  ;;  %s2231_s26 = sshll.u32 %s2842_s9, 11  ;;  %s3705_s9 = scalar_lea.sflag [#allocation4], %s312_s22 }
  0x42   : > { %v346_v24 = vpack.c.bf16 %v338_v23, %v337_v22  ;;  %s3696_s12 = scalar_lea.hbm %s3754_s8, %s2231_s26  ;;  %p2705_p12 = pneg %p2704_p10 }
  0x44   : > { %p2712_p7 = pnand %p2711_p4, %p2705_p12 }
  0x48   : > { %2328 = vmatmul.mubr.msk.bf16.gmra.mrb[4].mxu0 %vm362_vm0, %v342_v14 }
  0x49   : > { %2331 = vmatprep.mubr.msk.bf16.mxu0 %vm362_vm0, %v343_v15 }
  0x50   : > { %2332 = vmatmul.mubr.msk.bf16.gmra.mrb[8].mxu0 %vm362_vm0, %v344_v20 }
  0x51   : > { %2335 = vmatprep.mubr.msk.bf16.mxu0 %vm362_vm0, %v345_v21 }
  0x58   : > { %2336 = vmatmul.mubr.msk.bf16.gmra.mrb[12].mxu0 %vm362_vm0, %v346_v24 }
 0x113   : > { %v2325_v26 = vpop.f32.mrb[0].mxu0 }
 0x114   : > { %v2940_v27 = vadd.f32 %v2325_v26, %v2142_v25  ;;  %v421_v28 = vpop.f32.mrb[1].mxu0 }
 0x115   : > { %v2942_v29 = vadd.f32 %v2142_v25, %v421_v28  ;;  %v2326_v30 = vpop.f32.mrb[2].mxu0 }
 0x116   : > { %489 = vadd.xlane.f32.xlu1 %v2940_v27  ;;  %v424_v31 = vpop.f32.mrb[3].mxu0  ;;  %v2946_v32 = vadd.f32 %v2326_v30, %v2142_v25 }
 0x117   : > { %485 = vadd.xlane.f32.xlu0 %v2942_v29  ;;  %v2948_v33 = vadd.f32 %v2142_v25, %v424_v31 }
 0x11a   : > { %491 = vadd.xlane.f32.xlu1 %v2946_v32 }
 0x11b   : > { %v2329_v34 = vpop.f32.mrb[4].mxu0  ;;  %487 = vadd.xlane.f32.xlu0 %v2948_v33 }
 0x11c   : > { %v437_v35 = vpop.f32.mrb[5].mxu0  ;;  %v2957_v40 = vadd.f32 %v2329_v34, %v2142_v25 }
 0x11d   : > { %v2952_v36 = vadd.f32 %v2142_v25, %v437_v35  ;;  %v2330_v37 = vpop.f32.mrb[6].mxu0 }
 0x11e   : > { %v440_v38 = vpop.f32.mrb[7].mxu0  ;;  %v2960_v41 = vadd.f32 %v2330_v37, %v2142_v25 }
 0x11f   : > { %v2954_v39 = vadd.f32 %v2142_v25, %v440_v38  ;;  %493 = vadd.xlane.f32.xlu0 %v2952_v36 }
 0x121   : > { %495 = vadd.xlane.f32.xlu1 %v2954_v39 }
 0x123   : > { %v2333_v42 = vpop.f32.mrb[8].mxu0  ;;  %497 = vadd.xlane.f32.xlu0 %v2957_v40 }
 0x124   : > { %v453_v43 = vpop.f32.mrb[9].mxu0  ;;  %v2969_v48 = vadd.f32 %v2333_v42, %v2142_v25 }
 0x125   : > { %v2963_v44 = vadd.f32 %v2142_v25, %v453_v43  ;;  %v2334_v45 = vpop.f32.mrb[10].mxu0  ;;  %499 = vadd.xlane.f32.xlu1 %v2960_v41 }
 0x126   : > { %v456_v46 = vpop.f32.mrb[11].mxu0  ;;  %v2972_v49 = vadd.f32 %v2334_v45, %v2142_v25  ;;  %v2570_v45 = vld [vmem:[%s3749_s3] sm:$0xff]  }
 0x127   : > { %v2966_v47 = vadd.f32 %v2142_v25, %v456_v46  ;;  %501 = vadd.xlane.f32.xlu0 %v2963_v44  ;;  %2339 = vmatprep.subr.bf16.mxu1 %v2570_v45 }
 0x128   : > { %2340 = vmatpush3.bf16.msra.mxu1 %v2570_v45  ;;  %v2575_v45 = vld [vmem:[%s3749_s3 + $0x28] sm:$0xff]  }
 0x129   : > { %503 = vadd.xlane.f32.xlu1 %v2966_v47 }
 0x12b   : > { %v2337_v50 = vpop.f32.mrb[12].mxu0  ;;  %505 = vadd.xlane.f32.xlu0 %v2969_v48 }
 0x12c   : > { %v469_v51 = vpop.f32.mrb[13].mxu0  ;;  %v2981_v56 = vadd.f32 %v2337_v50, %v2142_v25 }
 0x12d   : > { %v2975_v52 = vadd.f32 %v2142_v25, %v469_v51  ;;  %v2338_v53 = vpop.f32.mrb[14].mxu0  ;;  %507 = vadd.xlane.f32.xlu1 %v2972_v49 }
 0x12e   : > { %v472_v54 = vpop.f32.mrb[15].mxu0  ;;  %3780 = vst [vmem:[#allocation10_spill] sm:$0xff] %v2981_v56  ;;  %v2984_v57 = vadd.f32 %v2338_v53, %v2142_v25 }
 0x12f   : > { %3778 = vst [vmem:[#allocation8_spill] sm:$0xff] %v2975_v52  ;;  %v2978_v55 = vadd.f32 %v2142_v25, %v472_v54  ;;  %509 = vadd.xlane.f32.xlu0 %v2975_v52 }
 0x130   : > { %3781 = vst [vmem:[#allocation11_spill] sm:$0xff] %v2984_v57 }
 0x131   : > { %3779 = vst [vmem:[#allocation9_spill] sm:$0xff] %v2978_v55  ;;  %511 = vadd.xlane.f32.xlu1 %v2978_v55 }
 0x133   : > { %513 = vadd.xlane.f32.xlu0 %v2981_v56 }
 0x135   : > { %515 = vadd.xlane.f32.xlu1 %v2984_v57 }
 0x1a3   : > { %v490_v58 = vpop.xlane.xlu1 %489 }
 0x1a4   : > { %v486_v59 = vpop.xlane.xlu0 %485  ;;  %v2988_v60 = vmul.f32 0.03125, %v490_v58 }
 0x1a5   : > { %v2990_v61 = vmul.f32 0.03125, %v486_v59 }
 0x1a6   : > { %v3004_v4 = vsub.f32 %v2940_v27, %v2988_v60 }
 0x1a7   : > { %v492_v62 = vpop.xlane.xlu1 %491  ;;  %v2994_v63 = vsub.f32 %v2942_v29, %v2990_v61 }
 0x1a8   : > { %v488_v0 = vpop.xlane.xlu0 %487  ;;  %v2996_v1 = vmul.f32 0.03125, %v492_v62  ;;  %v551_v8 = vmul.f32 %v3004_v4, %v3004_v4 }
 0x1a9   : > { %v2998_v2 = vmul.f32 0.03125, %v488_v0  ;;  %v549_v3 = vmul.f32 %v2994_v63, %v2994_v63 }
 0x1aa   : > { %v3018_v10 = vsub.f32 %v2946_v32, %v2996_v1 }
 0x1ab   : > { %565 = vadd.xlane.f32.xlu0 %v549_v3  ;;  %v3008_v5 = vsub.f32 %v2948_v33, %v2998_v2 }
 0x1ac   : > { %v494_v6 = vpop.xlane.xlu0 %493  ;;  %v552_v16 = vmul.f32 %v3018_v10, %v3018_v10 }
 0x1ad   : > { %v3010_v7 = vmul.f32 0.03125, %v494_v6  ;;  %v550_v9 = vmul.f32 %v3008_v5, %v3008_v5  ;;  %v2571_v6 = vld [vmem:[%s3749_s3 + $0x8] sm:$0xff]  }
 0x1ae   : > { %v496_v11 = vpop.xlane.xlu1 %495  ;;  %2341 = vmatprep.subr.bf16.mxu1 %v2571_v6 }
 0x1af   : > { %v3020_v12 = vmul.f32 0.03125, %v496_v11  ;;  %569 = vadd.xlane.f32.xlu0 %v551_v8  ;;  %567 = vadd.xlane.f32.xlu1 %v550_v9  ;;  %v3024_v13 = vsub.f32 %v2952_v36, %v3010_v7 }
 0x1b0   : > { %v498_v14 = vpop.xlane.xlu0 %497  ;;  %2342 = vmatpush3.bf16.msra.mxu1 %v2571_v6  ;;  %v2580_v6 = vld [vmem:[%s3750_s4 + $0x10] sm:$0xff]  }
 0x1b1   : > { %v3026_v15 = vmul.f32 0.03125, %v498_v14  ;;  %v553_v17 = vmul.f32 %v3024_v13, %v3024_v13  ;;  %v3034_v18 = vsub.f32 %v2954_v39, %v3020_v12 }
 0x1b2   : > { %v500_v19 = vpop.xlane.xlu1 %499 }
 0x1b3   : > { %v3036_v20 = vmul.f32 0.03125, %v500_v19  ;;  %571 = vadd.xlane.f32.xlu1 %v552_v16  ;;  %573 = vadd.xlane.f32.xlu0 %v553_v17  ;;  %v3040_v21 = vsub.f32 %v2957_v40, %v3026_v15  ;;  %v554_v24 = vmul.f32 %v3034_v18, %v3034_v18 }
 0x1b4   : > { %v502_v22 = vpop.xlane.xlu0 %501 }
 0x1b5   : > { %v3042_v23 = vmul.f32 0.03125, %v502_v22  ;;  %v555_v25 = vmul.f32 %v3040_v21, %v3040_v21  ;;  %v3050_v26 = vsub.f32 %v2960_v41, %v3036_v20 }
 0x1b6   : > { %v504_v28 = vpop.xlane.xlu1 %503 }
 0x1b7   : > { %v3052_v30 = vmul.f32 0.03125, %v504_v28  ;;  %575 = vadd.xlane.f32.xlu1 %v554_v24  ;;  %577 = vadd.xlane.f32.xlu0 %v555_v25  ;;  %v3056_v31 = vsub.f32 %v2963_v44, %v3042_v23  ;;  %v556_v37 = vmul.f32 %v3050_v26, %v3050_v26  ;;  %v2572_v24 = vld [vmem:[%s3749_s3 + $0x10] sm:$0xff]  }
 0x1b8   : > { %v506_v34 = vpop.xlane.xlu0 %505  ;;  %2343 = vmatprep.subr.bf16.mxu1 %v2572_v24 }
 0x1b9   : > { %v3058_v35 = vmul.f32 0.03125, %v506_v34  ;;  %v557_v38 = vmul.f32 %v3056_v31, %v3056_v31  ;;  %v3066_v42 = vsub.f32 %v2966_v47, %v3052_v30  ;;  %2344 = vmatpush3.bf16.msra.mxu1 %v2572_v24 }
 0x1ba   : > { %v508_v43 = vpop.xlane.xlu1 %507 }
 0x1bb   : > { %v3071_v46 = vmul.f32 0.03125, %v508_v43  ;;  %579 = vadd.xlane.f32.xlu1 %v556_v37  ;;  %581 = vadd.xlane.f32.xlu0 %v557_v38  ;;  %v3075_v50 = vsub.f32 %v2969_v48, %v3058_v35  ;;  %v558_v54 = vmul.f32 %v3066_v42, %v3066_v42  ;;  %v2573_v37 = vld [vmem:[%s3749_s3 + $0x18] sm:$0xff]   ;;  %v2574_v43 = vld [vmem:[%s3749_s3 + $0x20] sm:$0xff]  }
 0x1bc   : > { %v510_v51 = vpop.xlane.xlu0 %509  ;;  %2345 = vmatprep.subr.bf16.mxu1 %v2573_v37 }
 0x1bd   : > { %v3077_v53 = vmul.f32 0.03125, %v510_v51  ;;  %v559_v58 = vmul.f32 %v3075_v50, %v3075_v50  ;;  %v3085_v59 = vsub.f32 %v2972_v49, %v3071_v46  ;;  %2346 = vmatpush3.bf16.msra.mxu1 %v2573_v37  ;;  %v2576_v51 = vld [vmem:[%s3749_s3 + $0x30] sm:$0xff]  }
 0x1be   : > { %v512_v62 = vpop.xlane.xlu1 %511  ;;  %2347 = vmatprep.subr.bf16.mxu1 %v2574_v43 }
 0x1bf   : > { %v3087_v0 = vmul.f32 0.03125, %v512_v62  ;;  %583 = vadd.xlane.f32.xlu1 %v558_v54  ;;  %585 = vadd.xlane.f32.xlu0 %v559_v58  ;;  %v3091_v3 = vsub.f32 %v2975_v52, %v3077_v53  ;;  %v560_v11 = vmul.f32 %v3085_v59, %v3085_v59  ;;  %v2577_v54 = vld [vmem:[%s3749_s3 + $0x38] sm:$0xff]   ;;  %v2578_v58 = vld [vmem:[%s3750_s4] sm:$0xff]   ;;  %v2579_v62 = vld [vmem:[%s3750_s4 + $0x8] sm:$0xff]  }
 0x1c0   : > { %v514_v8 = vpop.xlane.xlu0 %513  ;;  %2371 = vmatprep.subr.bf16.mxu0 %v2578_v58 }
 0x1c1   : > { %v3096_v9 = vmul.f32 0.03125, %v514_v8  ;;  %v561_v14 = vmul.f32 %v3091_v3, %v3091_v3  ;;  %v3104_v16 = vsub.f32 %v2978_v55, %v3087_v0  ;;  %2348 = vmatpush3.bf16.msra.mxu1 %v2574_v43  ;;  %2372 = vmatpush3.bf16.msra.mxu0 %v2578_v58  ;;  %v2581_v8 = vld [vmem:[%s3750_s4 + $0x18] sm:$0xff]  }
 0x1c2   : > { %v516_v17 = vpop.xlane.xlu1 %515  ;;  %2349 = vmatprep.subr.bf16.mxu1 %v2575_v45  ;;  %2373 = vmatprep.subr.bf16.mxu0 %v2579_v62 }
 0x1c3   : > { %v3106_v19 = vmul.f32 0.03125, %v516_v17  ;;  %587 = vadd.xlane.f32.xlu1 %v560_v11  ;;  %589 = vadd.xlane.f32.xlu0 %v561_v14  ;;  %v3110_v22 = vsub.f32 %v2981_v56, %v3096_v9  ;;  %v562_v25 = vmul.f32 %v3104_v16, %v3104_v16  ;;  %v2582_v11 = vld [vmem:[%s3750_s4 + $0x20] sm:$0xff]   ;;  %v2583_v14 = vld [vmem:[%s3750_s4 + $0x28] sm:$0xff]   ;;  %v597_v17 = vmul.f32 96.0, %v2990_v61 }
 0x1c5   : > { %v563_v28 = vmul.f32 %v3110_v22, %v3110_v22  ;;  %v3121_v34 = vsub.f32 %v2984_v57, %v3106_v19  ;;  %2350 = vmatpush3.bf16.msra.mxu1 %v2575_v45  ;;  %2374 = vmatpush3.bf16.msra.mxu0 %v2579_v62  ;;  %v613_v24 = vmul.f32 %v597_v17, %v2990_v61  ;;  %v603_v61 = vmul.f32 96.0, %v3026_v15 }
 0x1c6   : > { %2351 = vmatprep.subr.bf16.mxu1 %v2576_v51  ;;  %2375 = vmatprep.subr.bf16.mxu0 %v2580_v6 }
 0x1c7   : > { %591 = vadd.xlane.f32.xlu1 %v562_v25  ;;  %593 = vadd.xlane.f32.xlu0 %v563_v28  ;;  %v564_v38 = vmul.f32 %v3121_v34, %v3121_v34  ;;  %v598_v25 = vmul.f32 96.0, %v2998_v2  ;;  %v599_v28 = vmul.f32 96.0, %v2988_v60  ;;  %v619_v52 = vmul.f32 %v603_v61, %v3026_v15 }
 0x1c8   : > { %v607_v15 = vmul.f32 96.0, %v3058_v35  ;;  %v608_v61 = vmul.f32 96.0, %v3071_v46 }
 0x1c9   : > { %2352 = vmatpush3.bf16.msra.mxu1 %v2576_v51  ;;  %2376 = vmatpush3.bf16.msra.mxu0 %v2580_v6  ;;  %v614_v45 = vmul.f32 %v598_v25, %v2998_v2  ;;  %v615_v51 = vmul.f32 %v599_v28, %v2988_v60  ;;  %v601_v6 = vmul.f32 96.0, %v3010_v7 }
 0x1ca   : > { %2353 = vmatprep.subr.bf16.mxu1 %v2577_v54  ;;  %2377 = vmatprep.subr.bf16.mxu0 %v2581_v8 }
 0x1cb   : > { %595 = vadd.xlane.f32.xlu1 %v564_v38  ;;  %v617_v57 = vmul.f32 %v601_v6, %v3010_v7  ;;  %v606_v7 = vmul.f32 96.0, %v3052_v30 }
 0x1cd   : > { %2354 = vmatpush3.bf16.msra.mxu1 %v2577_v54  ;;  %2378 = vmatpush3.bf16.msra.mxu0 %v2581_v8  ;;  %v600_v54 = vmul.f32 96.0, %v2996_v1  ;;  %v602_v8 = vmul.f32 96.0, %v3020_v12 }
 0x1ce   : > { %2379 = vmatprep.subr.bf16.mxu0 %v2582_v11 }
 0x1cf   : > { %v616_v60 = vmul.f32 %v600_v54, %v2996_v1  ;;  %v618_v56 = vmul.f32 %v602_v8, %v3020_v12 }
 0x1d1   : > { %2380 = vmatpush3.bf16.msra.mxu0 %v2582_v11 }
 0x1d2   : > { %2381 = vmatprep.subr.bf16.mxu0 %v2583_v14 }
 0x1d5   : > { %2382 = vmatpush3.bf16.msra.mxu0 %v2583_v14 }
 0x238   : > { %v566_v37 = vpop.xlane.xlu0 %565 }
 0x239   : > { %v629_v38 = vsub.f32 %v566_v37, %v613_v24  ;;  %v604_v24 = vmul.f32 96.0, %v3036_v20  ;;  %v725_v37 = vlaneseq }
 0x23b   : > { %v645_v43 = vmul.f32 0.03125, %v629_v38 }
 0x23c   : > { %v568_v58 = vpop.xlane.xlu1 %567  ;;  %v570_v62 = vpop.xlane.xlu0 %569 }
 0x23d   : > { %v661_v11 = vmax.f32 %v645_v43, 0.0  ;;  %v630_v14 = vsub.f32 %v568_v58, %v614_v45  ;;  %v631_v17 = vsub.f32 %v570_v62, %v615_v51  ;;  %v620_v62 = vmul.f32 %v604_v24, %v3036_v20 }
 0x23f   : > { %v677_v38 = vadd.f32 1e-05, %v661_v11  ;;  %v646_v2 = vmul.f32 0.03125, %v630_v14  ;;  %v647_v25 = vmul.f32 0.03125, %v631_v17  ;;  %v605_v11 = vmul.f32 96.0, %v3042_v23 }
 0x240   : > { %v572_v28 = vpop.xlane.xlu1 %571  ;;  %v574_v55 = vpop.xlane.xlu0 %573  ;;  %v3175_v14 = vshrl.u32 %v725_v37, 7 }
 0x241   : > { %2610 = vrsqrt.f32 %v677_v38  ;;  %v662_v43 = vmax.f32 %v646_v2, 0.0  ;;  %v663_v45 = vmax.f32 %v647_v25, 0.0  ;;  %v632_v51 = vsub.f32 %v572_v28, %v616_v60 }
 0x242   : > { %v633_v58 = vsub.f32 %v574_v55, %v617_v57  ;;  %v609_v55 = vmul.f32 96.0, %v3077_v53  ;;  %v621_v38 = vmul.f32 %v605_v11, %v3042_v23  ;;  %v3765_v2 = vsub.s32 0, %v3175_v14 }
 0x243   : > { %v678_v1 = vadd.f32 1e-05, %v662_v43  ;;  %v679_v54 = vadd.f32 1e-05, %v663_v45  ;;  %v648_v17 = vmul.f32 0.03125, %v632_v51  ;;  %v622_v43 = vmul.f32 %v606_v7, %v3052_v30 }
 0x244   : > { %v649_v6 = vmul.f32 0.03125, %v633_v58  ;;  %v576_v12 = vpop.xlane.xlu1 %575  ;;  %v578_v8 = vpop.xlane.xlu0 %577  ;;  %v3187_v45 = vld [vmem:[%s3751_s5] sm:$0xf]  ;;  %v625_v23 = vmul.f32 %v609_v55, %v3077_v53  ;;  %v610_v30 = vmul.f32 96.0, %v3087_v0 }
 0x245   : > { %2612 = vrsqrt.f32 %v678_v1  ;;  %v664_v57 = vmax.f32 %v648_v17, 0.0  ;;  %v634_v20 = vsub.f32 %v576_v12, %v618_v56  ;;  %v635_v24 = vsub.f32 %v578_v8, %v619_v52 }
 0x246   : > { %2614 = vrsqrt.f32 %v679_v54  ;;  %v665_v37 = vmax.f32 %v649_v6, 0.0  ;;  %v623_v52 = vmul.f32 %v607_v15, %v3058_v35  ;;  %v624_v1 = vmul.f32 %v608_v61, %v3071_v46 }
 0x247   : > { %v680_v25 = vadd.f32 1e-05, %v664_v57  ;;  %v650_v60 = vmul.f32 0.03125, %v634_v20  ;;  %v651_v28 = vmul.f32 0.03125, %v635_v24  ;;  %v3196_v7 = vrot.slane %v3187_v45, %v3765_v2 }
 0x248   : > { %v681_v51 = vadd.f32 1e-05, %v665_v37  ;;  %v580_v58 = vpop.xlane.xlu1 %579  ;;  %v582_v56 = vpop.xlane.xlu0 %581  ;;  %v3764_v12 = vsub.s32 1, %v3175_v14  ;;  %v612_v57 = vmul.f32 96.0, %v3106_v19 }
 0x249   : > { %2616 = vrsqrt.f32 %v680_v25  ;;  %v666_v11 = vmax.f32 %v650_v60, 0.0  ;;  %v667_v54 = vmax.f32 %v651_v28, 0.0  ;;  %v636_v17 = vsub.f32 %v580_v58, %v620_v62 }
 0x24a   : > { %v637_v6 = vsub.f32 %v582_v56, %v621_v38  ;;  %2618 = vrsqrt.f32 %v681_v51  ;;  %v611_v62 = vmul.f32 96.0, %v3096_v9  ;;  %v626_v60 = vmul.f32 %v610_v30, %v3087_v0 }
 0x24b   : > { %v2611_v8 = vpop.eup %2610  ;;  %v682_v35 = vadd.f32 1e-05, %v666_v11  ;;  %v683_v46 = vadd.f32 1e-05, %v667_v54  ;;  %v652_v15 = vmul.f32 0.03125, %v636_v17  ;;  %v3206_v28 = vrot.slane %v3187_v45, %v3764_v12 }
 0x24c   : > { %v653_v53 = vmul.f32 0.03125, %v637_v6  ;;  %v584_v61 = vpop.xlane.xlu1 %583  ;;  %v586_v55 = vpop.xlane.xlu0 %585  ;;  %v709_v20 = vmul.f32 %v2611_v8, %v2994_v63  ;;  %v628_v8 = vmul.f32 %v612_v57, %v3106_v19 }
 0x24d   : > { %2620 = vrsqrt.f32 %v682_v35  ;;  %v668_v24 = vmax.f32 %v652_v15, 0.0  ;;  %v638_v37 = vsub.f32 %v584_v61, %v622_v43  ;;  %v639_v38 = vsub.f32 %v586_v55, %v623_v52 }
 0x24e   : > { %2622 = vrsqrt.f32 %v683_v46  ;;  %v669_v25 = vmax.f32 %v653_v53, 0.0  ;;  %v729_v54 = vmul.f32 %v3196_v7, %v709_v20  ;;  %v627_v52 = vmul.f32 %v611_v62, %v3096_v9 }
 0x24f   : > { %v2613_v51 = vpop.eup %2612  ;;  %v684_v58 = vadd.f32 1e-05, %v668_v24  ;;  %v654_v56 = vmul.f32 0.03125, %v638_v37  ;;  %v655_v11 = vmul.f32 0.03125, %v639_v38 }
 0x250   : > { %v2615_v63 = vpop.eup %2614  ;;  %v685_v17 = vadd.f32 1e-05, %v669_v25  ;;  %v588_v6 = vpop.xlane.xlu1 %587  ;;  %v710_v0 = vmul.f32 %v2613_v51, %v3008_v5  ;;  %v749_v9 = vadd.f32 %v3206_v28, %v729_v54 }
 0x251   : > { %v590_v43 = vpop.xlane.xlu0 %589  ;;  %2624 = vrsqrt.f32 %v684_v58  ;;  %v670_v30 = vmax.f32 %v654_v56, 0.0  ;;  %v671_v35 = vmax.f32 %v655_v11, 0.0  ;;  %v640_v46 = vsub.f32 %v588_v6, %v624_v1 }
 0x252   : > { %2626 = vrsqrt.f32 %v685_v17  ;;  %v641_v15 = vsub.f32 %v590_v43, %v625_v23  ;;  %v730_v53 = vmul.f32 %v3196_v7, %v710_v0  ;;  %v711_v61 = vmul.f32 %v2615_v63, %v3004_v4 }
 0x253   : > { %v2617_v55 = vpop.eup %2616  ;;  %v686_v20 = vadd.f32 1e-05, %v670_v30  ;;  %v687_v24 = vadd.f32 1e-05, %v671_v35  ;;  %v656_v37 = vmul.f32 0.03125, %v640_v46 }
 0x254   : > { %v657_v62 = vmul.f32 0.03125, %v641_v15  ;;  %v592_v19 = vpop.xlane.xlu1 %591  ;;  %v750_v5 = vadd.f32 %v3206_v28, %v730_v53  ;;  %v712_v38 = vmul.f32 %v2617_v55, %v3018_v10  ;;  %v731_v1 = vmul.f32 %v3196_v7, %v711_v61  ;;  %v2619_v23 = vpop.eup %2618 }
 0x255   : > { %v594_v57 = vpop.xlane.xlu0 %593  ;;  %2628 = vrsqrt.f32 %v686_v20  ;;  %v672_v25 = vmax.f32 %v656_v37, 0.0  ;;  %v642_v51 = vsub.f32 %v592_v19, %v626_v60  ;;  %v713_v60 = vmul.f32 %v2619_v23, %v3024_v13 }
 0x256   : > { %v643_v4 = vsub.f32 %v594_v57, %v627_v52  ;;  %2630 = vrsqrt.f32 %v687_v24  ;;  %v673_v58 = vmax.f32 %v657_v62, 0.0  ;;  %v765_v56 = vpack.c.bf16 %v750_v5, %v749_v9 }
 0x257   : > { %v732_v11 = vmul.f32 %v3196_v7, %v712_v38  ;;  %v2621_v54 = vpop.eup %2620  ;;  %v688_v63 = vadd.f32 1e-05, %v672_v25  ;;  %v658_v17 = vmul.f32 0.03125, %v642_v51  ;;  %v751_v43 = vadd.f32 %v3206_v28, %v731_v1 }
 0x258   : > { %v659_v6 = vmul.f32 0.03125, %v643_v4  ;;  %v2623_v0 = vpop.eup %2622  ;;  %v689_v10 = vadd.f32 1e-05, %v673_v58  ;;  %v596_v30 = vpop.xlane.xlu1 %595  ;;  %2355 = vmatprep.mubr.bf16.mxu1 %v765_v56  ;;  %v714_v52 = vmul.f32 %v2621_v54, %v3034_v18  ;;  %v733_v55 = vmul.f32 %v3196_v7, %v713_v60 }
 0x259   : > { %v752_v35 = vadd.f32 %v3206_v28, %v732_v11  ;;  %2632 = vrsqrt.f32 %v688_v63  ;;  %v674_v46 = vmax.f32 %v658_v17, 0.0  ;;  %v644_v53 = vsub.f32 %v596_v30, %v628_v8 }
 0x25a   : > { %v675_v15 = vmax.f32 %v659_v6, 0.0  ;;  %2634 = vrsqrt.f32 %v689_v10  ;;  %v734_v20 = vmul.f32 %v3196_v7, %v714_v52  ;;  %v715_v19 = vmul.f32 %v2623_v0, %v3040_v21 }
 0x25b   : > { %v766_v61 = vpack.c.bf16 %v752_v35, %v751_v43  ;;  %v2625_v24 = vpop.eup %2624  ;;  %v690_v37 = vadd.f32 1e-05, %v674_v46  ;;  %v660_v62 = vmul.f32 0.03125, %v644_v53  ;;  %v753_v13 = vadd.f32 %v3206_v28, %v733_v55 }
 0x25c   : > { %v691_v9 = vadd.f32 1e-05, %v675_v15  ;;  %v2627_v57 = vpop.eup %2626  ;;  %v754_v18 = vadd.f32 %v3206_v28, %v734_v20  ;;  %v716_v8 = vmul.f32 %v2625_v24, %v3050_v26  ;;  %v735_v38 = vmul.f32 %v3196_v7, %v715_v19 }
 0x25d   : > { %2356 = vmatmul.mubr.bf16.vlgmr.msra.gmra.mrb[0].mxu1 %v766_v61  ;;  %2636 = vrsqrt.f32 %v690_v37  ;;  %v676_v5 = vmax.f32 %v660_v62, 0.0  ;;  %v717_v1 = vmul.f32 %v2627_v57, %v3056_v31 }
 0x25e   : > { %2638 = vrsqrt.f32 %v691_v9  ;;  %v767_v23 = vpack.c.bf16 %v754_v18, %v753_v13  ;;  %v736_v25 = vmul.f32 %v3196_v7, %v716_v8  ;;  %v755_v58 = vadd.f32 %v3206_v28, %v735_v38  ;;  %v2584_v18 = vld [vmem:[%s3750_s4 + $0x30] sm:$0xff]  }
 0x25f   : > { %v2629_v51 = vpop.eup %2628  ;;  %v692_v21 = vadd.f32 1e-05, %v676_v5  ;;  %v737_v11 = vmul.f32 %v3196_v7, %v717_v1  ;;  %2383 = vmatprep.subr.bf16.mxu0 %v2584_v18 }
 0x260   : > { %v2631_v4 = vpop.eup %2630  ;;  %2359 = vmatprep.mubr.bf16.mxu1 %v767_v23  ;;  %v756_v56 = vadd.f32 %v3206_v28, %v736_v25  ;;  %v718_v26 = vmul.f32 %v2629_v51, %v3066_v42  ;;  %2384 = vmatpush3.bf16.msra.mxu0 %v2584_v18 }
 0x261   : > { %2640 = vrsqrt.f32 %v692_v21  ;;  %v719_v54 = vmul.f32 %v2631_v4, %v3075_v50  ;;  %v757_v43 = vadd.f32 %v3206_v28, %v737_v11 }
 0x262   : > { %v768_v31 = vpack.c.bf16 %v756_v56, %v755_v58  ;;  %v738_v63 = vmul.f32 %v3196_v7, %v718_v26 }
 0x263   : > { %v2633_v17 = vpop.eup %2632  ;;  %v739_v30 = vmul.f32 %v3196_v7, %v719_v54 }
 0x264   : > { %v2635_v6 = vpop.eup %2634  ;;  %v758_v0 = vadd.f32 %v3206_v28, %v738_v63  ;;  %v720_v10 = vmul.f32 %v2633_v17, %v3085_v59 }
 0x265   : > { %2360 = vmatmul.mubr.bf16.gmra.mrb[4].mxu1 %v768_v31  ;;  %v721_v42 = vmul.f32 %v2635_v6, %v3091_v3  ;;  %v759_v46 = vadd.f32 %v3206_v28, %v739_v30 }
 0x266   : > { %v769_v35 = vpack.c.bf16 %v758_v0, %v757_v43  ;;  %v740_v60 = vmul.f32 %v3196_v7, %v720_v10 }
 0x267   : > { %v2637_v50 = vpop.eup %2636  ;;  %v741_v61 = vmul.f32 %v3196_v7, %v721_v42 }
 0x268   : > { %v2639_v52 = vpop.eup %2638  ;;  %2363 = vmatprep.mubr.bf16.mxu1 %v769_v35  ;;  %v760_v15 = vadd.f32 %v3206_v28, %v740_v60  ;;  %v722_v53 = vmul.f32 %v2637_v50, %v3104_v16 }
 0x269   : > { %v723_v59 = vmul.f32 %v2639_v52, %v3110_v22  ;;  %v761_v24 = vadd.f32 %v3206_v28, %v741_v61 }
 0x26a   : > { %v770_v55 = vpack.c.bf16 %v760_v15, %v759_v46  ;;  %v742_v20 = vmul.f32 %v3196_v7, %v722_v53 }
 0x26b   : > { %v2641_v3 = vpop.eup %2640  ;;  %v743_v62 = vmul.f32 %v3196_v7, %v723_v59 }
 0x26c   : > { %v762_v37 = vadd.f32 %v3206_v28, %v742_v20  ;;  %v724_v9 = vmul.f32 %v2641_v3, %v3121_v34  ;;  %v2585_v34 = vld [vmem:[%s3750_s4 + $0x38] sm:$0xff]  }
 0x26d   : > { %2364 = vmatmul.mubr.bf16.gmra.mrb[8].mxu1 %v770_v55  ;;  %v763_v57 = vadd.f32 %v3206_v28, %v743_v62  ;;  %2385 = vmatprep.subr.bf16.mxu0 %v2585_v34 }
 0x26e   : > { %v771_v19 = vpack.c.bf16 %v762_v37, %v761_v24  ;;  %v744_v16 = vmul.f32 %v3196_v7, %v724_v9  ;;  %2386 = vmatpush3.bf16.msra.mxu0 %v2585_v34  ;;  %v3763_v7 = vsub.s32 2, %v3175_v14 }
 0x270   : > { %2367 = vmatprep.mubr.bf16.mxu1 %v771_v19  ;;  %v764_v22 = vadd.f32 %v3206_v28, %v744_v16  ;;  %v792_v28 = vrot.slane %v3187_v45, %v3763_v7 }
 0x272   : > { %v772_v13 = vpack.c.bf16 %v764_v22, %v763_v57 }
 0x275   : > { %2368 = vmatmul.mubr.bf16.gmra.mrb[12].mxu1 %v772_v13 }
 0x330   : > { %v2357_v8 = vpop.f32.mrb[0].mxu1 }
 0x331   : > { %v884_v5 = vadd.f32 %v2357_v8, %v792_v28  ;;  %v875_v38 = vpop.f32.mrb[1].mxu1 }
 0x332   : > { %v876_v1 = vadd.f32 %v875_v38, %v792_v28  ;;  %v2358_v23 = vpop.f32.mrb[2].mxu1 }
 0x333   : > { %v887_v25 = vadd.f32 %v2358_v23, %v792_v28  ;;  %v878_v51 = vpop.f32.mrb[3].mxu1  ;;  %v940_v4 = vmax.f32 %v884_v5, 0.0 }
 0x334   : > { %v879_v21 = vadd.f32 %v878_v51, %v792_v28  ;;  %v938_v56 = vmax.f32 %v876_v1, 0.0 }
 0x335   : > { %v941_v58 = vmax.f32 %v887_v25, 0.0 }
 0x336   : > { %v939_v26 = vmax.f32 %v879_v21, 0.0 }
 0x337   : > { %v955_v11 = vpack.c.bf16 %v941_v58, %v940_v4 }
 0x338   : > { %v954_v54 = vpack.c.bf16 %v939_v26, %v938_v56  ;;  %v2361_v31 = vpop.f32.mrb[4].mxu1  ;;  %v3762_v56 = vsub.s32 3, %v3175_v14 }
 0x339   : > { %v900_v63 = vadd.f32 %v2361_v31, %v792_v28  ;;  %v891_v17 = vpop.f32.mrb[5].mxu1 }
 0x33a   : > { %v892_v6 = vadd.f32 %v891_v17, %v792_v28  ;;  %v2362_v43 = vpop.f32.mrb[6].mxu1  ;;  %2387 = vmatprep.mubr.bf16.mxu0 %v954_v54 }
 0x33b   : > { %v903_v0 = vadd.f32 %v2362_v43, %v792_v28  ;;  %v894_v10 = vpop.f32.mrb[7].mxu1  ;;  %2388 = vmatmul.mubr.bf16.vlgmr.msra.gmra.mrb[16].mxu0 %v955_v11  ;;  %v944_v42 = vmax.f32 %v900_v63, 0.0  ;;  %v1142_v11 = vrot.slane %v3187_v45, %v3762_v56 }
 0x33c   : > { %v895_v30 = vadd.f32 %v894_v10, %v792_v28  ;;  %v942_v60 = vmax.f32 %v892_v6, 0.0 }
 0x33d   : > { %v945_v35 = vmax.f32 %v903_v0, 0.0 }
 0x33e   : > { %v943_v50 = vmax.f32 %v895_v30, 0.0 }
 0x33f   : > { %v957_v52 = vpack.c.bf16 %v945_v35, %v944_v42 }
 0x340   : > { %v956_v46 = vpack.c.bf16 %v943_v50, %v942_v60  ;;  %v2365_v15 = vpop.f32.mrb[8].mxu1 }
 0x341   : > { %v916_v53 = vadd.f32 %v2365_v15, %v792_v28  ;;  %v907_v61 = vpop.f32.mrb[9].mxu1 }
 0x342   : > { %v908_v59 = vadd.f32 %v907_v61, %v792_v28  ;;  %v2366_v55 = vpop.f32.mrb[10].mxu1  ;;  %2391 = vmatprep.mubr.bf16.mxu0 %v956_v46 }
 0x343   : > { %v919_v20 = vadd.f32 %v2366_v55, %v792_v28  ;;  %v910_v3 = vpop.f32.mrb[11].mxu1  ;;  %2392 = vmatmul.mubr.bf16.gmra.mrb[20].mxu0 %v957_v52  ;;  %v948_v37 = vmax.f32 %v916_v53, 0.0 }
 0x344   : > { %v911_v24 = vadd.f32 %v910_v3, %v792_v28  ;;  %v946_v62 = vmax.f32 %v908_v59, 0.0 }
 0x345   : > { %v949_v9 = vmax.f32 %v919_v20, 0.0 }
 0x346   : > { %v947_v19 = vmax.f32 %v911_v24, 0.0 }
 0x347   : > { %v959_v16 = vpack.c.bf16 %v949_v9, %v948_v37 }
 0x348   : > { %v958_v57 = vpack.c.bf16 %v947_v19, %v946_v62  ;;  %v2369_v22 = vpop.f32.mrb[12].mxu1 }
 0x349   : > { %v932_v13 = vadd.f32 %v2369_v22, %v792_v28  ;;  %v923_v18 = vpop.f32.mrb[13].mxu1 }
 0x34a   : > { %v924_v34 = vadd.f32 %v923_v18, %v792_v28  ;;  %v2370_v8 = vpop.f32.mrb[14].mxu1  ;;  %2395 = vmatprep.mubr.bf16.mxu0 %v958_v57  ;;  %v3784_v57 = vld [vmem:[#allocation10_spill] sm:$0xff] }
 0x34b   : > { %v935_v5 = vadd.f32 %v2370_v8, %v792_v28  ;;  %v926_v38 = vpop.f32.mrb[15].mxu1  ;;  %2396 = vmatmul.mubr.bf16.gmra.mrb[24].mxu0 %v959_v16  ;;  %v952_v23 = vmax.f32 %v932_v13, 0.0  ;;  %v3786_v13 = vld [vmem:[#allocation9_spill] sm:$0xff] }
 0x34c   : > { %v927_v1 = vadd.f32 %v926_v38, %v792_v28  ;;  %v950_v51 = vmax.f32 %v924_v34, 0.0  ;;  %v3787_v34 = vld [vmem:[#allocation11_spill] sm:$0xff] }
 0x34d   : > { %v953_v25 = vmax.f32 %v935_v5, 0.0 }
 0x34e   : > { %v951_v21 = vmax.f32 %v927_v1, 0.0 }
 0x34f   : > { %v961_v4 = vpack.c.bf16 %v953_v25, %v952_v23 }
 0x350   : > { %v960_v58 = vpack.c.bf16 %v951_v21, %v950_v51 }
 0x352   : > { %2399 = vmatprep.mubr.bf16.mxu0 %v960_v58 }
 0x353   : > { %2400 = vmatmul.mubr.bf16.gmra.mrb[28].mxu0 %v961_v4 }
 0x40e   : > { %v2389_v26 = vpop.f32.mrb[16].mxu0 }
 0x40f   : > { %v1060_v54 = vpop.f32.mrb[17].mxu0  ;;  %v1125_v17 = vadd.f32 %v2389_v26, %v2940_v27 }
 0x410   : > { %v1123_v31 = vadd.f32 %v1060_v54, %v2942_v29  ;;  %v2390_v63 = vpop.f32.mrb[18].mxu0 }
 0x411   : > { %v1063_v28 = vpop.f32.mrb[19].mxu0  ;;  %v1126_v0 = vadd.f32 %v2390_v63, %v2946_v32  ;;  %v3280_v30 = vadd.f32 %v1142_v11, %v1125_v17 }
 0x412   : > { %v3273_v6 = vadd.f32 %v1142_v11, %v1123_v31  ;;  %v1124_v43 = vadd.f32 %v1063_v28, %v2948_v33 }
 0x413   : > { %v3283_v42 = vadd.f32 %v1142_v11, %v1126_v0 }
 0x414   : > { %v3277_v10 = vadd.f32 %v1142_v11, %v1124_v43  ;;  %1161 = vadd.xlane.f32.xlu0 %v3273_v6 }
 0x416   : > { %1163 = vadd.xlane.f32.xlu1 %v3277_v10  ;;  %v2393_v45 = vpop.f32.mrb[20].mxu0 }
 0x417   : > { %v1076_v29 = vpop.f32.mrb[21].mxu0  ;;  %v1129_v32 = vadd.f32 %v2393_v45, %v2957_v40 }
 0x418   : > { %v1127_v27 = vadd.f32 %v1076_v29, %v2952_v36  ;;  %1165 = vadd.xlane.f32.xlu0 %v3280_v30  ;;  %v2394_v35 = vpop.f32.mrb[22].mxu0 }
 0x419   : > { %v1079_v33 = vpop.f32.mrb[23].mxu0  ;;  %v1130_v52 = vadd.f32 %v2394_v35, %v2960_v41  ;;  %v3296_v15 = vadd.f32 %v1142_v11, %v1129_v32 }
 0x41a   : > { %v3288_v60 = vadd.f32 %v1142_v11, %v1127_v27  ;;  %v1128_v50 = vadd.f32 %v1079_v33, %v2954_v39  ;;  %1167 = vadd.xlane.f32.xlu1 %v3283_v42 }
 0x41b   : > { %v3299_v61 = vadd.f32 %v1142_v11, %v1130_v52 }
 0x41c   : > { %v3293_v46 = vadd.f32 %v1142_v11, %v1128_v50  ;;  %1169 = vadd.xlane.f32.xlu0 %v3288_v60 }
 0x41e   : > { %1171 = vadd.xlane.f32.xlu1 %v3293_v46  ;;  %v2397_v36 = vpop.f32.mrb[24].mxu0 }
 0x41f   : > { %v1092_v53 = vpop.f32.mrb[25].mxu0  ;;  %v1133_v41 = vadd.f32 %v2397_v36, %v2969_v48  ;;  %v3783_v48 = vld [vmem:[#allocation8_spill] sm:$0xff] }
 0x420   : > { %v1131_v40 = vadd.f32 %v1092_v53, %v2963_v44  ;;  %1173 = vadd.xlane.f32.xlu0 %v3296_v15  ;;  %v2398_v39 = vpop.f32.mrb[26].mxu0 }
 0x421   : > { %v1095_v59 = vpop.f32.mrb[27].mxu0  ;;  %v1134_v3 = vadd.f32 %v2398_v39, %v2972_v49  ;;  %v3312_v37 = vadd.f32 %v1142_v11, %v1133_v41 }
 0x422   : > { %v3304_v55 = vadd.f32 %v1142_v11, %v1131_v40  ;;  %v1132_v20 = vadd.f32 %v1095_v59, %v2966_v47  ;;  %1175 = vadd.xlane.f32.xlu1 %v3299_v61 }
 0x423   : > { %v3315_v62 = vadd.f32 %v1142_v11, %v1134_v3 }
 0x424   : > { %v3309_v24 = vadd.f32 %v1142_v11, %v1132_v20  ;;  %1177 = vadd.xlane.f32.xlu0 %v3304_v55 }
 0x426   : > { %3782 = vst [vmem:[#allocation12_spill] sm:$0xff] %v3309_v24  ;;  %1179 = vadd.xlane.f32.xlu1 %v3309_v24  ;;  %v2401_v44 = vpop.f32.mrb[28].mxu0 }
 0x427   : > { %v1108_v9 = vpop.f32.mrb[29].mxu0  ;;  %v1137_v49 = vadd.f32 %v2401_v44, %v3784_v57 }
 0x428   : > { %v1135_v19 = vadd.f32 %v1108_v9, %v3783_v48  ;;  %1181 = vadd.xlane.f32.xlu0 %v3312_v37  ;;  %v2402_v47 = vpop.f32.mrb[30].mxu0 }
 0x429   : > { %v1111_v16 = vpop.f32.mrb[31].mxu0  ;;  %v1138_v8 = vadd.f32 %v2402_v47, %v3787_v34  ;;  %v3328_v38 = vadd.f32 %v1142_v11, %v1137_v49 }
 0x42a   : > { %v3320_v22 = vadd.f32 %v1142_v11, %v1135_v19  ;;  %v1136_v18 = vadd.f32 %v1111_v16, %v3786_v13  ;;  %1183 = vadd.xlane.f32.xlu1 %v3315_v62 }
 0x42b   : > { %3789 = vst [vmem:[#allocation9_spill] sm:$0xff] %v3328_v38  ;;  %v3331_v1 = vadd.f32 %v1142_v11, %v1138_v8 }
 0x42c   : > { %3785 = vst [vmem:[#allocation8_spill] sm:$0xff] %v3320_v22  ;;  %v3325_v5 = vadd.f32 %v1142_v11, %v1136_v18  ;;  %1185 = vadd.xlane.f32.xlu0 %v3320_v22 }
 0x42d   : > { %3790 = vst [vmem:[#allocation11_spill] sm:$0xff] %v3331_v1 }
 0x42e   : > { %3788 = vst [vmem:[#allocation10_spill] sm:$0xff] %v3325_v5  ;;  %1187 = vadd.xlane.f32.xlu1 %v3325_v5 }
 0x430   : > { %1189 = vadd.xlane.f32.xlu0 %v3328_v38 }
 0x432   : > { %1191 = vadd.xlane.f32.xlu1 %v3331_v1 }
 0x4a1   : > { %v1162_v23 = vpop.xlane.xlu0 %1161 }
 0x4a2   : > { %v3335_v25 = vmul.f32 0.03125, %v1162_v23 }
 0x4a3   : > { %v1164_v51 = vpop.xlane.xlu1 %1163 }
 0x4a4   : > { %v3337_v21 = vmul.f32 0.03125, %v1164_v51  ;;  %v3341_v4 = vsub.f32 %v3273_v6, %v3335_v25 }
 0x4a5   : > { %v1166_v58 = vpop.xlane.xlu0 %1165 }
 0x4a6   : > { %v3343_v26 = vmul.f32 0.03125, %v1166_v58  ;;  %v1225_v11 = vmul.f32 %v3341_v4, %v3341_v4  ;;  %v3349_v54 = vsub.f32 %v3277_v10, %v3337_v21 }
 0x4a7   : > { %v1168_v31 = vpop.xlane.xlu1 %1167 }
 0x4a8   : > { %v3351_v63 = vmul.f32 0.03125, %v1168_v31  ;;  %1241 = vadd.xlane.f32.xlu0 %v1225_v11  ;;  %v1226_v28 = vmul.f32 %v3349_v54, %v3349_v54  ;;  %v3357_v17 = vsub.f32 %v3280_v30, %v3343_v26  ;;  %v2586_v11 = vld [vmem:[%s3749_s3 + $0x40] sm:$0xff]  }
 0x4a9   : > { %v1170_v43 = vpop.xlane.xlu0 %1169  ;;  %2403 = vmatprep.subr.bf16.mxu1 %v2586_v11 }
 0x4aa   : > { %v3359_v0 = vmul.f32 0.03125, %v1170_v43  ;;  %1243 = vadd.xlane.f32.xlu1 %v1226_v28  ;;  %v1227_v45 = vmul.f32 %v3357_v17, %v3357_v17  ;;  %v3365_v29 = vsub.f32 %v3283_v42, %v3351_v63  ;;  %2404 = vmatpush3.bf16.msra.mxu1 %v2586_v11 }
 0x4ab   : > { %v1172_v27 = vpop.xlane.xlu1 %1171 }
 0x4ac   : > { %v3367_v35 = vmul.f32 0.03125, %v1172_v27  ;;  %1245 = vadd.xlane.f32.xlu0 %v1227_v45  ;;  %v1228_v33 = vmul.f32 %v3365_v29, %v3365_v29  ;;  %v3373_v32 = vsub.f32 %v3288_v60, %v3359_v0  ;;  %v1277_v12 = vmul.f32 96.0, %v3359_v0 }
 0x4ad   : > { %v1174_v50 = vpop.xlane.xlu0 %1173 }
 0x4ae   : > { %v3375_v52 = vmul.f32 0.03125, %v1174_v50  ;;  %1247 = vadd.xlane.f32.xlu1 %v1228_v33  ;;  %v1229_v36 = vmul.f32 %v3373_v32, %v3373_v32  ;;  %v3381_v53 = vsub.f32 %v3293_v46, %v3367_v35  ;;  %v1278_v2 = vmul.f32 96.0, %v3367_v35 }
 0x4af   : > { %v1176_v40 = vpop.xlane.xlu1 %1175 }
 0x4b0   : > { %v3383_v39 = vmul.f32 0.03125, %v1176_v40  ;;  %1249 = vadd.xlane.f32.xlu0 %v1229_v36  ;;  %v1230_v59 = vmul.f32 %v3381_v53, %v3381_v53  ;;  %v3389_v41 = vsub.f32 %v3296_v15, %v3375_v52  ;;  %v2587_v40 = vld [vmem:[%s3749_s3 + $0x48] sm:$0xff]  }
 0x4b1   : > { %v1178_v20 = vpop.xlane.xlu0 %1177  ;;  %2405 = vmatprep.subr.bf16.mxu1 %v2587_v40 }
 0x4b2   : > { %v3391_v3 = vmul.f32 0.03125, %v1178_v20  ;;  %1251 = vadd.xlane.f32.xlu1 %v1230_v59  ;;  %v1231_v44 = vmul.f32 %v3389_v41, %v3389_v41  ;;  %v3397_v9 = vsub.f32 %v3299_v61, %v3383_v39  ;;  %2406 = vmatpush3.bf16.msra.mxu1 %v2587_v40  ;;  %v2593_v40 = vld [vmem:[%s3749_s3 + $0x78] sm:$0xff]  }
 0x4b3   : > { %v1180_v48 = vpop.xlane.xlu1 %1179 }
 0x4b4   : > { %v3399_v19 = vmul.f32 0.03125, %v1180_v48  ;;  %1253 = vadd.xlane.f32.xlu0 %v1231_v44  ;;  %v1232_v47 = vmul.f32 %v3397_v9, %v3397_v9  ;;  %v3405_v16 = vsub.f32 %v3304_v55, %v3391_v3 }
 0x4b5   : > { %v1182_v57 = vpop.xlane.xlu0 %1181 }
 0x4b6   : > { %v3407_v49 = vmul.f32 0.03125, %v1182_v57  ;;  %1255 = vadd.xlane.f32.xlu1 %v1232_v47  ;;  %v1233_v13 = vmul.f32 %v3405_v16, %v3405_v16  ;;  %v3413_v18 = vsub.f32 %v3309_v24, %v3399_v19 }
 0x4b7   : > { %v1184_v34 = vpop.xlane.xlu1 %1183 }
 0x4b8   : > { %v3415_v8 = vmul.f32 0.03125, %v1184_v34  ;;  %1257 = vadd.xlane.f32.xlu0 %v1233_v13  ;;  %v1234_v23 = vmul.f32 %v3413_v18, %v3413_v18  ;;  %v3421_v51 = vsub.f32 %v3312_v37, %v3407_v49  ;;  %v2588_v34 = vld [vmem:[%s3749_s3 + $0x50] sm:$0xff]  }
 0x4b9   : > { %v1186_v58 = vpop.xlane.xlu0 %1185  ;;  %2407 = vmatprep.subr.bf16.mxu1 %v2588_v34 }
 0x4ba   : > { %v3426_v31 = vmul.f32 0.03125, %v1186_v58  ;;  %1259 = vadd.xlane.f32.xlu1 %v1234_v23  ;;  %v1235_v28 = vmul.f32 %v3421_v51, %v3421_v51  ;;  %v3432_v43 = vsub.f32 %v3315_v62, %v3415_v8  ;;  %2408 = vmatpush3.bf16.msra.mxu1 %v2588_v34  ;;  %v2597_v34 = vld [vmem:[%s3750_s4 + $0x58] sm:$0xff]  }
 0x4bb   : > { %v1188_v45 = vpop.xlane.xlu1 %1187 }
 0x4bc   : > { %v3434_v27 = vmul.f32 0.03125, %v1188_v45  ;;  %1261 = vadd.xlane.f32.xlu0 %v1235_v28  ;;  %v1236_v33 = vmul.f32 %v3432_v43, %v3432_v43  ;;  %v3440_v50 = vsub.f32 %v3320_v22, %v3426_v31  ;;  %v2589_v28 = vld [vmem:[%s3749_s3 + $0x58] sm:$0xff]   ;;  %v2590_v45 = vld [vmem:[%s3749_s3 + $0x60] sm:$0xff]  }
 0x4bd   : > { %v1190_v36 = vpop.xlane.xlu0 %1189  ;;  %2409 = vmatprep.subr.bf16.mxu1 %v2589_v28 }
 0x4be   : > { %v3445_v59 = vmul.f32 0.03125, %v1190_v36  ;;  %1263 = vadd.xlane.f32.xlu1 %v1236_v33  ;;  %v1237_v20 = vmul.f32 %v3440_v50, %v3440_v50  ;;  %v3451_v44 = vsub.f32 %v3325_v5, %v3434_v27  ;;  %2410 = vmatpush3.bf16.msra.mxu1 %v2589_v28  ;;  %v2591_v33 = vld [vmem:[%s3749_s3 + $0x68] sm:$0xff]   ;;  %v2592_v36 = vld [vmem:[%s3749_s3 + $0x70] sm:$0xff]   ;;  %v1273_v28 = vmul.f32 96.0, %v3335_v25 }
 0x4bf   : > { %v1192_v48 = vpop.xlane.xlu1 %1191  ;;  %2411 = vmatprep.subr.bf16.mxu1 %v2590_v45 }
 0x4c0   : > { %v3453_v47 = vmul.f32 0.03125, %v1192_v48  ;;  %1265 = vadd.xlane.f32.xlu0 %v1237_v20  ;;  %v1238_v57 = vmul.f32 %v3451_v44, %v3451_v44  ;;  %v3459_v13 = vsub.f32 %v3328_v38, %v3445_v59  ;;  %v2594_v20 = vld [vmem:[%s3750_s4 + $0x40] sm:$0xff]   ;;  %v2595_v48 = vld [vmem:[%s3750_s4 + $0x48] sm:$0xff]  }
 0x4c1   : > { %2435 = vmatprep.subr.bf16.mxu0 %v2594_v20 }
 0x4c2   : > { %1267 = vadd.xlane.f32.xlu1 %v1238_v57  ;;  %v1239_v23 = vmul.f32 %v3459_v13, %v3459_v13  ;;  %v3468_v58 = vsub.f32 %v3331_v1, %v3453_v47  ;;  %2412 = vmatpush3.bf16.msra.mxu1 %v2590_v45  ;;  %v2596_v57 = vld [vmem:[%s3750_s4 + $0x50] sm:$0xff]   ;;  %v1274_v45 = vmul.f32 96.0, %v3337_v21  ;;  %v3791_v1 = vsub.s32 0, %v3175_v14 }
 0x4c3   : > { %2413 = vmatprep.subr.bf16.mxu1 %v2591_v33  ;;  %2436 = vmatpush3.bf16.msra.mxu0 %v2594_v20 }
 0x4c4   : > { %1269 = vadd.xlane.f32.xlu0 %v1239_v23  ;;  %v1240_v11 = vmul.f32 %v3468_v58, %v3468_v58  ;;  %2437 = vmatprep.subr.bf16.mxu0 %v2595_v48  ;;  %v2598_v23 = vld [vmem:[%s3750_s4 + $0x60] sm:$0xff]  }
 0x4c6   : > { %1271 = vadd.xlane.f32.xlu1 %v1240_v11  ;;  %2414 = vmatpush3.bf16.msra.mxu1 %v2591_v33  ;;  %v2599_v11 = vld [vmem:[%s3750_s4 + $0x68] sm:$0xff]   ;;  %v1289_v33 = vmul.f32 %v1273_v28, %v3335_v25  ;;  %v3517_v25 = vld [vmem:[%s3751_s5 + $0x4] sm:$0xf] }
 0x4c7   : > { %2415 = vmatprep.subr.bf16.mxu1 %v2592_v36  ;;  %2438 = vmatpush3.bf16.msra.mxu0 %v2595_v48  ;;  %v1290_v48 = vmul.f32 %v1274_v45, %v3337_v21  ;;  %v3525_v22 = vrot.slane %v3517_v25, %v3791_v1  ;;  %v1282_v1 = vmul.f32 96.0, %v3399_v19 }
 0x4c8   : > { %2439 = vmatprep.subr.bf16.mxu0 %v2596_v57 }
 0x4ca   : > { %2416 = vmatpush3.bf16.msra.mxu1 %v2592_v36  ;;  %v1275_v36 = vmul.f32 96.0, %v3343_v26 }
 0x4cb   : > { %2417 = vmatprep.subr.bf16.mxu1 %v2593_v40  ;;  %2440 = vmatpush3.bf16.msra.mxu0 %v2596_v57  ;;  %v1276_v57 = vmul.f32 96.0, %v3351_v63 }
 0x4cc   : > { %2441 = vmatprep.subr.bf16.mxu0 %v2597_v34 }
 0x4cd   : > { %v1292_v45 = vmul.f32 %v1276_v57, %v3351_v63  ;;  %v1281_v63 = vmul.f32 96.0, %v3391_v3 }
 0x4ce   : > { %2418 = vmatpush3.bf16.msra.mxu1 %v2593_v40 }
 0x4cf   : > { %2442 = vmatpush3.bf16.msra.mxu0 %v2597_v34 }
 0x4d0   : > { %2443 = vmatprep.subr.bf16.mxu0 %v2598_v23 }
 0x4d3   : > { %2444 = vmatpush3.bf16.msra.mxu0 %v2598_v23  ;;  %v1291_v23 = vmul.f32 %v1275_v36, %v3343_v26  ;;  %v1280_v26 = vmul.f32 96.0, %v3383_v39 }
 0x4d4   : > { %2445 = vmatprep.subr.bf16.mxu0 %v2599_v11 }
 0x4d7   : > { %2446 = vmatpush3.bf16.msra.mxu0 %v2599_v11 }
 0x535   : > { %v1242_v40 = vpop.xlane.xlu0 %1241 }
 0x536   : > { %v1305_v20 = vsub.f32 %v1242_v40, %v1289_v33 }
 0x537   : > { %v1244_v34 = vpop.xlane.xlu1 %1243 }
 0x538   : > { %v1321_v56 = vmul.f32 0.03125, %v1305_v20  ;;  %v1306_v7 = vsub.f32 %v1244_v34, %v1290_v48  ;;  %v1279_v20 = vmul.f32 96.0, %v3375_v52 }
 0x539   : > { %v1246_v11 = vpop.xlane.xlu0 %1245 }
 0x53a   : > { %v1337_v28 = vmax.f32 %v1321_v56, 0.0  ;;  %v1322_v33 = vmul.f32 0.03125, %v1306_v7  ;;  %v1307_v21 = vsub.f32 %v1246_v11, %v1291_v23  ;;  %v1293_v56 = vmul.f32 %v1277_v12, %v3359_v0 }
 0x53b   : > { %v1248_v40 = vpop.xlane.xlu1 %1247  ;;  %v1294_v23 = vmul.f32 %v1278_v2, %v3367_v35  ;;  %v1297_v35 = vmul.f32 %v1281_v63, %v3391_v3 }
 0x53c   : > { %v1353_v36 = vadd.f32 1e-05, %v1337_v28  ;;  %v1338_v48 = vmax.f32 %v1322_v33, 0.0  ;;  %v1323_v34 = vmul.f32 0.03125, %v1307_v21  ;;  %v1308_v5 = vsub.f32 %v1248_v40, %v1292_v45 }
 0x53d   : > { %v1250_v7 = vpop.xlane.xlu0 %1249  ;;  %v1295_v21 = vmul.f32 %v1279_v20, %v3375_v52  ;;  %v1296_v45 = vmul.f32 %v1280_v26, %v3383_v39  ;;  %v1298_v26 = vmul.f32 %v1282_v1, %v3399_v19 }
 0x53e   : > { %2642 = vrsqrt.f32 %v1353_v36  ;;  %v1354_v57 = vadd.f32 1e-05, %v1338_v48  ;;  %v1339_v11 = vmax.f32 %v1323_v34, 0.0  ;;  %v1324_v38 = vmul.f32 0.03125, %v1308_v5 }
 0x53f   : > { %v1309_v28 = vsub.f32 %v1250_v7, %v1293_v56  ;;  %v1252_v33 = vpop.xlane.xlu1 %1251  ;;  %v1283_v36 = vmul.f32 96.0, %v3407_v49  ;;  %v1284_v5 = vmul.f32 96.0, %v3415_v8  ;;  %v1285_v56 = vmul.f32 96.0, %v3426_v31 }
 0x540   : > { %2644 = vrsqrt.f32 %v1354_v57  ;;  %v1355_v40 = vadd.f32 1e-05, %v1339_v11  ;;  %v1340_v12 = vmax.f32 %v1324_v38, 0.0  ;;  %v1310_v0 = vsub.f32 %v1252_v33, %v1294_v23 }
 0x541   : > { %v1325_v24 = vmul.f32 0.03125, %v1309_v28  ;;  %v1254_v2 = vpop.xlane.xlu0 %1253  ;;  %v1286_v38 = vmul.f32 96.0, %v3434_v27  ;;  %v1299_v11 = vmul.f32 %v1283_v36, %v3407_v49  ;;  %v1300_v28 = vmul.f32 %v1284_v5, %v3415_v8 }
 0x542   : > { %2646 = vrsqrt.f32 %v1355_v40  ;;  %v1356_v48 = vadd.f32 1e-05, %v1340_v12  ;;  %v1326_v34 = vmul.f32 0.03125, %v1310_v0  ;;  %v1311_v52 = vsub.f32 %v1254_v2, %v1295_v21 }
 0x543   : > { %v1341_v20 = vmax.f32 %v1325_v24, 0.0  ;;  %v1256_v39 = vpop.xlane.xlu1 %1255  ;;  %v1287_v33 = vmul.f32 96.0, %v3445_v59  ;;  %v1301_v12 = vmul.f32 %v1285_v56, %v3426_v31  ;;  %v1302_v0 = vmul.f32 %v1286_v38, %v3434_v27 }
 0x544   : > { %2648 = vrsqrt.f32 %v1356_v48  ;;  %v1342_v7 = vmax.f32 %v1326_v34, 0.0  ;;  %v1327_v23 = vmul.f32 0.03125, %v1311_v52  ;;  %v1312_v3 = vsub.f32 %v1256_v39, %v1296_v45 }
 0x545   : > { %v1357_v63 = vadd.f32 1e-05, %v1341_v20  ;;  %v1258_v57 = vpop.xlane.xlu0 %1257  ;;  %v1288_v45 = vmul.f32 96.0, %v3453_v47  ;;  %v1303_v34 = vmul.f32 %v1287_v33, %v3445_v59 }
 0x546   : > { %v1358_v24 = vadd.f32 1e-05, %v1342_v7  ;;  %v1343_v21 = vmax.f32 %v1327_v23, 0.0  ;;  %v1328_v40 = vmul.f32 0.03125, %v1312_v3  ;;  %v1313_v19 = vsub.f32 %v1258_v57, %v1297_v35 }
 0x547   : > { %2650 = vrsqrt.f32 %v1357_v63  ;;  %v1260_v1 = vpop.xlane.xlu1 %1259  ;;  %v3792_v35 = vsub.s32 1, %v3175_v14  ;;  %v1304_v23 = vmul.f32 %v1288_v45, %v3453_v47 }
 0x548   : > { %v2643_v2 = vpop.eup %2642  ;;  %2652 = vrsqrt.f32 %v1358_v24  ;;  %v1359_v48 = vadd.f32 1e-05, %v1343_v21  ;;  %v1344_v49 = vmax.f32 %v1328_v40, 0.0  ;;  %v1329_v36 = vmul.f32 0.03125, %v1313_v19 }
 0x549   : > { %v1314_v8 = vsub.f32 %v1260_v1, %v1298_v26  ;;  %v1262_v5 = vpop.xlane.xlu0 %1261  ;;  %v1385_v52 = vmul.f32 %v2643_v2, %v3341_v4  ;;  %v3550_v20 = vrot.slane %v3517_v25, %v3792_v35 }
 0x54a   : > { %v2645_v31 = vpop.eup %2644  ;;  %2654 = vrsqrt.f32 %v1359_v48  ;;  %v1360_v27 = vadd.f32 1e-05, %v1344_v49  ;;  %v1345_v39 = vmax.f32 %v1329_v36, 0.0  ;;  %v1315_v56 = vsub.f32 %v1262_v5, %v1299_v11 }
 0x54b   : > { %v1330_v38 = vmul.f32 0.03125, %v1314_v8  ;;  %v1264_v7 = vpop.xlane.xlu1 %1263  ;;  %v1386_v26 = vmul.f32 %v2645_v31, %v3349_v54  ;;  %v1405_v59 = vmul.f32 %v3525_v22, %v1385_v52 }
 0x54c   : > { %v2647_v3 = vpop.eup %2646  ;;  %2656 = vrsqrt.f32 %v1360_v27  ;;  %v1361_v4 = vadd.f32 1e-05, %v1345_v39  ;;  %v1331_v63 = vmul.f32 0.03125, %v1315_v56  ;;  %v1316_v57 = vsub.f32 %v1264_v7, %v1300_v28 }
 0x54d   : > { %v1387_v33 = vmul.f32 %v2647_v3, %v3357_v17  ;;  %v1346_v24 = vmax.f32 %v1330_v38, 0.0  ;;  %v1266_v21 = vpop.xlane.xlu0 %1265  ;;  %v1406_v40 = vmul.f32 %v3525_v22, %v1386_v26  ;;  %v1425_v11 = vadd.f32 %v3550_v20, %v1405_v59 }
 0x54e   : > { %v2649_v19 = vpop.eup %2648  ;;  %2658 = vrsqrt.f32 %v1361_v4  ;;  %v1347_v47 = vmax.f32 %v1331_v63, 0.0  ;;  %v1332_v1 = vmul.f32 0.03125, %v1316_v57  ;;  %v1317_v54 = vsub.f32 %v1266_v21, %v1301_v12 }
 0x54f   : > { %v1407_v45 = vmul.f32 %v3525_v22, %v1387_v33  ;;  %v1388_v2 = vmul.f32 %v2649_v19, %v3365_v29  ;;  %v1362_v48 = vadd.f32 1e-05, %v1346_v24  ;;  %v1268_v49 = vpop.xlane.xlu1 %1267  ;;  %v1426_v28 = vadd.f32 %v3550_v20, %v1406_v40 }
 0x550   : > { %v1363_v17 = vadd.f32 1e-05, %v1347_v47  ;;  %v1348_v36 = vmax.f32 %v1332_v1, 0.0  ;;  %v1333_v8 = vmul.f32 0.03125, %v1317_v54  ;;  %v1318_v5 = vsub.f32 %v1268_v49, %v1302_v0 }
 0x551   : > { %v2651_v52 = vpop.eup %2650  ;;  %v1408_v35 = vmul.f32 %v3525_v22, %v1388_v2  ;;  %2660 = vrsqrt.f32 %v1362_v48  ;;  %v1270_v31 = vpop.xlane.xlu0 %1269  ;;  %v1441_v27 = vpack.c.bf16 %v1426_v28, %v1425_v11  ;;  %v1427_v12 = vadd.f32 %v3550_v20, %v1407_v45 }
 0x552   : > { %v2653_v39 = vpop.eup %2652  ;;  %2662 = vrsqrt.f32 %v1363_v17  ;;  %v1364_v56 = vadd.f32 1e-05, %v1348_v36  ;;  %v1349_v29 = vmax.f32 %v1333_v8, 0.0  ;;  %v1334_v38 = vmul.f32 0.03125, %v1318_v5 }
 0x553   : > { %v1319_v7 = vsub.f32 %v1270_v31, %v1303_v34  ;;  %v1272_v26 = vpop.xlane.xlu1 %1271  ;;  %2419 = vmatprep.mubr.bf16.mxu1 %v1441_v27  ;;  %v1428_v59 = vadd.f32 %v3550_v20, %v1408_v35  ;;  %v1389_v0 = vmul.f32 %v2651_v52, %v3373_v32  ;;  %v1390_v3 = vmul.f32 %v2653_v39, %v3381_v53 }
 0x554   : > { %v2655_v4 = vpop.eup %2654  ;;  %2664 = vrsqrt.f32 %v1364_v56  ;;  %v1365_v63 = vadd.f32 1e-05, %v1349_v29  ;;  %v1350_v57 = vmax.f32 %v1334_v38, 0.0  ;;  %v1320_v33 = vsub.f32 %v1272_v26, %v1304_v23 }
 0x555   : > { %v1335_v24 = vmul.f32 0.03125, %v1319_v7  ;;  %v1442_v21 = vpack.c.bf16 %v1428_v59, %v1427_v12  ;;  %v1409_v40 = vmul.f32 %v3525_v22, %v1389_v0  ;;  %v1410_v11 = vmul.f32 %v3525_v22, %v1390_v3 }
 0x556   : > { %v2657_v34 = vpop.eup %2656  ;;  %2666 = vrsqrt.f32 %v1365_v63  ;;  %v1366_v19 = vadd.f32 1e-05, %v1350_v57  ;;  %v1336_v47 = vmul.f32 0.03125, %v1320_v33  ;;  %v1391_v1 = vmul.f32 %v2655_v4, %v3389_v41 }
 0x557   : > { %v1351_v32 = vmax.f32 %v1335_v24, 0.0  ;;  %2420 = vmatmul.mubr.bf16.vlgmr.msra.gmra.mrb[16].mxu1 %v1442_v21  ;;  %v1429_v53 = vadd.f32 %v3550_v20, %v1409_v40  ;;  %v1430_v54 = vadd.f32 %v3550_v20, %v1410_v11  ;;  %v1392_v23 = vmul.f32 %v2657_v34, %v3397_v9 }
 0x558   : > { %v2659_v45 = vpop.eup %2658  ;;  %2668 = vrsqrt.f32 %v1366_v19  ;;  %v1352_v2 = vmax.f32 %v1336_v47, 0.0  ;;  %v1411_v48 = vmul.f32 %v3525_v22, %v1391_v1 }
 0x559   : > { %v1367_v49 = vadd.f32 1e-05, %v1351_v32  ;;  %v1443_v28 = vpack.c.bf16 %v1430_v54, %v1429_v53  ;;  %v1412_v17 = vmul.f32 %v3525_v22, %v1392_v23  ;;  %v1393_v36 = vmul.f32 %v2659_v45, %v3405_v16  ;;  %v2603_v54 = vld [vmem:[#allocation2 + $0x8] sm:$0xff]   ;;  %v2605_v23 = vld [vmem:[#allocation2 + $0x18] sm:$0xff]   ;;  %v3606_v45 = vld [vmem:[#allocation2 + $0x20] sm:$0xff]  }
 0x55a   : > { %v1368_v41 = vadd.f32 1e-05, %v1352_v2  ;;  %v1431_v5 = vadd.f32 %v3550_v20, %v1411_v48  ;;  %v3793_v2 = vsub.s32 2, %v3175_v14 }
 0x55b   : > { %v2661_v8 = vpop.eup %2660  ;;  %2670 = vrsqrt.f32 %v1367_v49  ;;  %2423 = vmatprep.mubr.bf16.mxu1 %v1443_v28  ;;  %v1432_v52 = vadd.f32 %v3550_v20, %v1412_v17  ;;  %v1413_v9 = vmul.f32 %v3525_v22, %v1393_v36 }
 0x55c   : > { %v2663_v35 = vpop.eup %2662  ;;  %2672 = vrsqrt.f32 %v1368_v41  ;;  %v1394_v31 = vmul.f32 %v2661_v8, %v3413_v18  ;;  %v3613_v48 = vrot.slane %v3517_v25, %v3793_v2 }
 0x55d   : > { %v1444_v27 = vpack.c.bf16 %v1432_v52, %v1431_v5  ;;  %v1395_v12 = vmul.f32 %v2663_v35, %v3421_v51  ;;  %v1433_v7 = vadd.f32 %v3550_v20, %v1413_v9 }
 0x55e   : > { %v2665_v39 = vpop.eup %2664  ;;  %v1414_v16 = vmul.f32 %v3525_v22, %v1394_v31 }
 0x55f   : > { %2424 = vmatmul.mubr.bf16.gmra.mrb[20].mxu1 %v1444_v27  ;;  %v1396_v56 = vmul.f32 %v2665_v39, %v3432_v43  ;;  %v1415_v29 = vmul.f32 %v3525_v22, %v1395_v12 }
 0x560   : > { %v2667_v38 = vpop.eup %2666  ;;  %v1434_v26 = vadd.f32 %v3550_v20, %v1414_v16 }
 0x561   : > { %v1416_v59 = vmul.f32 %v3525_v22, %v1396_v56  ;;  %v1397_v18 = vmul.f32 %v2667_v38, %v3440_v50  ;;  %v1435_v51 = vadd.f32 %v3550_v20, %v1415_v29 }
 0x562   : > { %v2669_v0 = vpop.eup %2668  ;;  %v1445_v3 = vpack.c.bf16 %v1434_v26, %v1433_v7 }
 0x563   : > { %v1436_v4 = vadd.f32 %v3550_v20, %v1416_v59  ;;  %v1398_v63 = vmul.f32 %v2669_v0, %v3451_v44  ;;  %v1417_v43 = vmul.f32 %v3525_v22, %v1397_v18 }
 0x564   : > { %2427 = vmatprep.mubr.bf16.mxu1 %v1445_v3 }
 0x565   : > { %v2671_v57 = vpop.eup %2670  ;;  %v1446_v33 = vpack.c.bf16 %v1436_v4, %v1435_v51  ;;  %v1418_v24 = vmul.f32 %v3525_v22, %v1398_v63  ;;  %v1437_v50 = vadd.f32 %v3550_v20, %v1417_v43 }
 0x566   : > { %v2673_v21 = vpop.eup %2672  ;;  %v1399_v40 = vmul.f32 %v2671_v57, %v3459_v13  ;;  %v2600_v13 = vld [vmem:[%s3750_s4 + $0x70] sm:$0xff]  }
 0x567   : > { %2428 = vmatmul.mubr.bf16.gmra.mrb[24].mxu1 %v1446_v33  ;;  %v1438_v11 = vadd.f32 %v3550_v20, %v1418_v24  ;;  %v1400_v34 = vmul.f32 %v2673_v21, %v3468_v58  ;;  %2447 = vmatprep.subr.bf16.mxu0 %v2600_v13  ;;  %v2601_v58 = vld [vmem:[%s3750_s4 + $0x78] sm:$0xff]  }
 0x568   : > { %v1419_v19 = vmul.f32 %v3525_v22, %v1399_v40  ;;  %2448 = vmatpush3.bf16.msra.mxu0 %v2600_v13 }
 0x569   : > { %v1447_v44 = vpack.c.bf16 %v1438_v11, %v1437_v50  ;;  %v1420_v47 = vmul.f32 %v3525_v22, %v1400_v34  ;;  %2449 = vmatprep.subr.bf16.mxu0 %v2601_v58  ;;  %v2602_v22 = vld [vmem:[#allocation2] sm:$0xff]  }
 0x56a   : > { %v1439_v1 = vadd.f32 %v3550_v20, %v1419_v19  ;;  %2499 = vmatprep.subr.bf16.mxu1 %v2602_v22 }
 0x56b   : > { %2431 = vmatprep.mubr.bf16.mxu1 %v1447_v44  ;;  %v1440_v32 = vadd.f32 %v3550_v20, %v1420_v47  ;;  %2507 = vmatpush3.bf16.msra.mxu1 %v2602_v22  ;;  %v2604_v20 = vld [vmem:[#allocation2 + $0x10] sm:$0xff]  }
 0x56c   : > { %2450 = vmatpush3.bf16.msra.mxu0 %v2601_v58  ;;  %2500 = vmatprep.subr.bf16.mxu1 %v2603_v54 }
 0x56d   : > { %v1448_v53 = vpack.c.bf16 %v1440_v32, %v1439_v1  ;;  %2467 = vmatprep.subr.bf16.mxu0 %v2602_v22 }
 0x56f   : > { %2432 = vmatmul.mubr.bf16.gmra.mrb[28].mxu1 %v1448_v53 }
 0x570   : > { %2508 = vmatpush3.bf16.msra.mxu1 %v2603_v54 }
 0x571   : > { %2501 = vmatprep.subr.bf16.mxu1 %v2604_v20 }
 0x574   : > { %2509 = vmatpush3.bf16.msra.mxu1 %v2604_v20 }
 0x575   : > { %2502 = vmatprep.subr.bf16.mxu1 %v2605_v23 }
 0x578   : > { %2510 = vmatpush3.bf16.msra.mxu1 %v2605_v23 }
 0x579   : > { %2503 = vmatprep.subr.bf16.mxu1 %v3606_v45 }
 0x57c   : > { %2511 = vmatpush3.bf16.msra.mxu1 %v3606_v45 }
 0x62a   : > { %v2421_v49 = vpop.f32.mrb[16].mxu1 }
 0x62b   : > { %v1561_v28 = vadd.f32 %v2421_v49, %v3613_v48  ;;  %v1552_v17 = vpop.f32.mrb[17].mxu1 }
 0x62c   : > { %v1553_v36 = vadd.f32 %v1552_v17, %v3613_v48  ;;  %v2422_v41 = vpop.f32.mrb[18].mxu1 }
 0x62d   : > { %v1564_v8 = vadd.f32 %v2422_v41, %v3613_v48  ;;  %v1555_v5 = vpop.f32.mrb[19].mxu1  ;;  %v1617_v9 = vmax.f32 %v1561_v28, 0.0 }
 0x62e   : > { %v1556_v52 = vadd.f32 %v1555_v5, %v3613_v48  ;;  %v1615_v31 = vmax.f32 %v1553_v36, 0.0 }
 0x62f   : > { %v1618_v35 = vmax.f32 %v1564_v8, 0.0 }
 0x630   : > { %v1616_v27 = vmax.f32 %v1556_v52, 0.0  ;;  %v2607_v52 = vld [vmem:[#allocation2 + $0x28] sm:$0xff]  }
 0x631   : > { %v1632_v12 = vpack.c.bf16 %v1618_v35, %v1617_v9  ;;  %2504 = vmatprep.subr.bf16.mxu1 %v2607_v52  ;;  %v2608_v9 = vld [vmem:[#allocation2 + $0x30] sm:$0xff]  }
 0x632   : > { %v1631_v39 = vpack.c.bf16 %v1616_v27, %v1615_v31  ;;  %v2425_v16 = vpop.f32.mrb[20].mxu1  ;;  %2512 = vmatpush3.bf16.msra.mxu1 %v2607_v52 }
 0x633   : > { %v1577_v56 = vadd.f32 %v2425_v16, %v3613_v48  ;;  %v1568_v29 = vpop.f32.mrb[21].mxu1  ;;  %2505 = vmatprep.subr.bf16.mxu1 %v2608_v9 }
 0x634   : > { %v1569_v38 = vadd.f32 %v1568_v29, %v3613_v48  ;;  %v2426_v7 = vpop.f32.mrb[22].mxu1  ;;  %2451 = vmatprep.mubr.bf16.mxu0 %v1631_v39 }
 0x635   : > { %v1580_v26 = vadd.f32 %v2426_v7, %v3613_v48  ;;  %v1571_v59 = vpop.f32.mrb[23].mxu1  ;;  %2452 = vmatmul.mubr.bf16.vlgmr.msra.gmra.mrb[32].mxu0 %v1632_v12  ;;  %v1621_v0 = vmax.f32 %v1577_v56, 0.0 }
 0x636   : > { %v1572_v18 = vadd.f32 %v1571_v59, %v3613_v48  ;;  %2468 = vmatpush3.bf16.msra.mxu0 %v2602_v22  ;;  %v1619_v51 = vmax.f32 %v1569_v38, 0.0  ;;  %2513 = vmatpush3.bf16.msra.mxu1 %v2608_v9 }
 0x637   : > { %v1622_v3 = vmax.f32 %v1580_v26, 0.0  ;;  %2469 = vmatprep.subr.bf16.mxu0 %v2603_v54 }
 0x638   : > { %v1620_v4 = vmax.f32 %v1572_v18, 0.0 }
 0x639   : > { %v1634_v63 = vpack.c.bf16 %v1622_v3, %v1621_v0 }
 0x63a   : > { %v1633_v43 = vpack.c.bf16 %v1620_v4, %v1619_v51  ;;  %v2429_v57 = vpop.f32.mrb[24].mxu1  ;;  %2470 = vmatpush3.bf16.msra.mxu0 %v2603_v54 }
 0x63b   : > { %v1593_v33 = vadd.f32 %v2429_v57, %v3613_v48  ;;  %v1584_v24 = vpop.f32.mrb[25].mxu1  ;;  %2471 = vmatprep.subr.bf16.mxu0 %v2604_v20 }
 0x63c   : > { %v1585_v21 = vadd.f32 %v1584_v24, %v3613_v48  ;;  %v2430_v40 = vpop.f32.mrb[26].mxu1  ;;  %2455 = vmatprep.mubr.bf16.mxu0 %v1633_v43 }
 0x63d   : > { %v1596_v50 = vadd.f32 %v2430_v40, %v3613_v48  ;;  %v1587_v11 = vpop.f32.mrb[27].mxu1  ;;  %2456 = vmatmul.mubr.bf16.gmra.mrb[36].mxu0 %v1634_v63  ;;  %v1625_v19 = vmax.f32 %v1593_v33, 0.0 }
 0x63e   : > { %v1588_v34 = vadd.f32 %v1587_v11, %v3613_v48  ;;  %2472 = vmatpush3.bf16.msra.mxu0 %v2604_v20  ;;  %v1623_v47 = vmax.f32 %v1585_v21, 0.0 }
 0x63f   : > { %v1626_v44 = vmax.f32 %v1596_v50, 0.0  ;;  %2473 = vmatprep.subr.bf16.mxu0 %v2605_v23 }
 0x640   : > { %v1624_v1 = vmax.f32 %v1588_v34, 0.0 }
 0x641   : > { %v1636_v32 = vpack.c.bf16 %v1626_v44, %v1625_v19 }
 0x642   : > { %v1635_v53 = vpack.c.bf16 %v1624_v1, %v1623_v47  ;;  %v2433_v13 = vpop.f32.mrb[28].mxu1  ;;  %2474 = vmatpush3.bf16.msra.mxu0 %v2605_v23 }
 0x643   : > { %v1609_v58 = vadd.f32 %v2433_v13, %v3613_v48  ;;  %v1600_v22 = vpop.f32.mrb[29].mxu1  ;;  %2475 = vmatprep.subr.bf16.mxu0 %v3606_v45 }
 0x644   : > { %v1601_v54 = vadd.f32 %v1600_v22, %v3613_v48  ;;  %v2434_v2 = vpop.f32.mrb[30].mxu1  ;;  %2459 = vmatprep.mubr.bf16.mxu0 %v1635_v53 }
 0x645   : > { %v1612_v20 = vadd.f32 %v2434_v2, %v3613_v48  ;;  %v1603_v49 = vpop.f32.mrb[31].mxu1  ;;  %2460 = vmatmul.mubr.bf16.gmra.mrb[40].mxu0 %v1636_v32  ;;  %v1629_v17 = vmax.f32 %v1609_v58, 0.0 }
 0x646   : > { %v1604_v28 = vadd.f32 %v1603_v49, %v3613_v48  ;;  %2476 = vmatpush3.bf16.msra.mxu0 %v3606_v45  ;;  %v1627_v23 = vmax.f32 %v1601_v54, 0.0  ;;  %v2609_v48 = vld [vmem:[#allocation2 + $0x38] sm:$0xff]   ;;  %v3794_v45 = vsub.s32 3, %v3175_v14  ;;  %v3795_v54 = vld [vmem:[#allocation12_spill] sm:$0xff] }
 0x647   : > { %v1630_v36 = vmax.f32 %v1612_v20, 0.0  ;;  %2477 = vmatprep.subr.bf16.mxu0 %v2607_v52  ;;  %2506 = vmatprep.subr.bf16.mxu1 %v2609_v48 }
 0x648   : > { %v1628_v41 = vmax.f32 %v1604_v28, 0.0  ;;  %2514 = vmatpush3.bf16.msra.mxu1 %v2609_v48  ;;  %v3636_v35 = vrot.slane %v3517_v25, %v3794_v45 }
 0x649   : > { %v1638_v8 = vpack.c.bf16 %v1630_v36, %v1629_v17 }
 0x64a   : > { %v1637_v5 = vpack.c.bf16 %v1628_v41, %v1627_v23  ;;  %2478 = vmatpush3.bf16.msra.mxu0 %v2607_v52  ;;  %v3796_v23 = vld [vmem:[#allocation9_spill] sm:$0xff] }
 0x64b   : > { %2479 = vmatprep.subr.bf16.mxu0 %v2608_v9 }
 0x64c   : > { %2463 = vmatprep.mubr.bf16.mxu0 %v1637_v5  ;;  %v3797_v5 = vld [vmem:[#allocation8_spill] sm:$0xff] }
 0x64d   : > { %2464 = vmatmul.mubr.bf16.gmra.mrb[44].mxu0 %v1638_v8 }
 0x64e   : > { %2480 = vmatpush3.bf16.msra.mxu0 %v2608_v9 }
 0x64f   : > { %2481 = vmatprep.subr.bf16.mxu0 %v2609_v48 }
 0x652   : > { %2482 = vmatpush3.bf16.msra.mxu0 %v2609_v48 }
 0x708   : > { %v2453_v31 = vpop.f32.mrb[32].mxu0 }
 0x709   : > { %v1803_v27 = vadd.f32 %v2453_v31, %v3280_v30  ;;  %v1738_v12 = vpop.f32.mrb[33].mxu0  ;;  %v3798_v31 = vld [vmem:[#allocation11_spill] sm:$0xff] }
 0x70a   : > { %v1801_v39 = vadd.f32 %v1738_v12, %v3273_v6  ;;  %v2454_v16 = vpop.f32.mrb[34].mxu0 }
 0x70b   : > { %v1823_v56 = vadd.f32 %v3636_v35, %v1803_v27  ;;  %v1804_v29 = vadd.f32 %v2454_v16, %v3283_v42  ;;  %v1741_v38 = vpop.f32.mrb[35].mxu0  ;;  %v3799_v16 = vld [vmem:[#allocation10_spill] sm:$0xff] }
 0x70c   : > { %v1821_v7 = vadd.f32 %v3636_v35, %v1801_v39  ;;  %v1802_v26 = vadd.f32 %v1741_v38, %v3277_v10 }
 0x70d   : > { %v1824_v14 = vadd.f32 %v3636_v35, %v1804_v29  ;;  %v1839_v59 = vmax.f32 %v1823_v56, 0.0 }
 0x70e   : > { %v1822_v25 = vadd.f32 %v3636_v35, %v1802_v26  ;;  %v1837_v30 = vmax.f32 %v1821_v7, 0.0 }
 0x70f   : > { %v1840_v18 = vmax.f32 %v1824_v14, 0.0 }
 0x710   : > { %v1838_v0 = vmax.f32 %v1822_v25, 0.0  ;;  %v2457_v3 = vpop.f32.mrb[36].mxu0 }
 0x711   : > { %v1854_v6 = vpack.c.bf16 %v1840_v18, %v1839_v59  ;;  %v1807_v51 = vadd.f32 %v2457_v3, %v3296_v15  ;;  %v1754_v4 = vpop.f32.mrb[37].mxu0 }
 0x712   : > { %v1805_v42 = vadd.f32 %v1754_v4, %v3288_v60  ;;  %v2458_v63 = vpop.f32.mrb[38].mxu0  ;;  %v1853_v43 = vpack.c.bf16 %v1838_v0, %v1837_v30  ;;  %v2217_v30 = vld [vmem:[%s3753_s7] ss:$0 sm:$0xff] }
 0x713   : > { %v1827_v57 = vadd.f32 %v3636_v35, %v1807_v51  ;;  %v1808_v10 = vadd.f32 %v2458_v63, %v3299_v61  ;;  %v1757_v33 = vpop.f32.mrb[39].mxu0 }
 0x714   : > { %v1825_v24 = vadd.f32 %v3636_v35, %v1805_v42  ;;  %v1806_v21 = vadd.f32 %v1757_v33, %v3293_v46  ;;  %2483 = vmatprep.mubr.bf16.mxu0 %v1853_v43 }
 0x715   : > { %v1828_v40 = vadd.f32 %v3636_v35, %v1808_v10  ;;  %2484 = vmatmul.mubr.bf16.vlgmr.msra.gmra.mrb[48].mxu0 %v1854_v6  ;;  %v1843_v50 = vmax.f32 %v1827_v57, 0.0 }
 0x716   : > { %v1826_v15 = vadd.f32 %v3636_v35, %v1806_v21  ;;  %v1841_v60 = vmax.f32 %v1825_v24, 0.0 }
 0x717   : > { %v1844_v11 = vmax.f32 %v1828_v40, 0.0 }
 0x718   : > { %v1842_v34 = vmax.f32 %v1826_v15, 0.0  ;;  %v2461_v19 = vpop.f32.mrb[40].mxu0 }
 0x719   : > { %v1856_v44 = vpack.c.bf16 %v1844_v11, %v1843_v50  ;;  %v1811_v47 = vadd.f32 %v2461_v19, %v3312_v37  ;;  %v1770_v61 = vpop.f32.mrb[41].mxu0 }
 0x71a   : > { %v1809_v1 = vadd.f32 %v1770_v61, %v3304_v55  ;;  %v2462_v32 = vpop.f32.mrb[42].mxu0  ;;  %v1855_v53 = vpack.c.bf16 %v1842_v34, %v1841_v60 }
 0x71b   : > { %v1831_v46 = vadd.f32 %v3636_v35, %v1811_v47  ;;  %v1812_v13 = vadd.f32 %v2462_v32, %v3315_v62  ;;  %v1773_v58 = vpop.f32.mrb[43].mxu0 }
 0x71c   : > { %v1829_v22 = vadd.f32 %v3636_v35, %v1809_v1  ;;  %v1810_v2 = vadd.f32 %v1773_v58, %v3795_v54  ;;  %2487 = vmatprep.mubr.bf16.mxu1 %v1855_v53 }
 0x71d   : > { %v1832_v20 = vadd.f32 %v3636_v35, %v1812_v13  ;;  %2488 = vmatmul.mubr.bf16.vlgmr.msra.gmra.mrb[32].mxu1 %v1856_v44  ;;  %v1847_v49 = vmax.f32 %v1831_v46, 0.0 }
 0x71e   : > { %v1830_v37 = vadd.f32 %v3636_v35, %v1810_v2  ;;  %v1845_v55 = vmax.f32 %v1829_v22, 0.0 }
 0x71f   : > { %v1848_v28 = vmax.f32 %v1832_v20, 0.0 }
 0x720   : > { %v1846_v17 = vmax.f32 %v1830_v37, 0.0  ;;  %v2465_v36 = vpop.f32.mrb[44].mxu0 }
 0x721   : > { %v1815_v41 = vadd.f32 %v2465_v36, %v3796_v23  ;;  %v1786_v8 = vpop.f32.mrb[45].mxu0  ;;  %v1858_v62 = vpack.c.bf16 %v1848_v28, %v1847_v49 }
 0x722   : > { %v1813_v52 = vadd.f32 %v1786_v8, %v3797_v5  ;;  %v2466_v9 = vpop.f32.mrb[46].mxu0  ;;  %v1857_v48 = vpack.c.bf16 %v1846_v17, %v1845_v55 }
 0x723   : > { %v1835_v45 = vadd.f32 %v3636_v35, %v1815_v41  ;;  %v1816_v27 = vadd.f32 %v2466_v9, %v3798_v31  ;;  %v1789_v12 = vpop.f32.mrb[47].mxu0 }
 0x724   : > { %v1833_v39 = vadd.f32 %v3636_v35, %v1813_v52  ;;  %v1814_v56 = vadd.f32 %v1789_v12, %v3799_v16  ;;  %2491 = vmatprep.mubr.bf16.mxu1 %v1857_v48 }
 0x725   : > { %v1836_v29 = vadd.f32 %v3636_v35, %v1816_v27  ;;  %2492 = vmatmul.mubr.bf16.gmra.mrb[36].mxu1 %v1858_v62  ;;  %v1851_v7 = vmax.f32 %v1835_v45, 0.0 }
 0x726   : > { %v1834_v38 = vadd.f32 %v3636_v35, %v1814_v56  ;;  %v1849_v14 = vmax.f32 %v1833_v39, 0.0 }
 0x727   : > { %v1852_v26 = vmax.f32 %v1836_v29, 0.0 }
 0x728   : > { %v1850_v25 = vmax.f32 %v1834_v38, 0.0 }
 0x729   : > { %v1860_v59 = vpack.c.bf16 %v1852_v26, %v1851_v7 }
 0x72a   : > { %v1859_v18 = vpack.c.bf16 %v1850_v25, %v1849_v14 }
 0x72c   : > { %2495 = vmatprep.mubr.bf16.mxu1 %v1859_v18 }
 0x72d   : > { %2496 = vmatmul.mubr.bf16.gmra.mrb[40].mxu1 %v1860_v59 }
 0x7e8   : > { %v2485_v0 = vpop.f32.mrb[48].mxu0 }
 0x7e9   : > { %v1975_v3 = vadd.f32 %v2485_v0, %v2217_v30  ;;  %v1966_v6 = vpop.f32.mrb[49].mxu0 }
 0x7ea   : > { %v1967_v51 = vadd.f32 %v2217_v30, %v1966_v6  ;;  %v2486_v35 = vpop.f32.mrb[50].mxu0 }
 0x7eb   : > { %2031 = vst [vmem:[%s3676_s20 + $0x10] sm:$0xff] %v1975_v3  ;;  %v1978_v4 = vadd.f32 %v2486_v35, %v2217_v30  ;;  %v1969_v42 = vpop.f32.mrb[51].mxu0 }
 0x7ec   : > { %2029 = vst [vmem:[%s3676_s20] sm:$0xff] %v1967_v51  ;;  %v1970_v63 = vadd.f32 %v2217_v30, %v1969_v42 }
 0x7ed   : > { %2032 = vst [vmem:[%s3676_s20 + $0x18] sm:$0xff] %v1978_v4 }
 0x7ee   : > { %2030 = vst [vmem:[%s3676_s20 + $0x8] sm:$0xff] %v1970_v63 }
 0x7f0   : > { %v2489_v43 = vpop.f32.mrb[32].mxu1 }
 0x7f1   : > { %v1991_v57 = vadd.f32 %v2489_v43, %v2217_v30  ;;  %v1982_v10 = vpop.f32.mrb[33].mxu1 }
 0x7f2   : > { %v1983_v33 = vadd.f32 %v2217_v30, %v1982_v10  ;;  %v2490_v24 = vpop.f32.mrb[34].mxu1 }
 0x7f3   : > { %2035 = vst [vmem:[%s3676_s20 + $0x30] sm:$0xff] %v1991_v57  ;;  %v1994_v21 = vadd.f32 %v2490_v24, %v2217_v30  ;;  %v1985_v40 = vpop.f32.mrb[35].mxu1 }
 0x7f4   : > { %2033 = vst [vmem:[%s3676_s20 + $0x20] sm:$0xff] %v1983_v33  ;;  %v1986_v15 = vadd.f32 %v2217_v30, %v1985_v40 }
 0x7f5   : > { %2036 = vst [vmem:[%s3676_s20 + $0x38] sm:$0xff] %v1994_v21 }
 0x7f6   : > { %2034 = vst [vmem:[%s3676_s20 + $0x28] sm:$0xff] %v1986_v15 }
 0x7f8   : > { %v2493_v50 = vpop.f32.mrb[36].mxu1 }
 0x7f9   : > { %v2007_v11 = vadd.f32 %v2493_v50, %v2217_v30  ;;  %v1998_v60 = vpop.f32.mrb[37].mxu1 }
 0x7fa   : > { %v1999_v34 = vadd.f32 %v2217_v30, %v1998_v60  ;;  %v2494_v19 = vpop.f32.mrb[38].mxu1 }
 0x7fb   : > { %2039 = vst [vmem:[%s3676_s20 + $0x50] sm:$0xff] %v2007_v11  ;;  %v2010_v44 = vadd.f32 %v2494_v19, %v2217_v30  ;;  %v2001_v47 = vpop.f32.mrb[39].mxu1 }
 0x7fc   : > { %2037 = vst [vmem:[%s3676_s20 + $0x40] sm:$0xff] %v1999_v34  ;;  %v2002_v61 = vadd.f32 %v2217_v30, %v2001_v47 }
 0x7fd   : > { %2040 = vst [vmem:[%s3676_s20 + $0x58] sm:$0xff] %v2010_v44 }
 0x7fe   : > { %2038 = vst [vmem:[%s3676_s20 + $0x48] sm:$0xff] %v2002_v61 }
 0x800   : > { %v2497_v1 = vpop.f32.mrb[40].mxu1 }
 0x801   : > { %v2023_v32 = vadd.f32 %v2497_v1, %v2217_v30  ;;  %v2014_v53 = vpop.f32.mrb[41].mxu1 }
 0x802   : > { %v2015_v46 = vadd.f32 %v2217_v30, %v2014_v53  ;;  %v2498_v13 = vpop.f32.mrb[42].mxu1 }
 0x803   : > { %2043 = vst [vmem:[%s3676_s20 + $0x70] sm:$0xff] %v2023_v32  ;;  %v2026_v58 = vadd.f32 %v2498_v13, %v2217_v30  ;;  %v2017_v22 = vpop.f32.mrb[43].mxu1 }
 0x804   : > { %2041 = vst [vmem:[%s3676_s20 + $0x60] sm:$0xff] %v2015_v46  ;;  %v2018_v54 = vadd.f32 %v2217_v30, %v2017_v22 }
 0x805   : > { %2044 = vst [vmem:[%s3676_s20 + $0x78] sm:$0xff] %v2026_v58 }
 0x806   : > { %2042 = vst [vmem:[%s3676_s20 + $0x68] sm:$0xff] %v2018_v54 }
 0x807   : > { %2715 = shalt.err (!%p2712_p7)
}
 0x808   : > { %s2716_s22 = scalar_lea.hbm %s3696_s12, 2048  ;;  %s2720_s20 = scalar_lea.hbm %s3754_s8, 4096 }
 0x809   : > { %p2717_p8 = scmp.ne.s32.totalorder %s3696_s12, %s2716_s22  ;;  %p2721_p1 = scmp.lt.u32.totalorder %s3696_s12, %s3754_s8 }
 0x80a   : > { %p2722_p0 = scmp.lt.u32.totalorder %s2720_s20, %s2716_s22  ;;  %p2724_p6 = scmp.lt.u32.totalorder %s2716_s22, %s3696_s12 }
 0x80b   : > { %p2718_p11 = pnand %p2717_p8, %p3800_p9 }
 0x80c   : > { %p2723_p5 = por %p2722_p0, %p2721_p1 }
 0x80d   : > { %p2719_p13 = pneg %p2718_p11 }
 0x80e   : > { %p2725_p10 = por %p2724_p6, %p2723_p5 }
 0x810   : > { %p2726_p12 = pnand %p2725_p10, %p2719_p13 }
 0x812   : > { %2729 = shalt.err (!%p2726_p12)
}
 0x813   : > { %s2774_s17 = smov 128   ;;  %s2775_s13 = smov 8  }
 0x814   : > { %2519 = dma.vmem_to_hbm [thread:$0]  (%p3800_p9), %s3698_s19, 2048, %s3696_s12, %s3705_s9, %s2774_s17, %s2774_s17, %s2775_s13  }
 0x815 PF: > { %p2531_p2 = scmp.ge.s32.totalorder %s2768_s30, 2  ;;  %s2074_s18 = sand.u32 1, %s2756_s27  }
 0x816   : > { %p3801_p3 = scmp.ne.s32.totalorder %s3772_s16, 0  ;;  %s2075_s21 = scalar_lea.sflag [#allocation4], %s2074_s18 }
 0x818   : > { %p2526_p4 = pnand %p2531_p2, %p3801_p3 }
 0x81a   : > { %2751 = dma.done.wait (!%p2526_p4), %s2075_s21, 2048  }
 0x81b   : > { %2753 = vsyncadd (!%p2526_p4), %s2075_s21, 4294965248  ;;  %p19_p7 = scmp.ge.s32.totalorder %s2846_s11, 4   ;;  %s3802_s27 = smov %s2760_s28 }
 0x81c   : > { %s3803_s28 = smov %s2764_s29  ;;  %s3804_s29 = smov %s2857_s14 }
 0x81d   : > { %s3805_s30 = smov %s2846_s11  ;;  %21 = sbr.rel (!%p19_p7) target bundleno = 4 (0x4), region = 95 }
 0x824   :  { %2080 = vsyncpa [#allocation3], 1 }
 0x825   :  { %2082 = vsyncpa [#allocation3 + $0x1], 1 }
 0x826   :  { %2083 = vsyncpa [#allocation4], 1 }
 0x827   :  { %2085 = vsyncpa [#allocation4 + $0x1], 1 }

// kernel: tpu_custom_call.1
= control target key start
LH: loop header
LB: loop body
LE: loop exit
PB: predicated region body
PF: predicated region fallthrough
CT: control target
= control target key end

     0   :  { %13 = vsyncpa [#allocation3], 0  ;;  %s3746_s0 = inlined_call_operand.vmem [shape: f32[256,16], index: 0, kind: input, shape index: {}]   ;;  %s3747_s1 = inlined_call_operand.vmem [shape: bf16[16,128], index: 1, kind: input, shape index: {}]   ;;  %s3748_s2 = inlined_call_operand.vmem [shape: f32[1,128], index: 2, kind: input, shape index: {}]   ;;  %s3749_s3 = inlined_call_operand.vmem [shape: bf16[2,128,128], index: 3, kind: input, shape index: {}]   ;;  %s3750_s4 = inlined_call_operand.vmem [shape: bf16[2,128,128], index: 4, kind: input, shape index: {}]   ;;  %s3751_s5 = inlined_call_operand.vmem [shape: f32[2,4,128], index: 5, kind: input, shape index: {}]   ;;  %s3752_s6 = inlined_call_operand.hbm [shape: bf16[128,128], index: 6, kind: input, shape index: {}]   ;;  %s3753_s7 = inlined_call_operand.vmem [shape: f32[1,128], index: 7, kind: input, shape index: {}]   ;;  %s3754_s8 = inlined_call_operand.hbm [shape: f32[256,128], index: 8, kind: output, shape index: {}]  }
   0x1   :  { %14 = vsyncpa [#allocation4], 0 }
   0x2   :  { %16 = vsyncpa [#allocation4 + $0x1], 0  ;;  %s2821_s27 = smov 0   ;;  %s2823_s28 = smov 0  }
   0x3   :  { %s2825_s29 = smov 0   ;;  %s2827_s30 = smov 0  }
   0x4 LB: > { %s2842_s9 = sadd.s32 4294967295, %s2768_s30   ;;  %s2133_s10 = sadd.s32 4294967294, %s2768_s30   ;;  %s2768_s30 = sphi %s2827_s30, %s3805_s30   ;;  %s2764_s29 = sphi %s2825_s29, %s3804_s29   ;;  %s2760_s28 = sphi %s2823_s28, %s3803_s28   ;;  %s2756_s27 = sphi %s2821_s27, %s3802_s27  }
   0x5   : > { %s2846_s11 = sadd.s32 1, %s2768_s30   ;;  %s202_s12 = sadd.s32 1, %s2764_s29 }
   0x6   : > { %s199_s13 = ssub.s32 %s2768_s30, %s2846_s11  ;;  %p212_p0 = scmp.ne.s32.totalorder %s2764_s29, %s2760_s28 }
   0x7   : > { %p200_p1 = scmp.eq.s32.totalorder %s199_s13, 0  ;;  %p213_p2 = scmp.eq.s32.totalorder %s2842_s9, 1 }
   0x8   : > { %p218_p3 = scmp.ne.s32.totalorder %s2760_s28, %s2756_s27  ;;  %p219_p4 = scmp.eq.s32.totalorder %s2133_s10, 1 }
   0x9   : > { %s2857_s14 = scalar_select %p200_p1, %s2764_s29, %s202_s12  }
   0xa   : > { %p2859_p5 = por %p213_p2, %p212_p0  ;;  %p2863_p6 = por %p219_p4, %p218_p3 }
   0xb   : > { %p2134_p7 = scmp.ge.s32.totalorder %s2768_s30, 1  ;;  %p226_p8 = scmp.lt.s32.totalorder %s2768_s30, 3 }
   0xc   : > { %s3771_s15 = scalar_select %p2859_p5, 1, 0 }
   0xd   : > { %s3772_s16 = scalar_select %p2863_p6, 1, 0 }
   0xe   : > { %p3755_p9 = scmp.eq.s32.totalorder %s2842_s9, 0  ;;  %p2870_p10 = pnand %p2134_p7, %p226_p8 }
   0xf   : > { %s2770_s18 = smov [#allocation2]   ;;  %s2674_s23 = scalar_lea.hbm %s3752_s6, 1024 }
  0x10   : > { %s3773_s17 = scalar_select %p2870_p10, 1, 0 }
  0x11   : > { %s253_s19 = sshll.u32 %s2770_s18, 4  ;;  %p2521_p11 = pneg %p2870_p10  ;;  %s254_s19 = int_to_ptr.vmem [resolvable:$true] %s253_s19 }
  0x12   : > { %p2675_p13 = scmp.ne.s32.totalorder %s3752_s6, %s2674_s23  ;;  %p2681_p3 = scmp.lt.u32.totalorder %s2674_s23, %s3752_s6 }
  0x13   : > { %p2878_p12 = pnand %p3755_p9, %p2521_p11 }
  0x15   : > { %p2676_p0 = pneg %p2878_p12 }
  0x17   : > { %p2677_p1 = pnand %p2676_p0, %p2675_p13 }
  0x19   : > { %p2678_p2 = pneg %p2677_p1 }
  0x1b   : > { %p2683_p4 = pnand %p2681_p3, %p2678_p2 }
  0x1d   : > { %2686 = shalt.err (!%p2683_p4)
}
  0x1e   : > { %s2687_s12 = scalar_lea.vmem %s254_s19, 1024  ;;  %p2695_p9 = scmp.lt.s32.totalorder %s254_s19, %s254_s19 }
  0x1f   : > { %p2688_p7 = scmp.ne.s32.totalorder %s254_s19, %s2687_s12  ;;  %p2696_p6 = scmp.lt.s32.totalorder %s2687_s12, %s2687_s12 }
  0x21   : > { %p2690_p8 = pnand %p2688_p7, %p2676_p0  ;;  %p2697_p5 = por %p2696_p6, %p2695_p9 }
  0x23   : > { %p2691_p11 = pneg %p2690_p8 }
  0x25   : > { %p2698_p10 = pnand %p2697_p5, %p2691_p11 }
  0x27   : > { %2701 = shalt.err (!%p2698_p10)
}
  0x28   : > { %s2771_s13 = smov 64   ;;  %s2772_s18 = smov 4  }
  0x29   : > { %2524 = dma.hbm_to_vmem [thread:$0]  (!%p2878_p12), %s3752_s6, 1024, %s254_s19, [#allocation3], %s2771_s13, %s2771_s13, %s2772_s18  }
  0x2a   : > { %p3775_p13 = scmp.ne.s32.totalorder %s3773_s17, 0 }
  0x2c   : > { %281 = sbr.rel (%p3775_p13) target bundleno = 2069 (0x815), region = 52 }
  0x33   : > { %p3776_p1 = scmp.eq.s32.totalorder %s2842_s9, 0 }
  0x35   : > { %2747 = dma.done.wait (%p3776_p1), [#allocation3], 1024   ;;  %p3777_p0 = pmov %p3776_p1 }
  0x36   : > { %s2140_s23 = sshll.u32 %s2842_s9, 4  ;;  %v2569_v0 = vld [vmem:[%s3747_s1] sm:$0xff]   ;;  %vm362_vm0 = vcmask 130048   ;;  %s312_s22 = sand.u32 1, %s2760_s28  }
  0x37   : > { %2749 = vsyncadd (%p3777_p0), [#allocation3], 4294966272  ;;  %p316_p5 = scmp.lt.s32.totalorder %s2140_s23, 31  ;;  %2321 = vmatprep.subr.bf16.mxu0 %v2569_v0  ;;  %v2142_v25 = vld [vmem:[%s3748_s2] ss:$0 sm:$0xff]  ;;  %p3800_p9 = scmp.ne.s32.totalorder %s3771_s15, 0 }
  0x38   : > { %2322 = vmatpush3.bf16.msra.mxu0 %v2569_v0  ;;  %s2773_s18 = smov [#allocation5]  }
  0x39   : > { %s3807_s23 = smov (!%p316_p5, %s2140_s23), 31  ;;  %s2706_s21 = sshll.u32 %s2773_s18, 4  ;;  %s2707_s21 = int_to_ptr.vmem [resolvable:$false] %s2706_s21 }
  0x3a   : > { %s2141_s24 = sshll.u32 %s3807_s23, 3  ;;  %s2139_s23 = sshll.u32 %s312_s22, 7 }
  0x3b   : > { %s2908_s26 = scalar_lea.vmem %s3746_s0, %s2141_s24  ;;  %s3676_s20 = scalar_lea.vmem [#allocation5], %s2139_s23 }
  0x3c   : > { %v323_v1 = vld [vmem:[%s2908_s26] sm:$0xff]  ;;  %v324_v2 = vld [vmem:[%s2908_s26 + $0x8] sm:$0xff]  ;;  %v325_v3 = vld [vmem:[%s2908_s26 + $0x10] sm:$0xff]  ;;  %s2059_s19 = sshll.u32 %s3676_s20, 4  ;;  %s2708_s23 = scalar_lea.vmem %s2707_s21, 4096  ;;  %s3698_s19 = int_to_ptr.vmem [resolvable:$true] %s2059_s19 }
  0x3d   : > { %v339_v4 = vpack.c.bf16 %v324_v2, %v323_v1  ;;  %v326_v5 = vld [vmem:[%s2908_s26 + $0x18] sm:$0xff]  ;;  %v327_v6 = vld [vmem:[%s2908_s26 + $0x20] sm:$0xff]  ;;  %v328_v7 = vld [vmem:[%s2908_s26 + $0x28] sm:$0xff]  ;;  %s2702_s13 = scalar_lea.vmem %s3698_s19, 2048  ;;  %p2709_p2 = scmp.lt.s32.totalorder %s3698_s19, %s2707_s21 }
  0x3e   : > { %v340_v8 = vpack.c.bf16 %v326_v5, %v325_v3  ;;  %v341_v9 = vpack.c.bf16 %v328_v7, %v327_v6  ;;  %v329_v10 = vld [vmem:[%s2908_s26 + $0x30] sm:$0xff]  ;;  %v330_v11 = vld [vmem:[%s2908_s26 + $0x38] sm:$0xff]  ;;  %v331_v12 = vld [vmem:[%s2908_s26 + $0x40] sm:$0xff]  ;;  %p2703_p6 = scmp.ne.s32.totalorder %s3698_s19, %s2702_s13  ;;  %p2710_p3 = scmp.lt.s32.totalorder %s2708_s23, %s2702_s13 }
  0x3f   : > { %2323 = vmatprep.mubr.msk.bf16.mxu0 %vm362_vm0, %v339_v4  ;;  %v332_v13 = vld [vmem:[%s2908_s26 + $0x48] sm:$0xff]  ;;  %v342_v14 = vpack.c.bf16 %v330_v11, %v329_v10  ;;  %v333_v16 = vld [vmem:[%s2908_s26 + $0x50] sm:$0xff]  ;;  %v334_v17 = vld [vmem:[%s2908_s26 + $0x58] sm:$0xff] }
  0x40   : > { %2324 = vmatmul.mubr.msk.bf16.vlgmr.msra.gmra.mrb[0].mxu0 %vm362_vm0, %v340_v8  ;;  %v343_v15 = vpack.c.bf16 %v332_v13, %v331_v12  ;;  %v335_v18 = vld [vmem:[%s2908_s26 + $0x60] sm:$0xff]  ;;  %v336_v19 = vld [vmem:[%s2908_s26 + $0x68] sm:$0xff]  ;;  %v344_v20 = vpack.c.bf16 %v334_v17, %v333_v16  ;;  %v337_v22 = vld [vmem:[%s2908_s26 + $0x70] sm:$0xff]  ;;  %p2704_p10 = pnand %p2703_p6, %p3800_p9  ;;  %p2711_p4 = por %p2710_p3, %p2709_p2 }
  0x41   : > { %2327 = vmatprep.mubr.msk.bf16.mxu0 %vm362_vm0, %v341_v9  ;;  %v345_v21 = vpack.c.bf16 %v336_v19, %v335_v18  ;;  %v338_v23 = vld [vmem:[%s2908_s26 + $0x78] sm:$0xff]  ;;  %s2231_s26 = sshll.u32 %s2842_s9, 11  ;;  %s3705_s9 = scalar_lea.sflag [#allocation4], %s312_s22 }
  0x42   : > { %v346_v24 = vpack.c.bf16 %v338_v23, %v337_v22  ;;  %s3696_s12 = scalar_lea.hbm %s3754_s8, %s2231_s26  ;;  %p2705_p12 = pneg %p2704_p10 }
  0x44   : > { %p2712_p7 = pnand %p2711_p4, %p2705_p12 }
  0x48   : > { %2328 = vmatmul.mubr.msk.bf16.gmra.mrb[4].mxu0 %vm362_vm0, %v342_v14 }
  0x49   : > { %2331 = vmatprep.mubr.msk.bf16.mxu0 %vm362_vm0, %v343_v15 }
  0x50   : > { %2332 = vmatmul.mubr.msk.bf16.gmra.mrb[8].mxu0 %vm362_vm0, %v344_v20 }
  0x51   : > { %2335 = vmatprep.mubr.msk.bf16.mxu0 %vm362_vm0, %v345_v21 }
  0x58   : > { %2336 = vmatmul.mubr.msk.bf16.gmra.mrb[12].mxu0 %vm362_vm0, %v346_v24 }
 0x113   : > { %v2325_v26 = vpop.f32.mrb[0].mxu0 }
 0x114   : > { %v2940_v27 = vadd.f32 %v2325_v26, %v2142_v25  ;;  %v421_v28 = vpop.f32.mrb[1].mxu0 }
 0x115   : > { %v2942_v29 = vadd.f32 %v2142_v25, %v421_v28  ;;  %v2326_v30 = vpop.f32.mrb[2].mxu0 }
 0x116   : > { %489 = vadd.xlane.f32.xlu1 %v2940_v27  ;;  %v424_v31 = vpop.f32.mrb[3].mxu0  ;;  %v2946_v32 = vadd.f32 %v2326_v30, %v2142_v25 }
 0x117   : > { %485 = vadd.xlane.f32.xlu0 %v2942_v29  ;;  %v2948_v33 = vadd.f32 %v2142_v25, %v424_v31 }
 0x11a   : > { %491 = vadd.xlane.f32.xlu1 %v2946_v32 }
 0x11b   : > { %v2329_v34 = vpop.f32.mrb[4].mxu0  ;;  %487 = vadd.xlane.f32.xlu0 %v2948_v33 }
 0x11c   : > { %v437_v35 = vpop.f32.mrb[5].mxu0  ;;  %v2957_v40 = vadd.f32 %v2329_v34, %v2142_v25 }
 0x11d   : > { %v2952_v36 = vadd.f32 %v2142_v25, %v437_v35  ;;  %v2330_v37 = vpop.f32.mrb[6].mxu0 }
 0x11e   : > { %v440_v38 = vpop.f32.mrb[7].mxu0  ;;  %v2960_v41 = vadd.f32 %v2330_v37, %v2142_v25 }
 0x11f   : > { %v2954_v39 = vadd.f32 %v2142_v25, %v440_v38  ;;  %493 = vadd.xlane.f32.xlu0 %v2952_v36 }
 0x121   : > { %495 = vadd.xlane.f32.xlu1 %v2954_v39 }
 0x123   : > { %v2333_v42 = vpop.f32.mrb[8].mxu0  ;;  %497 = vadd.xlane.f32.xlu0 %v2957_v40 }
 0x124   : > { %v453_v43 = vpop.f32.mrb[9].mxu0  ;;  %v2969_v48 = vadd.f32 %v2333_v42, %v2142_v25 }
 0x125   : > { %v2963_v44 = vadd.f32 %v2142_v25, %v453_v43  ;;  %v2334_v45 = vpop.f32.mrb[10].mxu0  ;;  %499 = vadd.xlane.f32.xlu1 %v2960_v41 }
 0x126   : > { %v456_v46 = vpop.f32.mrb[11].mxu0  ;;  %v2972_v49 = vadd.f32 %v2334_v45, %v2142_v25  ;;  %v2570_v45 = vld [vmem:[%s3749_s3] sm:$0xff]  }
 0x127   : > { %v2966_v47 = vadd.f32 %v2142_v25, %v456_v46  ;;  %501 = vadd.xlane.f32.xlu0 %v2963_v44  ;;  %2339 = vmatprep.subr.bf16.mxu1 %v2570_v45 }
 0x128   : > { %2340 = vmatpush3.bf16.msra.mxu1 %v2570_v45  ;;  %v2575_v45 = vld [vmem:[%s3749_s3 + $0x28] sm:$0xff]  }
 0x129   : > { %503 = vadd.xlane.f32.xlu1 %v2966_v47 }
 0x12b   : > { %v2337_v50 = vpop.f32.mrb[12].mxu0  ;;  %505 = vadd.xlane.f32.xlu0 %v2969_v48 }
 0x12c   : > { %v469_v51 = vpop.f32.mrb[13].mxu0  ;;  %v2981_v56 = vadd.f32 %v2337_v50, %v2142_v25 }
 0x12d   : > { %v2975_v52 = vadd.f32 %v2142_v25, %v469_v51  ;;  %v2338_v53 = vpop.f32.mrb[14].mxu0  ;;  %507 = vadd.xlane.f32.xlu1 %v2972_v49 }
 0x12e   : > { %v472_v54 = vpop.f32.mrb[15].mxu0  ;;  %3780 = vst [vmem:[#allocation10_spill] sm:$0xff] %v2981_v56  ;;  %v2984_v57 = vadd.f32 %v2338_v53, %v2142_v25 }
 0x12f   : > { %3778 = vst [vmem:[#allocation8_spill] sm:$0xff] %v2975_v52  ;;  %v2978_v55 = vadd.f32 %v2142_v25, %v472_v54  ;;  %509 = vadd.xlane.f32.xlu0 %v2975_v52 }
 0x130   : > { %3781 = vst [vmem:[#allocation11_spill] sm:$0xff] %v2984_v57 }
 0x131   : > { %3779 = vst [vmem:[#allocation9_spill] sm:$0xff] %v2978_v55  ;;  %511 = vadd.xlane.f32.xlu1 %v2978_v55 }
 0x133   : > { %513 = vadd.xlane.f32.xlu0 %v2981_v56 }
 0x135   : > { %515 = vadd.xlane.f32.xlu1 %v2984_v57 }
 0x1a3   : > { %v490_v58 = vpop.xlane.xlu1 %489 }
 0x1a4   : > { %v486_v59 = vpop.xlane.xlu0 %485  ;;  %v2988_v60 = vmul.f32 0.03125, %v490_v58 }
 0x1a5   : > { %v2990_v61 = vmul.f32 0.03125, %v486_v59 }
 0x1a6   : > { %v3004_v4 = vsub.f32 %v2940_v27, %v2988_v60 }
 0x1a7   : > { %v492_v62 = vpop.xlane.xlu1 %491  ;;  %v2994_v63 = vsub.f32 %v2942_v29, %v2990_v61 }
 0x1a8   : > { %v488_v0 = vpop.xlane.xlu0 %487  ;;  %v2996_v1 = vmul.f32 0.03125, %v492_v62  ;;  %v551_v8 = vmul.f32 %v3004_v4, %v3004_v4 }
 0x1a9   : > { %v2998_v2 = vmul.f32 0.03125, %v488_v0  ;;  %v549_v3 = vmul.f32 %v2994_v63, %v2994_v63 }
 0x1aa   : > { %v3018_v10 = vsub.f32 %v2946_v32, %v2996_v1 }
 0x1ab   : > { %565 = vadd.xlane.f32.xlu0 %v549_v3  ;;  %v3008_v5 = vsub.f32 %v2948_v33, %v2998_v2 }
 0x1ac   : > { %v494_v6 = vpop.xlane.xlu0 %493  ;;  %v552_v16 = vmul.f32 %v3018_v10, %v3018_v10 }
 0x1ad   : > { %v3010_v7 = vmul.f32 0.03125, %v494_v6  ;;  %v550_v9 = vmul.f32 %v3008_v5, %v3008_v5  ;;  %v2571_v6 = vld [vmem:[%s3749_s3 + $0x8] sm:$0xff]  }
 0x1ae   : > { %v496_v11 = vpop.xlane.xlu1 %495  ;;  %2341 = vmatprep.subr.bf16.mxu1 %v2571_v6 }
 0x1af   : > { %v3020_v12 = vmul.f32 0.03125, %v496_v11  ;;  %569 = vadd.xlane.f32.xlu0 %v551_v8  ;;  %567 = vadd.xlane.f32.xlu1 %v550_v9  ;;  %v3024_v13 = vsub.f32 %v2952_v36, %v3010_v7 }
 0x1b0   : > { %v498_v14 = vpop.xlane.xlu0 %497  ;;  %2342 = vmatpush3.bf16.msra.mxu1 %v2571_v6  ;;  %v2580_v6 = vld [vmem:[%s3750_s4 + $0x10] sm:$0xff]  }
 0x1b1   : > { %v3026_v15 = vmul.f32 0.03125, %v498_v14  ;;  %v553_v17 = vmul.f32 %v3024_v13, %v3024_v13  ;;  %v3034_v18 = vsub.f32 %v2954_v39, %v3020_v12 }
 0x1b2   : > { %v500_v19 = vpop.xlane.xlu1 %499 }
 0x1b3   : > { %v3036_v20 = vmul.f32 0.03125, %v500_v19  ;;  %571 = vadd.xlane.f32.xlu1 %v552_v16  ;;  %573 = vadd.xlane.f32.xlu0 %v553_v17  ;;  %v3040_v21 = vsub.f32 %v2957_v40, %v3026_v15  ;;  %v554_v24 = vmul.f32 %v3034_v18, %v3034_v18 }
 0x1b4   : > { %v502_v22 = vpop.xlane.xlu0 %501 }
 0x1b5   : > { %v3042_v23 = vmul.f32 0.03125, %v502_v22  ;;  %v555_v25 = vmul.f32 %v3040_v21, %v3040_v21  ;;  %v3050_v26 = vsub.f32 %v2960_v41, %v3036_v20 }
 0x1b6   : > { %v504_v28 = vpop.xlane.xlu1 %503 }
 0x1b7   : > { %v3052_v30 = vmul.f32 0.03125, %v504_v28  ;;  %575 = vadd.xlane.f32.xlu1 %v554_v24  ;;  %577 = vadd.xlane.f32.xlu0 %v555_v25  ;;  %v3056_v31 = vsub.f32 %v2963_v44, %v3042_v23  ;;  %v556_v37 = vmul.f32 %v3050_v26, %v3050_v26  ;;  %v2572_v24 = vld [vmem:[%s3749_s3 + $0x10] sm:$0xff]  }
 0x1b8   : > { %v506_v34 = vpop.xlane.xlu0 %505  ;;  %2343 = vmatprep.subr.bf16.mxu1 %v2572_v24 }
 0x1b9   : > { %v3058_v35 = vmul.f32 0.03125, %v506_v34  ;;  %v557_v38 = vmul.f32 %v3056_v31, %v3056_v31  ;;  %v3066_v42 = vsub.f32 %v2966_v47, %v3052_v30  ;;  %2344 = vmatpush3.bf16.msra.mxu1 %v2572_v24 }
 0x1ba   : > { %v508_v43 = vpop.xlane.xlu1 %507 }
 0x1bb   : > { %v3071_v46 = vmul.f32 0.03125, %v508_v43  ;;  %579 = vadd.xlane.f32.xlu1 %v556_v37  ;;  %581 = vadd.xlane.f32.xlu0 %v557_v38  ;;  %v3075_v50 = vsub.f32 %v2969_v48, %v3058_v35  ;;  %v558_v54 = vmul.f32 %v3066_v42, %v3066_v42  ;;  %v2573_v37 = vld [vmem:[%s3749_s3 + $0x18] sm:$0xff]   ;;  %v2574_v43 = vld [vmem:[%s3749_s3 + $0x20] sm:$0xff]  }
 0x1bc   : > { %v510_v51 = vpop.xlane.xlu0 %509  ;;  %2345 = vmatprep.subr.bf16.mxu1 %v2573_v37 }
 0x1bd   : > { %v3077_v53 = vmul.f32 0.03125, %v510_v51  ;;  %v559_v58 = vmul.f32 %v3075_v50, %v3075_v50  ;;  %v3085_v59 = vsub.f32 %v2972_v49, %v3071_v46  ;;  %2346 = vmatpush3.bf16.msra.mxu1 %v2573_v37  ;;  %v2576_v51 = vld [vmem:[%s3749_s3 + $0x30] sm:$0xff]  }
 0x1be   : > { %v512_v62 = vpop.xlane.xlu1 %511  ;;  %2347 = vmatprep.subr.bf16.mxu1 %v2574_v43 }
 0x1bf   : > { %v3087_v0 = vmul.f32 0.03125, %v512_v62  ;;  %583 = vadd.xlane.f32.xlu1 %v558_v54  ;;  %585 = vadd.xlane.f32.xlu0 %v559_v58  ;;  %v3091_v3 = vsub.f32 %v2975_v52, %v3077_v53  ;;  %v560_v11 = vmul.f32 %v3085_v59, %v3085_v59  ;;  %v2577_v54 = vld [vmem:[%s3749_s3 + $0x38] sm:$0xff]   ;;  %v2578_v58 = vld [vmem:[%s3750_s4] sm:$0xff]   ;;  %v2579_v62 = vld [vmem:[%s3750_s4 + $0x8] sm:$0xff]  }
 0x1c0   : > { %v514_v8 = vpop.xlane.xlu0 %513  ;;  %2371 = vmatprep.subr.bf16.mxu0 %v2578_v58 }
 0x1c1   : > { %v3096_v9 = vmul.f32 0.03125, %v514_v8  ;;  %v561_v14 = vmul.f32 %v3091_v3, %v3091_v3  ;;  %v3104_v16 = vsub.f32 %v2978_v55, %v3087_v0  ;;  %2348 = vmatpush3.bf16.msra.mxu1 %v2574_v43  ;;  %2372 = vmatpush3.bf16.msra.mxu0 %v2578_v58  ;;  %v2581_v8 = vld [vmem:[%s3750_s4 + $0x18] sm:$0xff]  }
 0x1c2   : > { %v516_v17 = vpop.xlane.xlu1 %515  ;;  %2349 = vmatprep.subr.bf16.mxu1 %v2575_v45  ;;  %2373 = vmatprep.subr.bf16.mxu0 %v2579_v62 }
 0x1c3   : > { %v3106_v19 = vmul.f32 0.03125, %v516_v17  ;;  %587 = vadd.xlane.f32.xlu1 %v560_v11  ;;  %589 = vadd.xlane.f32.xlu0 %v561_v14  ;;  %v3110_v22 = vsub.f32 %v2981_v56, %v3096_v9  ;;  %v562_v25 = vmul.f32 %v3104_v16, %v3104_v16  ;;  %v2582_v11 = vld [vmem:[%s3750_s4 + $0x20] sm:$0xff]   ;;  %v2583_v14 = vld [vmem:[%s3750_s4 + $0x28] sm:$0xff]   ;;  %v597_v17 = vmul.f32 96.0, %v2990_v61 }
 0x1c5   : > { %v563_v28 = vmul.f32 %v3110_v22, %v3110_v22  ;;  %v3121_v34 = vsub.f32 %v2984_v57, %v3106_v19  ;;  %2350 = vmatpush3.bf16.msra.mxu1 %v2575_v45  ;;  %2374 = vmatpush3.bf16.msra.mxu0 %v2579_v62  ;;  %v613_v24 = vmul.f32 %v597_v17, %v2990_v61  ;;  %v603_v61 = vmul.f32 96.0, %v3026_v15 }
 0x1c6   : > { %2351 = vmatprep.subr.bf16.mxu1 %v2576_v51  ;;  %2375 = vmatprep.subr.bf16.mxu0 %v2580_v6 }
 0x1c7   : > { %591 = vadd.xlane.f32.xlu1 %v562_v25  ;;  %593 = vadd.xlane.f32.xlu0 %v563_v28  ;;  %v564_v38 = vmul.f32 %v3121_v34, %v3121_v34  ;;  %v598_v25 = vmul.f32 96.0, %v2998_v2  ;;  %v599_v28 = vmul.f32 96.0, %v2988_v60  ;;  %v619_v52 = vmul.f32 %v603_v61, %v3026_v15 }
 0x1c8   : > { %v607_v15 = vmul.f32 96.0, %v3058_v35  ;;  %v608_v61 = vmul.f32 96.0, %v3071_v46 }
 0x1c9   : > { %2352 = vmatpush3.bf16.msra.mxu1 %v2576_v51  ;;  %2376 = vmatpush3.bf16.msra.mxu0 %v2580_v6  ;;  %v614_v45 = vmul.f32 %v598_v25, %v2998_v2  ;;  %v615_v51 = vmul.f32 %v599_v28, %v2988_v60  ;;  %v601_v6 = vmul.f32 96.0, %v3010_v7 }
 0x1ca   : > { %2353 = vmatprep.subr.bf16.mxu1 %v2577_v54  ;;  %2377 = vmatprep.subr.bf16.mxu0 %v2581_v8 }
 0x1cb   : > { %595 = vadd.xlane.f32.xlu1 %v564_v38  ;;  %v617_v57 = vmul.f32 %v601_v6, %v3010_v7  ;;  %v606_v7 = vmul.f32 96.0, %v3052_v30 }
 0x1cd   : > { %2354 = vmatpush3.bf16.msra.mxu1 %v2577_v54  ;;  %2378 = vmatpush3.bf16.msra.mxu0 %v2581_v8  ;;  %v600_v54 = vmul.f32 96.0, %v2996_v1  ;;  %v602_v8 = vmul.f32 96.0, %v3020_v12 }
 0x1ce   : > { %2379 = vmatprep.subr.bf16.mxu0 %v2582_v11 }
 0x1cf   : > { %v616_v60 = vmul.f32 %v600_v54, %v2996_v1  ;;  %v618_v56 = vmul.f32 %v602_v8, %v3020_v12 }
 0x1d1   : > { %2380 = vmatpush3.bf16.msra.mxu0 %v2582_v11 }
 0x1d2   : > { %2381 = vmatprep.subr.bf16.mxu0 %v2583_v14 }
 0x1d5   : > { %2382 = vmatpush3.bf16.msra.mxu0 %v2583_v14 }
 0x238   : > { %v566_v37 = vpop.xlane.xlu0 %565 }
 0x239   : > { %v629_v38 = vsub.f32 %v566_v37, %v613_v24  ;;  %v604_v24 = vmul.f32 96.0, %v3036_v20  ;;  %v725_v37 = vlaneseq }
 0x23b   : > { %v645_v43 = vmul.f32 0.03125, %v629_v38 }
 0x23c   : > { %v568_v58 = vpop.xlane.xlu1 %567  ;;  %v570_v62 = vpop.xlane.xlu0 %569 }
 0x23d   : > { %v661_v11 = vmax.f32 %v645_v43, 0.0  ;;  %v630_v14 = vsub.f32 %v568_v58, %v614_v45  ;;  %v631_v17 = vsub.f32 %v570_v62, %v615_v51  ;;  %v620_v62 = vmul.f32 %v604_v24, %v3036_v20 }
 0x23f   : > { %v677_v38 = vadd.f32 1e-05, %v661_v11  ;;  %v646_v2 = vmul.f32 0.03125, %v630_v14  ;;  %v647_v25 = vmul.f32 0.03125, %v631_v17  ;;  %v605_v11 = vmul.f32 96.0, %v3042_v23 }
 0x240   : > { %v572_v28 = vpop.xlane.xlu1 %571  ;;  %v574_v55 = vpop.xlane.xlu0 %573  ;;  %v3175_v14 = vshrl.u32 %v725_v37, 7 }
 0x241   : > { %2610 = vrsqrt.f32 %v677_v38  ;;  %v662_v43 = vmax.f32 %v646_v2, 0.0  ;;  %v663_v45 = vmax.f32 %v647_v25, 0.0  ;;  %v632_v51 = vsub.f32 %v572_v28, %v616_v60 }
 0x242   : > { %v633_v58 = vsub.f32 %v574_v55, %v617_v57  ;;  %v609_v55 = vmul.f32 96.0, %v3077_v53  ;;  %v621_v38 = vmul.f32 %v605_v11, %v3042_v23  ;;  %v3765_v2 = vsub.s32 0, %v3175_v14 }
 0x243   : > { %v678_v1 = vadd.f32 1e-05, %v662_v43  ;;  %v679_v54 = vadd.f32 1e-05, %v663_v45  ;;  %v648_v17 = vmul.f32 0.03125, %v632_v51  ;;  %v622_v43 = vmul.f32 %v606_v7, %v3052_v30 }
 0x244   : > { %v649_v6 = vmul.f32 0.03125, %v633_v58  ;;  %v576_v12 = vpop.xlane.xlu1 %575  ;;  %v578_v8 = vpop.xlane.xlu0 %577  ;;  %v3187_v45 = vld [vmem:[%s3751_s5] sm:$0xf]  ;;  %v625_v23 = vmul.f32 %v609_v55, %v3077_v53  ;;  %v610_v30 = vmul.f32 96.0, %v3087_v0 }
 0x245   : > { %2612 = vrsqrt.f32 %v678_v1  ;;  %v664_v57 = vmax.f32 %v648_v17, 0.0  ;;  %v634_v20 = vsub.f32 %v576_v12, %v618_v56  ;;  %v635_v24 = vsub.f32 %v578_v8, %v619_v52 }
 0x246   : > { %2614 = vrsqrt.f32 %v679_v54  ;;  %v665_v37 = vmax.f32 %v649_v6, 0.0  ;;  %v623_v52 = vmul.f32 %v607_v15, %v3058_v35  ;;  %v624_v1 = vmul.f32 %v608_v61, %v3071_v46 }
 0x247   : > { %v680_v25 = vadd.f32 1e-05, %v664_v57  ;;  %v650_v60 = vmul.f32 0.03125, %v634_v20  ;;  %v651_v28 = vmul.f32 0.03125, %v635_v24  ;;  %v3196_v7 = vrot.slane %v3187_v45, %v3765_v2 }
 0x248   : > { %v681_v51 = vadd.f32 1e-05, %v665_v37  ;;  %v580_v58 = vpop.xlane.xlu1 %579  ;;  %v582_v56 = vpop.xlane.xlu0 %581  ;;  %v3764_v12 = vsub.s32 1, %v3175_v14  ;;  %v612_v57 = vmul.f32 96.0, %v3106_v19 }
 0x249   : > { %2616 = vrsqrt.f32 %v680_v25  ;;  %v666_v11 = vmax.f32 %v650_v60, 0.0  ;;  %v667_v54 = vmax.f32 %v651_v28, 0.0  ;;  %v636_v17 = vsub.f32 %v580_v58, %v620_v62 }
 0x24a   : > { %v637_v6 = vsub.f32 %v582_v56, %v621_v38  ;;  %2618 = vrsqrt.f32 %v681_v51  ;;  %v611_v62 = vmul.f32 96.0, %v3096_v9  ;;  %v626_v60 = vmul.f32 %v610_v30, %v3087_v0 }
 0x24b   : > { %v2611_v8 = vpop.eup %2610  ;;  %v682_v35 = vadd.f32 1e-05, %v666_v11  ;;  %v683_v46 = vadd.f32 1e-05, %v667_v54  ;;  %v652_v15 = vmul.f32 0.03125, %v636_v17  ;;  %v3206_v28 = vrot.slane %v3187_v45, %v3764_v12 }
 0x24c   : > { %v653_v53 = vmul.f32 0.03125, %v637_v6  ;;  %v584_v61 = vpop.xlane.xlu1 %583  ;;  %v586_v55 = vpop.xlane.xlu0 %585  ;;  %v709_v20 = vmul.f32 %v2611_v8, %v2994_v63  ;;  %v628_v8 = vmul.f32 %v612_v57, %v3106_v19 }
 0x24d   : > { %2620 = vrsqrt.f32 %v682_v35  ;;  %v668_v24 = vmax.f32 %v652_v15, 0.0  ;;  %v638_v37 = vsub.f32 %v584_v61, %v622_v43  ;;  %v639_v38 = vsub.f32 %v586_v55, %v623_v52 }
 0x24e   : > { %2622 = vrsqrt.f32 %v683_v46  ;;  %v669_v25 = vmax.f32 %v653_v53, 0.0  ;;  %v729_v54 = vmul.f32 %v3196_v7, %v709_v20  ;;  %v627_v52 = vmul.f32 %v611_v62, %v3096_v9 }
 0x24f   : > { %v2613_v51 = vpop.eup %2612  ;;  %v684_v58 = vadd.f32 1e-05, %v668_v24  ;;  %v654_v56 = vmul.f32 0.03125, %v638_v37  ;;  %v655_v11 = vmul.f32 0.03125, %v639_v38 }
 0x250   : > { %v2615_v63 = vpop.eup %2614  ;;  %v685_v17 = vadd.f32 1e-05, %v669_v25  ;;  %v588_v6 = vpop.xlane.xlu1 %587  ;;  %v710_v0 = vmul.f32 %v2613_v51, %v3008_v5  ;;  %v749_v9 = vadd.f32 %v3206_v28, %v729_v54 }
 0x251   : > { %v590_v43 = vpop.xlane.xlu0 %589  ;;  %2624 = vrsqrt.f32 %v684_v58  ;;  %v670_v30 = vmax.f32 %v654_v56, 0.0  ;;  %v671_v35 = vmax.f32 %v655_v11, 0.0  ;;  %v640_v46 = vsub.f32 %v588_v6, %v624_v1 }
 0x252   : > { %2626 = vrsqrt.f32 %v685_v17  ;;  %v641_v15 = vsub.f32 %v590_v43, %v625_v23  ;;  %v730_v53 = vmul.f32 %v3196_v7, %v710_v0  ;;  %v711_v61 = vmul.f32 %v2615_v63, %v3004_v4 }
 0x253   : > { %v2617_v55 = vpop.eup %2616  ;;  %v686_v20 = vadd.f32 1e-05, %v670_v30  ;;  %v687_v24 = vadd.f32 1e-05, %v671_v35  ;;  %v656_v37 = vmul.f32 0.03125, %v640_v46 }
 0x254   : > { %v657_v62 = vmul.f32 0.03125, %v641_v15  ;;  %v592_v19 = vpop.xlane.xlu1 %591  ;;  %v750_v5 = vadd.f32 %v3206_v28, %v730_v53  ;;  %v712_v38 = vmul.f32 %v2617_v55, %v3018_v10  ;;  %v731_v1 = vmul.f32 %v3196_v7, %v711_v61  ;;  %v2619_v23 = vpop.eup %2618 }
 0x255   : > { %v594_v57 = vpop.xlane.xlu0 %593  ;;  %2628 = vrsqrt.f32 %v686_v20  ;;  %v672_v25 = vmax.f32 %v656_v37, 0.0  ;;  %v642_v51 = vsub.f32 %v592_v19, %v626_v60  ;;  %v713_v60 = vmul.f32 %v2619_v23, %v3024_v13 }
 0x256   : > { %v643_v4 = vsub.f32 %v594_v57, %v627_v52  ;;  %2630 = vrsqrt.f32 %v687_v24  ;;  %v673_v58 = vmax.f32 %v657_v62, 0.0  ;;  %v765_v56 = vpack.c.bf16 %v750_v5, %v749_v9 }
 0x257   : > { %v732_v11 = vmul.f32 %v3196_v7, %v712_v38  ;;  %v2621_v54 = vpop.eup %2620  ;;  %v688_v63 = vadd.f32 1e-05, %v672_v25  ;;  %v658_v17 = vmul.f32 0.03125, %v642_v51  ;;  %v751_v43 = vadd.f32 %v3206_v28, %v731_v1 }
 0x258   : > { %v659_v6 = vmul.f32 0.03125, %v643_v4  ;;  %v2623_v0 = vpop.eup %2622  ;;  %v689_v10 = vadd.f32 1e-05, %v673_v58  ;;  %v596_v30 = vpop.xlane.xlu1 %595  ;;  %2355 = vmatprep.mubr.bf16.mxu1 %v765_v56  ;;  %v714_v52 = vmul.f32 %v2621_v54, %v3034_v18  ;;  %v733_v55 = vmul.f32 %v3196_v7, %v713_v60 }
 0x259   : > { %v752_v35 = vadd.f32 %v3206_v28, %v732_v11  ;;  %2632 = vrsqrt.f32 %v688_v63  ;;  %v674_v46 = vmax.f32 %v658_v17, 0.0  ;;  %v644_v53 = vsub.f32 %v596_v30, %v628_v8 }
 0x25a   : > { %v675_v15 = vmax.f32 %v659_v6, 0.0  ;;  %2634 = vrsqrt.f32 %v689_v10  ;;  %v734_v20 = vmul.f32 %v3196_v7, %v714_v52  ;;  %v715_v19 = vmul.f32 %v2623_v0, %v3040_v21 }
 0x25b   : > { %v766_v61 = vpack.c.bf16 %v752_v35, %v751_v43  ;;  %v2625_v24 = vpop.eup %2624  ;;  %v690_v37 = vadd.f32 1e-05, %v674_v46  ;;  %v660_v62 = vmul.f32 0.03125, %v644_v53  ;;  %v753_v13 = vadd.f32 %v3206_v28, %v733_v55 }
 0x25c   : > { %v691_v9 = vadd.f32 1e-05, %v675_v15  ;;  %v2627_v57 = vpop.eup %2626  ;;  %v754_v18 = vadd.f32 %v3206_v28, %v734_v20  ;;  %v716_v8 = vmul.f32 %v2625_v24, %v3050_v26  ;;  %v735_v38 = vmul.f32 %v3196_v7, %v715_v19 }
 0x25d   : > { %2356 = vmatmul.mubr.bf16.vlgmr.msra.gmra.mrb[0].mxu1 %v766_v61  ;;  %2636 = vrsqrt.f32 %v690_v37  ;;  %v676_v5 = vmax.f32 %v660_v62, 0.0  ;;  %v717_v1 = vmul.f32 %v2627_v57, %v3056_v31 }
 0x25e   : > { %2638 = vrsqrt.f32 %v691_v9  ;;  %v767_v23 = vpack.c.bf16 %v754_v18, %v753_v13  ;;  %v736_v25 = vmul.f32 %v3196_v7, %v716_v8  ;;  %v755_v58 = vadd.f32 %v3206_v28, %v735_v38  ;;  %v2584_v18 = vld [vmem:[%s3750_s4 + $0x30] sm:$0xff]  }
 0x25f   : > { %v2629_v51 = vpop.eup %2628  ;;  %v692_v21 = vadd.f32 1e-05, %v676_v5  ;;  %v737_v11 = vmul.f32 %v3196_v7, %v717_v1  ;;  %2383 = vmatprep.subr.bf16.mxu0 %v2584_v18 }
 0x260   : > { %v2631_v4 = vpop.eup %2630  ;;  %2359 = vmatprep.mubr.bf16.mxu1 %v767_v23  ;;  %v756_v56 = vadd.f32 %v3206_v28, %v736_v25  ;;  %v718_v26 = vmul.f32 %v2629_v51, %v3066_v42  ;;  %2384 = vmatpush3.bf16.msra.mxu0 %v2584_v18 }
 0x261   : > { %2640 = vrsqrt.f32 %v692_v21  ;;  %v719_v54 = vmul.f32 %v2631_v4, %v3075_v50  ;;  %v757_v43 = vadd.f32 %v3206_v28, %v737_v11 }
 0x262   : > { %v768_v31 = vpack.c.bf16 %v756_v56, %v755_v58  ;;  %v738_v63 = vmul.f32 %v3196_v7, %v718_v26 }
 0x263   : > { %v2633_v17 = vpop.eup %2632  ;;  %v739_v30 = vmul.f32 %v3196_v7, %v719_v54 }
 0x264   : > { %v2635_v6 = vpop.eup %2634  ;;  %v758_v0 = vadd.f32 %v3206_v28, %v738_v63  ;;  %v720_v10 = vmul.f32 %v2633_v17, %v3085_v59 }
 0x265   : > { %2360 = vmatmul.mubr.bf16.gmra.mrb[4].mxu1 %v768_v31  ;;  %v721_v42 = vmul.f32 %v2635_v6, %v3091_v3  ;;  %v759_v46 = vadd.f32 %v3206_v28, %v739_v30 }
 0x266   : > { %v769_v35 = vpack.c.bf16 %v758_v0, %v757_v43  ;;  %v740_v60 = vmul.f32 %v3196_v7, %v720_v10 }
 0x267   : > { %v2637_v50 = vpop.eup %2636  ;;  %v741_v61 = vmul.f32 %v3196_v7, %v721_v42 }
 0x268   : > { %v2639_v52 = vpop.eup %2638  ;;  %2363 = vmatprep.mubr.bf16.mxu1 %v769_v35  ;;  %v760_v15 = vadd.f32 %v3206_v28, %v740_v60  ;;  %v722_v53 = vmul.f32 %v2637_v50, %v3104_v16 }
 0x269   : > { %v723_v59 = vmul.f32 %v2639_v52, %v3110_v22  ;;  %v761_v24 = vadd.f32 %v3206_v28, %v741_v61 }
 0x26a   : > { %v770_v55 = vpack.c.bf16 %v760_v15, %v759_v46  ;;  %v742_v20 = vmul.f32 %v3196_v7, %v722_v53 }
 0x26b   : > { %v2641_v3 = vpop.eup %2640  ;;  %v743_v62 = vmul.f32 %v3196_v7, %v723_v59 }
 0x26c   : > { %v762_v37 = vadd.f32 %v3206_v28, %v742_v20  ;;  %v724_v9 = vmul.f32 %v2641_v3, %v3121_v34  ;;  %v2585_v34 = vld [vmem:[%s3750_s4 + $0x38] sm:$0xff]  }
 0x26d   : > { %2364 = vmatmul.mubr.bf16.gmra.mrb[8].mxu1 %v770_v55  ;;  %v763_v57 = vadd.f32 %v3206_v28, %v743_v62  ;;  %2385 = vmatprep.subr.bf16.mxu0 %v2585_v34 }
 0x26e   : > { %v771_v19 = vpack.c.bf16 %v762_v37, %v761_v24  ;;  %v744_v16 = vmul.f32 %v3196_v7, %v724_v9  ;;  %2386 = vmatpush3.bf16.msra.mxu0 %v2585_v34  ;;  %v3763_v7 = vsub.s32 2, %v3175_v14 }
 0x270   : > { %2367 = vmatprep.mubr.bf16.mxu1 %v771_v19  ;;  %v764_v22 = vadd.f32 %v3206_v28, %v744_v16  ;;  %v792_v28 = vrot.slane %v3187_v45, %v3763_v7 }
 0x272   : > { %v772_v13 = vpack.c.bf16 %v764_v22, %v763_v57 }
 0x275   : > { %2368 = vmatmul.mubr.bf16.gmra.mrb[12].mxu1 %v772_v13 }
 0x330   : > { %v2357_v8 = vpop.f32.mrb[0].mxu1 }
 0x331   : > { %v884_v5 = vadd.f32 %v2357_v8, %v792_v28  ;;  %v875_v38 = vpop.f32.mrb[1].mxu1 }
 0x332   : > { %v876_v1 = vadd.f32 %v875_v38, %v792_v28  ;;  %v2358_v23 = vpop.f32.mrb[2].mxu1 }
 0x333   : > { %v887_v25 = vadd.f32 %v2358_v23, %v792_v28  ;;  %v878_v51 = vpop.f32.mrb[3].mxu1  ;;  %v940_v4 = vmax.f32 %v884_v5, 0.0 }
 0x334   : > { %v879_v21 = vadd.f32 %v878_v51, %v792_v28  ;;  %v938_v56 = vmax.f32 %v876_v1, 0.0 }
 0x335   : > { %v941_v58 = vmax.f32 %v887_v25, 0.0 }
 0x336   : > { %v939_v26 = vmax.f32 %v879_v21, 0.0 }
 0x337   : > { %v955_v11 = vpack.c.bf16 %v941_v58, %v940_v4 }
 0x338   : > { %v954_v54 = vpack.c.bf16 %v939_v26, %v938_v56  ;;  %v2361_v31 = vpop.f32.mrb[4].mxu1  ;;  %v3762_v56 = vsub.s32 3, %v3175_v14 }
 0x339   : > { %v900_v63 = vadd.f32 %v2361_v31, %v792_v28  ;;  %v891_v17 = vpop.f32.mrb[5].mxu1 }
 0x33a   : > { %v892_v6 = vadd.f32 %v891_v17, %v792_v28  ;;  %v2362_v43 = vpop.f32.mrb[6].mxu1  ;;  %2387 = vmatprep.mubr.bf16.mxu0 %v954_v54 }
 0x33b   : > { %v903_v0 = vadd.f32 %v2362_v43, %v792_v28  ;;  %v894_v10 = vpop.f32.mrb[7].mxu1  ;;  %2388 = vmatmul.mubr.bf16.vlgmr.msra.gmra.mrb[16].mxu0 %v955_v11  ;;  %v944_v42 = vmax.f32 %v900_v63, 0.0  ;;  %v1142_v11 = vrot.slane %v3187_v45, %v3762_v56 }
 0x33c   : > { %v895_v30 = vadd.f32 %v894_v10, %v792_v28  ;;  %v942_v60 = vmax.f32 %v892_v6, 0.0 }
 0x33d   : > { %v945_v35 = vmax.f32 %v903_v0, 0.0 }
 0x33e   : > { %v943_v50 = vmax.f32 %v895_v30, 0.0 }
 0x33f   : > { %v957_v52 = vpack.c.bf16 %v945_v35, %v944_v42 }
 0x340   : > { %v956_v46 = vpack.c.bf16 %v943_v50, %v942_v60  ;;  %v2365_v15 = vpop.f32.mrb[8].mxu1 }
 0x341   : > { %v916_v53 = vadd.f32 %v2365_v15, %v792_v28  ;;  %v907_v61 = vpop.f32.mrb[9].mxu1 }
 0x342   : > { %v908_v59 = vadd.f32 %v907_v61, %v792_v28  ;;  %v2366_v55 = vpop.f32.mrb[10].mxu1  ;;  %2391 = vmatprep.mubr.bf16.mxu0 %v956_v46 }
 0x343   : > { %v919_v20 = vadd.f32 %v2366_v55, %v792_v28  ;;  %v910_v3 = vpop.f32.mrb[11].mxu1  ;;  %2392 = vmatmul.mubr.bf16.gmra.mrb[20].mxu0 %v957_v52  ;;  %v948_v37 = vmax.f32 %v916_v53, 0.0 }
 0x344   : > { %v911_v24 = vadd.f32 %v910_v3, %v792_v28  ;;  %v946_v62 = vmax.f32 %v908_v59, 0.0 }
 0x345   : > { %v949_v9 = vmax.f32 %v919_v20, 0.0 }
 0x346   : > { %v947_v19 = vmax.f32 %v911_v24, 0.0 }
 0x347   : > { %v959_v16 = vpack.c.bf16 %v949_v9, %v948_v37 }
 0x348   : > { %v958_v57 = vpack.c.bf16 %v947_v19, %v946_v62  ;;  %v2369_v22 = vpop.f32.mrb[12].mxu1 }
 0x349   : > { %v932_v13 = vadd.f32 %v2369_v22, %v792_v28  ;;  %v923_v18 = vpop.f32.mrb[13].mxu1 }
 0x34a   : > { %v924_v34 = vadd.f32 %v923_v18, %v792_v28  ;;  %v2370_v8 = vpop.f32.mrb[14].mxu1  ;;  %2395 = vmatprep.mubr.bf16.mxu0 %v958_v57  ;;  %v3784_v57 = vld [vmem:[#allocation10_spill] sm:$0xff] }
 0x34b   : > { %v935_v5 = vadd.f32 %v2370_v8, %v792_v28  ;;  %v926_v38 = vpop.f32.mrb[15].mxu1  ;;  %2396 = vmatmul.mubr.bf16.gmra.mrb[24].mxu0 %v959_v16  ;;  %v952_v23 = vmax.f32 %v932_v13, 0.0  ;;  %v3786_v13 = vld [vmem:[#allocation9_spill] sm:$0xff] }
 0x34c   : > { %v927_v1 = vadd.f32 %v926_v38, %v792_v28  ;;  %v950_v51 = vmax.f32 %v924_v34, 0.0  ;;  %v3787_v34 = vld [vmem:[#allocation11_spill] sm:$0xff] }
 0x34d   : > { %v953_v25 = vmax.f32 %v935_v5, 0.0 }
 0x34e   : > { %v951_v21 = vmax.f32 %v927_v1, 0.0 }
 0x34f   : > { %v961_v4 = vpack.c.bf16 %v953_v25, %v952_v23 }
 0x350   : > { %v960_v58 = vpack.c.bf16 %v951_v21, %v950_v51 }
 0x352   : > { %2399 = vmatprep.mubr.bf16.mxu0 %v960_v58 }
 0x353   : > { %2400 = vmatmul.mubr.bf16.gmra.mrb[28].mxu0 %v961_v4 }
 0x40e   : > { %v2389_v26 = vpop.f32.mrb[16].mxu0 }
 0x40f   : > { %v1060_v54 = vpop.f32.mrb[17].mxu0  ;;  %v1125_v17 = vadd.f32 %v2389_v26, %v2940_v27 }
 0x410   : > { %v1123_v31 = vadd.f32 %v1060_v54, %v2942_v29  ;;  %v2390_v63 = vpop.f32.mrb[18].mxu0 }
 0x411   : > { %v1063_v28 = vpop.f32.mrb[19].mxu0  ;;  %v1126_v0 = vadd.f32 %v2390_v63, %v2946_v32  ;;  %v3280_v30 = vadd.f32 %v1142_v11, %v1125_v17 }
 0x412   : > { %v3273_v6 = vadd.f32 %v1142_v11, %v1123_v31  ;;  %v1124_v43 = vadd.f32 %v1063_v28, %v2948_v33 }
 0x413   : > { %v3283_v42 = vadd.f32 %v1142_v11, %v1126_v0 }
 0x414   : > { %v3277_v10 = vadd.f32 %v1142_v11, %v1124_v43  ;;  %1161 = vadd.xlane.f32.xlu0 %v3273_v6 }
 0x416   : > { %1163 = vadd.xlane.f32.xlu1 %v3277_v10  ;;  %v2393_v45 = vpop.f32.mrb[20].mxu0 }
 0x417   : > { %v1076_v29 = vpop.f32.mrb[21].mxu0  ;;  %v1129_v32 = vadd.f32 %v2393_v45, %v2957_v40 }
 0x418   : > { %v1127_v27 = vadd.f32 %v1076_v29, %v2952_v36  ;;  %1165 = vadd.xlane.f32.xlu0 %v3280_v30  ;;  %v2394_v35 = vpop.f32.mrb[22].mxu0 }
 0x419   : > { %v1079_v33 = vpop.f32.mrb[23].mxu0  ;;  %v1130_v52 = vadd.f32 %v2394_v35, %v2960_v41  ;;  %v3296_v15 = vadd.f32 %v1142_v11, %v1129_v32 }
 0x41a   : > { %v3288_v60 = vadd.f32 %v1142_v11, %v1127_v27  ;;  %v1128_v50 = vadd.f32 %v1079_v33, %v2954_v39  ;;  %1167 = vadd.xlane.f32.xlu1 %v3283_v42 }
 0x41b   : > { %v3299_v61 = vadd.f32 %v1142_v11, %v1130_v52 }
 0x41c   : > { %v3293_v46 = vadd.f32 %v1142_v11, %v1128_v50  ;;  %1169 = vadd.xlane.f32.xlu0 %v3288_v60 }
 0x41e   : > { %1171 = vadd.xlane.f32.xlu1 %v3293_v46  ;;  %v2397_v36 = vpop.f32.mrb[24].mxu0 }
 0x41f   : > { %v1092_v53 = vpop.f32.mrb[25].mxu0  ;;  %v1133_v41 = vadd.f32 %v2397_v36, %v2969_v48  ;;  %v3783_v48 = vld [vmem:[#allocation8_spill] sm:$0xff] }
 0x420   : > { %v1131_v40 = vadd.f32 %v1092_v53, %v2963_v44  ;;  %1173 = vadd.xlane.f32.xlu0 %v3296_v15  ;;  %v2398_v39 = vpop.f32.mrb[26].mxu0 }
 0x421   : > { %v1095_v59 = vpop.f32.mrb[27].mxu0  ;;  %v1134_v3 = vadd.f32 %v2398_v39, %v2972_v49  ;;  %v3312_v37 = vadd.f32 %v1142_v11, %v1133_v41 }
 0x422   : > { %v3304_v55 = vadd.f32 %v1142_v11, %v1131_v40  ;;  %v1132_v20 = vadd.f32 %v1095_v59, %v2966_v47  ;;  %1175 = vadd.xlane.f32.xlu1 %v3299_v61 }
 0x423   : > { %v3315_v62 = vadd.f32 %v1142_v11, %v1134_v3 }
 0x424   : > { %v3309_v24 = vadd.f32 %v1142_v11, %v1132_v20  ;;  %1177 = vadd.xlane.f32.xlu0 %v3304_v55 }
 0x426   : > { %3782 = vst [vmem:[#allocation12_spill] sm:$0xff] %v3309_v24  ;;  %1179 = vadd.xlane.f32.xlu1 %v3309_v24  ;;  %v2401_v44 = vpop.f32.mrb[28].mxu0 }
 0x427   : > { %v1108_v9 = vpop.f32.mrb[29].mxu0  ;;  %v1137_v49 = vadd.f32 %v2401_v44, %v3784_v57 }
 0x428   : > { %v1135_v19 = vadd.f32 %v1108_v9, %v3783_v48  ;;  %1181 = vadd.xlane.f32.xlu0 %v3312_v37  ;;  %v2402_v47 = vpop.f32.mrb[30].mxu0 }
 0x429   : > { %v1111_v16 = vpop.f32.mrb[31].mxu0  ;;  %v1138_v8 = vadd.f32 %v2402_v47, %v3787_v34  ;;  %v3328_v38 = vadd.f32 %v1142_v11, %v1137_v49 }
 0x42a   : > { %v3320_v22 = vadd.f32 %v1142_v11, %v1135_v19  ;;  %v1136_v18 = vadd.f32 %v1111_v16, %v3786_v13  ;;  %1183 = vadd.xlane.f32.xlu1 %v3315_v62 }
 0x42b   : > { %3789 = vst [vmem:[#allocation9_spill] sm:$0xff] %v3328_v38  ;;  %v3331_v1 = vadd.f32 %v1142_v11, %v1138_v8 }
 0x42c   : > { %3785 = vst [vmem:[#allocation8_spill] sm:$0xff] %v3320_v22  ;;  %v3325_v5 = vadd.f32 %v1142_v11, %v1136_v18  ;;  %1185 = vadd.xlane.f32.xlu0 %v3320_v22 }
 0x42d   : > { %3790 = vst [vmem:[#allocation11_spill] sm:$0xff] %v3331_v1 }
 0x42e   : > { %3788 = vst [vmem:[#allocation10_spill] sm:$0xff] %v3325_v5  ;;  %1187 = vadd.xlane.f32.xlu1 %v3325_v5 }
 0x430   : > { %1189 = vadd.xlane.f32.xlu0 %v3328_v38 }
 0x432   : > { %1191 = vadd.xlane.f32.xlu1 %v3331_v1 }
 0x4a1   : > { %v1162_v23 = vpop.xlane.xlu0 %1161 }
 0x4a2   : > { %v3335_v25 = vmul.f32 0.03125, %v1162_v23 }
 0x4a3   : > { %v1164_v51 = vpop.xlane.xlu1 %1163 }
 0x4a4   : > { %v3337_v21 = vmul.f32 0.03125, %v1164_v51  ;;  %v3341_v4 = vsub.f32 %v3273_v6, %v3335_v25 }
 0x4a5   : > { %v1166_v58 = vpop.xlane.xlu0 %1165 }
 0x4a6   : > { %v3343_v26 = vmul.f32 0.03125, %v1166_v58  ;;  %v1225_v11 = vmul.f32 %v3341_v4, %v3341_v4  ;;  %v3349_v54 = vsub.f32 %v3277_v10, %v3337_v21 }
 0x4a7   : > { %v1168_v31 = vpop.xlane.xlu1 %1167 }
 0x4a8   : > { %v3351_v63 = vmul.f32 0.03125, %v1168_v31  ;;  %1241 = vadd.xlane.f32.xlu0 %v1225_v11  ;;  %v1226_v28 = vmul.f32 %v3349_v54, %v3349_v54  ;;  %v3357_v17 = vsub.f32 %v3280_v30, %v3343_v26  ;;  %v2586_v11 = vld [vmem:[%s3749_s3 + $0x40] sm:$0xff]  }
 0x4a9   : > { %v1170_v43 = vpop.xlane.xlu0 %1169  ;;  %2403 = vmatprep.subr.bf16.mxu1 %v2586_v11 }
 0x4aa   : > { %v3359_v0 = vmul.f32 0.03125, %v1170_v43  ;;  %1243 = vadd.xlane.f32.xlu1 %v1226_v28  ;;  %v1227_v45 = vmul.f32 %v3357_v17, %v3357_v17  ;;  %v3365_v29 = vsub.f32 %v3283_v42, %v3351_v63  ;;  %2404 = vmatpush3.bf16.msra.mxu1 %v2586_v11 }
 0x4ab   : > { %v1172_v27 = vpop.xlane.xlu1 %1171 }
 0x4ac   : > { %v3367_v35 = vmul.f32 0.03125, %v1172_v27  ;;  %1245 = vadd.xlane.f32.xlu0 %v1227_v45  ;;  %v1228_v33 = vmul.f32 %v3365_v29, %v3365_v29  ;;  %v3373_v32 = vsub.f32 %v3288_v60, %v3359_v0  ;;  %v1277_v12 = vmul.f32 96.0, %v3359_v0 }
 0x4ad   : > { %v1174_v50 = vpop.xlane.xlu0 %1173 }
 0x4ae   : > { %v3375_v52 = vmul.f32 0.03125, %v1174_v50  ;;  %1247 = vadd.xlane.f32.xlu1 %v1228_v33  ;;  %v1229_v36 = vmul.f32 %v3373_v32, %v3373_v32  ;;  %v3381_v53 = vsub.f32 %v3293_v46, %v3367_v35  ;;  %v1278_v2 = vmul.f32 96.0, %v3367_v35 }
 0x4af   : > { %v1176_v40 = vpop.xlane.xlu1 %1175 }
 0x4b0   : > { %v3383_v39 = vmul.f32 0.03125, %v1176_v40  ;;  %1249 = vadd.xlane.f32.xlu0 %v1229_v36  ;;  %v1230_v59 = vmul.f32 %v3381_v53, %v3381_v53  ;;  %v3389_v41 = vsub.f32 %v3296_v15, %v3375_v52  ;;  %v2587_v40 = vld [vmem:[%s3749_s3 + $0x48] sm:$0xff]  }
 0x4b1   : > { %v1178_v20 = vpop.xlane.xlu0 %1177  ;;  %2405 = vmatprep.subr.bf16.mxu1 %v2587_v40 }
 0x4b2   : > { %v3391_v3 = vmul.f32 0.03125, %v1178_v20  ;;  %1251 = vadd.xlane.f32.xlu1 %v1230_v59  ;;  %v1231_v44 = vmul.f32 %v3389_v41, %v3389_v41  ;;  %v3397_v9 = vsub.f32 %v3299_v61, %v3383_v39  ;;  %2406 = vmatpush3.bf16.msra.mxu1 %v2587_v40  ;;  %v2593_v40 = vld [vmem:[%s3749_s3 + $0x78] sm:$0xff]  }
 0x4b3   : > { %v1180_v48 = vpop.xlane.xlu1 %1179 }
 0x4b4   : > { %v3399_v19 = vmul.f32 0.03125, %v1180_v48  ;;  %1253 = vadd.xlane.f32.xlu0 %v1231_v44  ;;  %v1232_v47 = vmul.f32 %v3397_v9, %v3397_v9  ;;  %v3405_v16 = vsub.f32 %v3304_v55, %v3391_v3 }
 0x4b5   : > { %v1182_v57 = vpop.xlane.xlu0 %1181 }
 0x4b6   : > { %v3407_v49 = vmul.f32 0.03125, %v1182_v57  ;;  %1255 = vadd.xlane.f32.xlu1 %v1232_v47  ;;  %v1233_v13 = vmul.f32 %v3405_v16, %v3405_v16  ;;  %v3413_v18 = vsub.f32 %v3309_v24, %v3399_v19 }
 0x4b7   : > { %v1184_v34 = vpop.xlane.xlu1 %1183 }
 0x4b8   : > { %v3415_v8 = vmul.f32 0.03125, %v1184_v34  ;;  %1257 = vadd.xlane.f32.xlu0 %v1233_v13  ;;  %v1234_v23 = vmul.f32 %v3413_v18, %v3413_v18  ;;  %v3421_v51 = vsub.f32 %v3312_v37, %v3407_v49  ;;  %v2588_v34 = vld [vmem:[%s3749_s3 + $0x50] sm:$0xff]  }
 0x4b9   : > { %v1186_v58 = vpop.xlane.xlu0 %1185  ;;  %2407 = vmatprep.subr.bf16.mxu1 %v2588_v34 }
 0x4ba   : > { %v3426_v31 = vmul.f32 0.03125, %v1186_v58  ;;  %1259 = vadd.xlane.f32.xlu1 %v1234_v23  ;;  %v1235_v28 = vmul.f32 %v3421_v51, %v3421_v51  ;;  %v3432_v43 = vsub.f32 %v3315_v62, %v3415_v8  ;;  %2408 = vmatpush3.bf16.msra.mxu1 %v2588_v34  ;;  %v2597_v34 = vld [vmem:[%s3750_s4 + $0x58] sm:$0xff]  }
 0x4bb   : > { %v1188_v45 = vpop.xlane.xlu1 %1187 }
 0x4bc   : > { %v3434_v27 = vmul.f32 0.03125, %v1188_v45  ;;  %1261 = vadd.xlane.f32.xlu0 %v1235_v28  ;;  %v1236_v33 = vmul.f32 %v3432_v43, %v3432_v43  ;;  %v3440_v50 = vsub.f32 %v3320_v22, %v3426_v31  ;;  %v2589_v28 = vld [vmem:[%s3749_s3 + $0x58] sm:$0xff]   ;;  %v2590_v45 = vld [vmem:[%s3749_s3 + $0x60] sm:$0xff]  }
 0x4bd   : > { %v1190_v36 = vpop.xlane.xlu0 %1189  ;;  %2409 = vmatprep.subr.bf16.mxu1 %v2589_v28 }
 0x4be   : > { %v3445_v59 = vmul.f32 0.03125, %v1190_v36  ;;  %1263 = vadd.xlane.f32.xlu1 %v1236_v33  ;;  %v1237_v20 = vmul.f32 %v3440_v50, %v3440_v50  ;;  %v3451_v44 = vsub.f32 %v3325_v5, %v3434_v27  ;;  %2410 = vmatpush3.bf16.msra.mxu1 %v2589_v28  ;;  %v2591_v33 = vld [vmem:[%s3749_s3 + $0x68] sm:$0xff]   ;;  %v2592_v36 = vld [vmem:[%s3749_s3 + $0x70] sm:$0xff]   ;;  %v1273_v28 = vmul.f32 96.0, %v3335_v25 }
 0x4bf   : > { %v1192_v48 = vpop.xlane.xlu1 %1191  ;;  %2411 = vmatprep.subr.bf16.mxu1 %v2590_v45 }
 0x4c0   : > { %v3453_v47 = vmul.f32 0.03125, %v1192_v48  ;;  %1265 = vadd.xlane.f32.xlu0 %v1237_v20  ;;  %v1238_v57 = vmul.f32 %v3451_v44, %v3451_v44  ;;  %v3459_v13 = vsub.f32 %v3328_v38, %v3445_v59  ;;  %v2594_v20 = vld [vmem:[%s3750_s4 + $0x40] sm:$0xff]   ;;  %v2595_v48 = vld [vmem:[%s3750_s4 + $0x48] sm:$0xff]  }
 0x4c1   : > { %2435 = vmatprep.subr.bf16.mxu0 %v2594_v20 }
 0x4c2   : > { %1267 = vadd.xlane.f32.xlu1 %v1238_v57  ;;  %v1239_v23 = vmul.f32 %v3459_v13, %v3459_v13  ;;  %v3468_v58 = vsub.f32 %v3331_v1, %v3453_v47  ;;  %2412 = vmatpush3.bf16.msra.mxu1 %v2590_v45  ;;  %v2596_v57 = vld [vmem:[%s3750_s4 + $0x50] sm:$0xff]   ;;  %v1274_v45 = vmul.f32 96.0, %v3337_v21  ;;  %v3791_v1 = vsub.s32 0, %v3175_v14 }
 0x4c3   : > { %2413 = vmatprep.subr.bf16.mxu1 %v2591_v33  ;;  %2436 = vmatpush3.bf16.msra.mxu0 %v2594_v20 }
 0x4c4   : > { %1269 = vadd.xlane.f32.xlu0 %v1239_v23  ;;  %v1240_v11 = vmul.f32 %v3468_v58, %v3468_v58  ;;  %2437 = vmatprep.subr.bf16.mxu0 %v2595_v48  ;;  %v2598_v23 = vld [vmem:[%s3750_s4 + $0x60] sm:$0xff]  }
 0x4c6   : > { %1271 = vadd.xlane.f32.xlu1 %v1240_v11  ;;  %2414 = vmatpush3.bf16.msra.mxu1 %v2591_v33  ;;  %v2599_v11 = vld [vmem:[%s3750_s4 + $0x68] sm:$0xff]   ;;  %v1289_v33 = vmul.f32 %v1273_v28, %v3335_v25  ;;  %v3517_v25 = vld [vmem:[%s3751_s5 + $0x4] sm:$0xf] }
 0x4c7   : > { %2415 = vmatprep.subr.bf16.mxu1 %v2592_v36  ;;  %2438 = vmatpush3.bf16.msra.mxu0 %v2595_v48  ;;  %v1290_v48 = vmul.f32 %v1274_v45, %v3337_v21  ;;  %v3525_v22 = vrot.slane %v3517_v25, %v3791_v1  ;;  %v1282_v1 = vmul.f32 96.0, %v3399_v19 }
 0x4c8   : > { %2439 = vmatprep.subr.bf16.mxu0 %v2596_v57 }
 0x4ca   : > { %2416 = vmatpush3.bf16.msra.mxu1 %v2592_v36  ;;  %v1275_v36 = vmul.f32 96.0, %v3343_v26 }
 0x4cb   : > { %2417 = vmatprep.subr.bf16.mxu1 %v2593_v40  ;;  %2440 = vmatpush3.bf16.msra.mxu0 %v2596_v57  ;;  %v1276_v57 = vmul.f32 96.0, %v3351_v63 }
 0x4cc   : > { %2441 = vmatprep.subr.bf16.mxu0 %v2597_v34 }
 0x4cd   : > { %v1292_v45 = vmul.f32 %v1276_v57, %v3351_v63  ;;  %v1281_v63 = vmul.f32 96.0, %v3391_v3 }
 0x4ce   : > { %2418 = vmatpush3.bf16.msra.mxu1 %v2593_v40 }
 0x4cf   : > { %2442 = vmatpush3.bf16.msra.mxu0 %v2597_v34 }
 0x4d0   : > { %2443 = vmatprep.subr.bf16.mxu0 %v2598_v23 }
 0x4d3   : > { %2444 = vmatpush3.bf16.msra.mxu0 %v2598_v23  ;;  %v1291_v23 = vmul.f32 %v1275_v36, %v3343_v26  ;;  %v1280_v26 = vmul.f32 96.0, %v3383_v39 }
 0x4d4   : > { %2445 = vmatprep.subr.bf16.mxu0 %v2599_v11 }
 0x4d7   : > { %2446 = vmatpush3.bf16.msra.mxu0 %v2599_v11 }
 0x535   : > { %v1242_v40 = vpop.xlane.xlu0 %1241 }
 0x536   : > { %v1305_v20 = vsub.f32 %v1242_v40, %v1289_v33 }
 0x537   : > { %v1244_v34 = vpop.xlane.xlu1 %1243 }
 0x538   : > { %v1321_v56 = vmul.f32 0.03125, %v1305_v20  ;;  %v1306_v7 = vsub.f32 %v1244_v34, %v1290_v48  ;;  %v1279_v20 = vmul.f32 96.0, %v3375_v52 }
 0x539   : > { %v1246_v11 = vpop.xlane.xlu0 %1245 }
 0x53a   : > { %v1337_v28 = vmax.f32 %v1321_v56, 0.0  ;;  %v1322_v33 = vmul.f32 0.03125, %v1306_v7  ;;  %v1307_v21 = vsub.f32 %v1246_v11, %v1291_v23  ;;  %v1293_v56 = vmul.f32 %v1277_v12, %v3359_v0 }
 0x53b   : > { %v1248_v40 = vpop.xlane.xlu1 %1247  ;;  %v1294_v23 = vmul.f32 %v1278_v2, %v3367_v35  ;;  %v1297_v35 = vmul.f32 %v1281_v63, %v3391_v3 }
 0x53c   : > { %v1353_v36 = vadd.f32 1e-05, %v1337_v28  ;;  %v1338_v48 = vmax.f32 %v1322_v33, 0.0  ;;  %v1323_v34 = vmul.f32 0.03125, %v1307_v21  ;;  %v1308_v5 = vsub.f32 %v1248_v40, %v1292_v45 }
 0x53d   : > { %v1250_v7 = vpop.xlane.xlu0 %1249  ;;  %v1295_v21 = vmul.f32 %v1279_v20, %v3375_v52  ;;  %v1296_v45 = vmul.f32 %v1280_v26, %v3383_v39  ;;  %v1298_v26 = vmul.f32 %v1282_v1, %v3399_v19 }
 0x53e   : > { %2642 = vrsqrt.f32 %v1353_v36  ;;  %v1354_v57 = vadd.f32 1e-05, %v1338_v48  ;;  %v1339_v11 = vmax.f32 %v1323_v34, 0.0  ;;  %v1324_v38 = vmul.f32 0.03125, %v1308_v5 }
 0x53f   : > { %v1309_v28 = vsub.f32 %v1250_v7, %v1293_v56  ;;  %v1252_v33 = vpop.xlane.xlu1 %1251  ;;  %v1283_v36 = vmul.f32 96.0, %v3407_v49  ;;  %v1284_v5 = vmul.f32 96.0, %v3415_v8  ;;  %v1285_v56 = vmul.f32 96.0, %v3426_v31 }
 0x540   : > { %2644 = vrsqrt.f32 %v1354_v57  ;;  %v1355_v40 = vadd.f32 1e-05, %v1339_v11  ;;  %v1340_v12 = vmax.f32 %v1324_v38, 0.0  ;;  %v1310_v0 = vsub.f32 %v1252_v33, %v1294_v23 }
 0x541   : > { %v1325_v24 = vmul.f32 0.03125, %v1309_v28  ;;  %v1254_v2 = vpop.xlane.xlu0 %1253  ;;  %v1286_v38 = vmul.f32 96.0, %v3434_v27  ;;  %v1299_v11 = vmul.f32 %v1283_v36, %v3407_v49  ;;  %v1300_v28 = vmul.f32 %v1284_v5, %v3415_v8 }
 0x542   : > { %2646 = vrsqrt.f32 %v1355_v40  ;;  %v1356_v48 = vadd.f32 1e-05, %v1340_v12  ;;  %v1326_v34 = vmul.f32 0.03125, %v1310_v0  ;;  %v1311_v52 = vsub.f32 %v1254_v2, %v1295_v21 }
 0x543   : > { %v1341_v20 = vmax.f32 %v1325_v24, 0.0  ;;  %v1256_v39 = vpop.xlane.xlu1 %1255  ;;  %v1287_v33 = vmul.f32 96.0, %v3445_v59  ;;  %v1301_v12 = vmul.f32 %v1285_v56, %v3426_v31  ;;  %v1302_v0 = vmul.f32 %v1286_v38, %v3434_v27 }
 0x544   : > { %2648 = vrsqrt.f32 %v1356_v48  ;;  %v1342_v7 = vmax.f32 %v1326_v34, 0.0  ;;  %v1327_v23 = vmul.f32 0.03125, %v1311_v52  ;;  %v1312_v3 = vsub.f32 %v1256_v39, %v1296_v45 }
 0x545   : > { %v1357_v63 = vadd.f32 1e-05, %v1341_v20  ;;  %v1258_v57 = vpop.xlane.xlu0 %1257  ;;  %v1288_v45 = vmul.f32 96.0, %v3453_v47  ;;  %v1303_v34 = vmul.f32 %v1287_v33, %v3445_v59 }
 0x546   : > { %v1358_v24 = vadd.f32 1e-05, %v1342_v7  ;;  %v1343_v21 = vmax.f32 %v1327_v23, 0.0  ;;  %v1328_v40 = vmul.f32 0.03125, %v1312_v3  ;;  %v1313_v19 = vsub.f32 %v1258_v57, %v1297_v35 }
 0x547   : > { %2650 = vrsqrt.f32 %v1357_v63  ;;  %v1260_v1 = vpop.xlane.xlu1 %1259  ;;  %v3792_v35 = vsub.s32 1, %v3175_v14  ;;  %v1304_v23 = vmul.f32 %v1288_v45, %v3453_v47 }
 0x548   : > { %v2643_v2 = vpop.eup %2642  ;;  %2652 = vrsqrt.f32 %v1358_v24  ;;  %v1359_v48 = vadd.f32 1e-05, %v1343_v21  ;;  %v1344_v49 = vmax.f32 %v1328_v40, 0.0  ;;  %v1329_v36 = vmul.f32 0.03125, %v1313_v19 }
 0x549   : > { %v1314_v8 = vsub.f32 %v1260_v1, %v1298_v26  ;;  %v1262_v5 = vpop.xlane.xlu0 %1261  ;;  %v1385_v52 = vmul.f32 %v2643_v2, %v3341_v4  ;;  %v3550_v20 = vrot.slane %v3517_v25, %v3792_v35 }
 0x54a   : > { %v2645_v31 = vpop.eup %2644  ;;  %2654 = vrsqrt.f32 %v1359_v48  ;;  %v1360_v27 = vadd.f32 1e-05, %v1344_v49  ;;  %v1345_v39 = vmax.f32 %v1329_v36, 0.0  ;;  %v1315_v56 = vsub.f32 %v1262_v5, %v1299_v11 }
 0x54b   : > { %v1330_v38 = vmul.f32 0.03125, %v1314_v8  ;;  %v1264_v7 = vpop.xlane.xlu1 %1263  ;;  %v1386_v26 = vmul.f32 %v2645_v31, %v3349_v54  ;;  %v1405_v59 = vmul.f32 %v3525_v22, %v1385_v52 }
 0x54c   : > { %v2647_v3 = vpop.eup %2646  ;;  %2656 = vrsqrt.f32 %v1360_v27  ;;  %v1361_v4 = vadd.f32 1e-05, %v1345_v39  ;;  %v1331_v63 = vmul.f32 0.03125, %v1315_v56  ;;  %v1316_v57 = vsub.f32 %v1264_v7, %v1300_v28 }
 0x54d   : > { %v1387_v33 = vmul.f32 %v2647_v3, %v3357_v17  ;;  %v1346_v24 = vmax.f32 %v1330_v38, 0.0  ;;  %v1266_v21 = vpop.xlane.xlu0 %1265  ;;  %v1406_v40 = vmul.f32 %v3525_v22, %v1386_v26  ;;  %v1425_v11 = vadd.f32 %v3550_v20, %v1405_v59 }
 0x54e   : > { %v2649_v19 = vpop.eup %2648  ;;  %2658 = vrsqrt.f32 %v1361_v4  ;;  %v1347_v47 = vmax.f32 %v1331_v63, 0.0  ;;  %v1332_v1 = vmul.f32 0.03125, %v1316_v57  ;;  %v1317_v54 = vsub.f32 %v1266_v21, %v1301_v12 }
 0x54f   : > { %v1407_v45 = vmul.f32 %v3525_v22, %v1387_v33  ;;  %v1388_v2 = vmul.f32 %v2649_v19, %v3365_v29  ;;  %v1362_v48 = vadd.f32 1e-05, %v1346_v24  ;;  %v1268_v49 = vpop.xlane.xlu1 %1267  ;;  %v1426_v28 = vadd.f32 %v3550_v20, %v1406_v40 }
 0x550   : > { %v1363_v17 = vadd.f32 1e-05, %v1347_v47  ;;  %v1348_v36 = vmax.f32 %v1332_v1, 0.0  ;;  %v1333_v8 = vmul.f32 0.03125, %v1317_v54  ;;  %v1318_v5 = vsub.f32 %v1268_v49, %v1302_v0 }
 0x551   : > { %v2651_v52 = vpop.eup %2650  ;;  %v1408_v35 = vmul.f32 %v3525_v22, %v1388_v2  ;;  %2660 = vrsqrt.f32 %v1362_v48  ;;  %v1270_v31 = vpop.xlane.xlu0 %1269  ;;  %v1441_v27 = vpack.c.bf16 %v1426_v28, %v1425_v11  ;;  %v1427_v12 = vadd.f32 %v3550_v20, %v1407_v45 }
 0x552   : > { %v2653_v39 = vpop.eup %2652  ;;  %2662 = vrsqrt.f32 %v1363_v17  ;;  %v1364_v56 = vadd.f32 1e-05, %v1348_v36  ;;  %v1349_v29 = vmax.f32 %v1333_v8, 0.0  ;;  %v1334_v38 = vmul.f32 0.03125, %v1318_v5 }
 0x553   : > { %v1319_v7 = vsub.f32 %v1270_v31, %v1303_v34  ;;  %v1272_v26 = vpop.xlane.xlu1 %1271  ;;  %2419 = vmatprep.mubr.bf16.mxu1 %v1441_v27  ;;  %v1428_v59 = vadd.f32 %v3550_v20, %v1408_v35  ;;  %v1389_v0 = vmul.f32 %v2651_v52, %v3373_v32  ;;  %v1390_v3 = vmul.f32 %v2653_v39, %v3381_v53 }
 0x554   : > { %v2655_v4 = vpop.eup %2654  ;;  %2664 = vrsqrt.f32 %v1364_v56  ;;  %v1365_v63 = vadd.f32 1e-05, %v1349_v29  ;;  %v1350_v57 = vmax.f32 %v1334_v38, 0.0  ;;  %v1320_v33 = vsub.f32 %v1272_v26, %v1304_v23 }
 0x555   : > { %v1335_v24 = vmul.f32 0.03125, %v1319_v7  ;;  %v1442_v21 = vpack.c.bf16 %v1428_v59, %v1427_v12  ;;  %v1409_v40 = vmul.f32 %v3525_v22, %v1389_v0  ;;  %v1410_v11 = vmul.f32 %v3525_v22, %v1390_v3 }
 0x556   : > { %v2657_v34 = vpop.eup %2656  ;;  %2666 = vrsqrt.f32 %v1365_v63  ;;  %v1366_v19 = vadd.f32 1e-05, %v1350_v57  ;;  %v1336_v47 = vmul.f32 0.03125, %v1320_v33  ;;  %v1391_v1 = vmul.f32 %v2655_v4, %v3389_v41 }
 0x557   : > { %v1351_v32 = vmax.f32 %v1335_v24, 0.0  ;;  %2420 = vmatmul.mubr.bf16.vlgmr.msra.gmra.mrb[16].mxu1 %v1442_v21  ;;  %v1429_v53 = vadd.f32 %v3550_v20, %v1409_v40  ;;  %v1430_v54 = vadd.f32 %v3550_v20, %v1410_v11  ;;  %v1392_v23 = vmul.f32 %v2657_v34, %v3397_v9 }
 0x558   : > { %v2659_v45 = vpop.eup %2658  ;;  %2668 = vrsqrt.f32 %v1366_v19  ;;  %v1352_v2 = vmax.f32 %v1336_v47, 0.0  ;;  %v1411_v48 = vmul.f32 %v3525_v22, %v1391_v1 }
 0x559   : > { %v1367_v49 = vadd.f32 1e-05, %v1351_v32  ;;  %v1443_v28 = vpack.c.bf16 %v1430_v54, %v1429_v53  ;;  %v1412_v17 = vmul.f32 %v3525_v22, %v1392_v23  ;;  %v1393_v36 = vmul.f32 %v2659_v45, %v3405_v16  ;;  %v2603_v54 = vld [vmem:[#allocation2 + $0x8] sm:$0xff]   ;;  %v2605_v23 = vld [vmem:[#allocation2 + $0x18] sm:$0xff]   ;;  %v3606_v45 = vld [vmem:[#allocation2 + $0x20] sm:$0xff]  }
 0x55a   : > { %v1368_v41 = vadd.f32 1e-05, %v1352_v2  ;;  %v1431_v5 = vadd.f32 %v3550_v20, %v1411_v48  ;;  %v3793_v2 = vsub.s32 2, %v3175_v14 }
 0x55b   : > { %v2661_v8 = vpop.eup %2660  ;;  %2670 = vrsqrt.f32 %v1367_v49  ;;  %2423 = vmatprep.mubr.bf16.mxu1 %v1443_v28  ;;  %v1432_v52 = vadd.f32 %v3550_v20, %v1412_v17  ;;  %v1413_v9 = vmul.f32 %v3525_v22, %v1393_v36 }
 0x55c   : > { %v2663_v35 = vpop.eup %2662  ;;  %2672 = vrsqrt.f32 %v1368_v41  ;;  %v1394_v31 = vmul.f32 %v2661_v8, %v3413_v18  ;;  %v3613_v48 = vrot.slane %v3517_v25, %v3793_v2 }
 0x55d   : > { %v1444_v27 = vpack.c.bf16 %v1432_v52, %v1431_v5  ;;  %v1395_v12 = vmul.f32 %v2663_v35, %v3421_v51  ;;  %v1433_v7 = vadd.f32 %v3550_v20, %v1413_v9 }
 0x55e   : > { %v2665_v39 = vpop.eup %2664  ;;  %v1414_v16 = vmul.f32 %v3525_v22, %v1394_v31 }
 0x55f   : > { %2424 = vmatmul.mubr.bf16.gmra.mrb[20].mxu1 %v1444_v27  ;;  %v1396_v56 = vmul.f32 %v2665_v39, %v3432_v43  ;;  %v1415_v29 = vmul.f32 %v3525_v22, %v1395_v12 }
 0x560   : > { %v2667_v38 = vpop.eup %2666  ;;  %v1434_v26 = vadd.f32 %v3550_v20, %v1414_v16 }
 0x561   : > { %v1416_v59 = vmul.f32 %v3525_v22, %v1396_v56  ;;  %v1397_v18 = vmul.f32 %v2667_v38, %v3440_v50  ;;  %v1435_v51 = vadd.f32 %v3550_v20, %v1415_v29 }
 0x562   : > { %v2669_v0 = vpop.eup %2668  ;;  %v1445_v3 = vpack.c.bf16 %v1434_v26, %v1433_v7 }
 0x563   : > { %v1436_v4 = vadd.f32 %v3550_v20, %v1416_v59  ;;  %v1398_v63 = vmul.f32 %v2669_v0, %v3451_v44  ;;  %v1417_v43 = vmul.f32 %v3525_v22, %v1397_v18 }
 0x564   : > { %2427 = vmatprep.mubr.bf16.mxu1 %v1445_v3 }
 0x565   : > { %v2671_v57 = vpop.eup %2670  ;;  %v1446_v33 = vpack.c.bf16 %v1436_v4, %v1435_v51  ;;  %v1418_v24 = vmul.f32 %v3525_v22, %v1398_v63  ;;  %v1437_v50 = vadd.f32 %v3550_v20, %v1417_v43 }
 0x566   : > { %v2673_v21 = vpop.eup %2672  ;;  %v1399_v40 = vmul.f32 %v2671_v57, %v3459_v13  ;;  %v2600_v13 = vld [vmem:[%s3750_s4 + $0x70] sm:$0xff]  }
 0x567   : > { %2428 = vmatmul.mubr.bf16.gmra.mrb[24].mxu1 %v1446_v33  ;;  %v1438_v11 = vadd.f32 %v3550_v20, %v1418_v24  ;;  %v1400_v34 = vmul.f32 %v2673_v21, %v3468_v58  ;;  %2447 = vmatprep.subr.bf16.mxu0 %v2600_v13  ;;  %v2601_v58 = vld [vmem:[%s3750_s4 + $0x78] sm:$0xff]  }
 0x568   : > { %v1419_v19 = vmul.f32 %v3525_v22, %v1399_v40  ;;  %2448 = vmatpush3.bf16.msra.mxu0 %v2600_v13 }
 0x569   : > { %v1447_v44 = vpack.c.bf16 %v1438_v11, %v1437_v50  ;;  %v1420_v47 = vmul.f32 %v3525_v22, %v1400_v34  ;;  %2449 = vmatprep.subr.bf16.mxu0 %v2601_v58  ;;  %v2602_v22 = vld [vmem:[#allocation2] sm:$0xff]  }
 0x56a   : > { %v1439_v1 = vadd.f32 %v3550_v20, %v1419_v19  ;;  %2499 = vmatprep.subr.bf16.mxu1 %v2602_v22 }
 0x56b   : > { %2431 = vmatprep.mubr.bf16.mxu1 %v1447_v44  ;;  %v1440_v32 = vadd.f32 %v3550_v20, %v1420_v47  ;;  %2507 = vmatpush3.bf16.msra.mxu1 %v2602_v22  ;;  %v2604_v20 = vld [vmem:[#allocation2 + $0x10] sm:$0xff]  }
 0x56c   : > { %2450 = vmatpush3.bf16.msra.mxu0 %v2601_v58  ;;  %2500 = vmatprep.subr.bf16.mxu1 %v2603_v54 }
 0x56d   : > { %v1448_v53 = vpack.c.bf16 %v1440_v32, %v1439_v1  ;;  %2467 = vmatprep.subr.bf16.mxu0 %v2602_v22 }
 0x56f   : > { %2432 = vmatmul.mubr.bf16.gmra.mrb[28].mxu1 %v1448_v53 }
 0x570   : > { %2508 = vmatpush3.bf16.msra.mxu1 %v2603_v54 }
 0x571   : > { %2501 = vmatprep.subr.bf16.mxu1 %v2604_v20 }
 0x574   : > { %2509 = vmatpush3.bf16.msra.mxu1 %v2604_v20 }
 0x575   : > { %2502 = vmatprep.subr.bf16.mxu1 %v2605_v23 }
 0x578   : > { %2510 = vmatpush3.bf16.msra.mxu1 %v2605_v23 }
 0x579   : > { %2503 = vmatprep.subr.bf16.mxu1 %v3606_v45 }
 0x57c   : > { %2511 = vmatpush3.bf16.msra.mxu1 %v3606_v45 }
 0x62a   : > { %v2421_v49 = vpop.f32.mrb[16].mxu1 }
 0x62b   : > { %v1561_v28 = vadd.f32 %v2421_v49, %v3613_v48  ;;  %v1552_v17 = vpop.f32.mrb[17].mxu1 }
 0x62c   : > { %v1553_v36 = vadd.f32 %v1552_v17, %v3613_v48  ;;  %v2422_v41 = vpop.f32.mrb[18].mxu1 }
 0x62d   : > { %v1564_v8 = vadd.f32 %v2422_v41, %v3613_v48  ;;  %v1555_v5 = vpop.f32.mrb[19].mxu1  ;;  %v1617_v9 = vmax.f32 %v1561_v28, 0.0 }
 0x62e   : > { %v1556_v52 = vadd.f32 %v1555_v5, %v3613_v48  ;;  %v1615_v31 = vmax.f32 %v1553_v36, 0.0 }
 0x62f   : > { %v1618_v35 = vmax.f32 %v1564_v8, 0.0 }
 0x630   : > { %v1616_v27 = vmax.f32 %v1556_v52, 0.0  ;;  %v2607_v52 = vld [vmem:[#allocation2 + $0x28] sm:$0xff]  }
 0x631   : > { %v1632_v12 = vpack.c.bf16 %v1618_v35, %v1617_v9  ;;  %2504 = vmatprep.subr.bf16.mxu1 %v2607_v52  ;;  %v2608_v9 = vld [vmem:[#allocation2 + $0x30] sm:$0xff]  }
 0x632   : > { %v1631_v39 = vpack.c.bf16 %v1616_v27, %v1615_v31  ;;  %v2425_v16 = vpop.f32.mrb[20].mxu1  ;;  %2512 = vmatpush3.bf16.msra.mxu1 %v2607_v52 }
 0x633   : > { %v1577_v56 = vadd.f32 %v2425_v16, %v3613_v48  ;;  %v1568_v29 = vpop.f32.mrb[21].mxu1  ;;  %2505 = vmatprep.subr.bf16.mxu1 %v2608_v9 }
 0x634   : > { %v1569_v38 = vadd.f32 %v1568_v29, %v3613_v48  ;;  %v2426_v7 = vpop.f32.mrb[22].mxu1  ;;  %2451 = vmatprep.mubr.bf16.mxu0 %v1631_v39 }
 0x635   : > { %v1580_v26 = vadd.f32 %v2426_v7, %v3613_v48  ;;  %v1571_v59 = vpop.f32.mrb[23].mxu1  ;;  %2452 = vmatmul.mubr.bf16.vlgmr.msra.gmra.mrb[32].mxu0 %v1632_v12  ;;  %v1621_v0 = vmax.f32 %v1577_v56, 0.0 }
 0x636   : > { %v1572_v18 = vadd.f32 %v1571_v59, %v3613_v48  ;;  %2468 = vmatpush3.bf16.msra.mxu0 %v2602_v22  ;;  %v1619_v51 = vmax.f32 %v1569_v38, 0.0  ;;  %2513 = vmatpush3.bf16.msra.mxu1 %v2608_v9 }
 0x637   : > { %v1622_v3 = vmax.f32 %v1580_v26, 0.0  ;;  %2469 = vmatprep.subr.bf16.mxu0 %v2603_v54 }
 0x638   : > { %v1620_v4 = vmax.f32 %v1572_v18, 0.0 }
 0x639   : > { %v1634_v63 = vpack.c.bf16 %v1622_v3, %v1621_v0 }
 0x63a   : > { %v1633_v43 = vpack.c.bf16 %v1620_v4, %v1619_v51  ;;  %v2429_v57 = vpop.f32.mrb[24].mxu1  ;;  %2470 = vmatpush3.bf16.msra.mxu0 %v2603_v54 }
 0x63b   : > { %v1593_v33 = vadd.f32 %v2429_v57, %v3613_v48  ;;  %v1584_v24 = vpop.f32.mrb[25].mxu1  ;;  %2471 = vmatprep.subr.bf16.mxu0 %v2604_v20 }
 0x63c   : > { %v1585_v21 = vadd.f32 %v1584_v24, %v3613_v48  ;;  %v2430_v40 = vpop.f32.mrb[26].mxu1  ;;  %2455 = vmatprep.mubr.bf16.mxu0 %v1633_v43 }
 0x63d   : > { %v1596_v50 = vadd.f32 %v2430_v40, %v3613_v48  ;;  %v1587_v11 = vpop.f32.mrb[27].mxu1  ;;  %2456 = vmatmul.mubr.bf16.gmra.mrb[36].mxu0 %v1634_v63  ;;  %v1625_v19 = vmax.f32 %v1593_v33, 0.0 }
 0x63e   : > { %v1588_v34 = vadd.f32 %v1587_v11, %v3613_v48  ;;  %2472 = vmatpush3.bf16.msra.mxu0 %v2604_v20  ;;  %v1623_v47 = vmax.f32 %v1585_v21, 0.0 }
 0x63f   : > { %v1626_v44 = vmax.f32 %v1596_v50, 0.0  ;;  %2473 = vmatprep.subr.bf16.mxu0 %v2605_v23 }
 0x640   : > { %v1624_v1 = vmax.f32 %v1588_v34, 0.0 }
 0x641   : > { %v1636_v32 = vpack.c.bf16 %v1626_v44, %v1625_v19 }
 0x642   : > { %v1635_v53 = vpack.c.bf16 %v1624_v1, %v1623_v47  ;;  %v2433_v13 = vpop.f32.mrb[28].mxu1  ;;  %2474 = vmatpush3.bf16.msra.mxu0 %v2605_v23 }
 0x643   : > { %v1609_v58 = vadd.f32 %v2433_v13, %v3613_v48  ;;  %v1600_v22 = vpop.f32.mrb[29].mxu1  ;;  %2475 = vmatprep.subr.bf16.mxu0 %v3606_v45 }
 0x644   : > { %v1601_v54 = vadd.f32 %v1600_v22, %v3613_v48  ;;  %v2434_v2 = vpop.f32.mrb[30].mxu1  ;;  %2459 = vmatprep.mubr.bf16.mxu0 %v1635_v53 }
 0x645   : > { %v1612_v20 = vadd.f32 %v2434_v2, %v3613_v48  ;;  %v1603_v49 = vpop.f32.mrb[31].mxu1  ;;  %2460 = vmatmul.mubr.bf16.gmra.mrb[40].mxu0 %v1636_v32  ;;  %v1629_v17 = vmax.f32 %v1609_v58, 0.0 }
 0x646   : > { %v1604_v28 = vadd.f32 %v1603_v49, %v3613_v48  ;;  %2476 = vmatpush3.bf16.msra.mxu0 %v3606_v45  ;;  %v1627_v23 = vmax.f32 %v1601_v54, 0.0  ;;  %v2609_v48 = vld [vmem:[#allocation2 + $0x38] sm:$0xff]   ;;  %v3794_v45 = vsub.s32 3, %v3175_v14  ;;  %v3795_v54 = vld [vmem:[#allocation12_spill] sm:$0xff] }
 0x647   : > { %v1630_v36 = vmax.f32 %v1612_v20, 0.0  ;;  %2477 = vmatprep.subr.bf16.mxu0 %v2607_v52  ;;  %2506 = vmatprep.subr.bf16.mxu1 %v2609_v48 }
 0x648   : > { %v1628_v41 = vmax.f32 %v1604_v28, 0.0  ;;  %2514 = vmatpush3.bf16.msra.mxu1 %v2609_v48  ;;  %v3636_v35 = vrot.slane %v3517_v25, %v3794_v45 }
 0x649   : > { %v1638_v8 = vpack.c.bf16 %v1630_v36, %v1629_v17 }
 0x64a   : > { %v1637_v5 = vpack.c.bf16 %v1628_v41, %v1627_v23  ;;  %2478 = vmatpush3.bf16.msra.mxu0 %v2607_v52  ;;  %v3796_v23 = vld [vmem:[#allocation9_spill] sm:$0xff] }
 0x64b   : > { %2479 = vmatprep.subr.bf16.mxu0 %v2608_v9 }
 0x64c   : > { %2463 = vmatprep.mubr.bf16.mxu0 %v1637_v5  ;;  %v3797_v5 = vld [vmem:[#allocation8_spill] sm:$0xff] }
 0x64d   : > { %2464 = vmatmul.mubr.bf16.gmra.mrb[44].mxu0 %v1638_v8 }
 0x64e   : > { %2480 = vmatpush3.bf16.msra.mxu0 %v2608_v9 }
 0x64f   : > { %2481 = vmatprep.subr.bf16.mxu0 %v2609_v48 }
 0x652   : > { %2482 = vmatpush3.bf16.msra.mxu0 %v2609_v48 }
 0x708   : > { %v2453_v31 = vpop.f32.mrb[32].mxu0 }
 0x709   : > { %v1803_v27 = vadd.f32 %v2453_v31, %v3280_v30  ;;  %v1738_v12 = vpop.f32.mrb[33].mxu0  ;;  %v3798_v31 = vld [vmem:[#allocation11_spill] sm:$0xff] }
 0x70a   : > { %v1801_v39 = vadd.f32 %v1738_v12, %v3273_v6  ;;  %v2454_v16 = vpop.f32.mrb[34].mxu0 }
 0x70b   : > { %v1823_v56 = vadd.f32 %v3636_v35, %v1803_v27  ;;  %v1804_v29 = vadd.f32 %v2454_v16, %v3283_v42  ;;  %v1741_v38 = vpop.f32.mrb[35].mxu0  ;;  %v3799_v16 = vld [vmem:[#allocation10_spill] sm:$0xff] }
 0x70c   : > { %v1821_v7 = vadd.f32 %v3636_v35, %v1801_v39  ;;  %v1802_v26 = vadd.f32 %v1741_v38, %v3277_v10 }
 0x70d   : > { %v1824_v14 = vadd.f32 %v3636_v35, %v1804_v29  ;;  %v1839_v59 = vmax.f32 %v1823_v56, 0.0 }
 0x70e   : > { %v1822_v25 = vadd.f32 %v3636_v35, %v1802_v26  ;;  %v1837_v30 = vmax.f32 %v1821_v7, 0.0 }
 0x70f   : > { %v1840_v18 = vmax.f32 %v1824_v14, 0.0 }
 0x710   : > { %v1838_v0 = vmax.f32 %v1822_v25, 0.0  ;;  %v2457_v3 = vpop.f32.mrb[36].mxu0 }
 0x711   : > { %v1854_v6 = vpack.c.bf16 %v1840_v18, %v1839_v59  ;;  %v1807_v51 = vadd.f32 %v2457_v3, %v3296_v15  ;;  %v1754_v4 = vpop.f32.mrb[37].mxu0 }
 0x712   : > { %v1805_v42 = vadd.f32 %v1754_v4, %v3288_v60  ;;  %v2458_v63 = vpop.f32.mrb[38].mxu0  ;;  %v1853_v43 = vpack.c.bf16 %v1838_v0, %v1837_v30  ;;  %v2217_v30 = vld [vmem:[%s3753_s7] ss:$0 sm:$0xff] }
 0x713   : > { %v1827_v57 = vadd.f32 %v3636_v35, %v1807_v51  ;;  %v1808_v10 = vadd.f32 %v2458_v63, %v3299_v61  ;;  %v1757_v33 = vpop.f32.mrb[39].mxu0 }
 0x714   : > { %v1825_v24 = vadd.f32 %v3636_v35, %v1805_v42  ;;  %v1806_v21 = vadd.f32 %v1757_v33, %v3293_v46  ;;  %2483 = vmatprep.mubr.bf16.mxu0 %v1853_v43 }
 0x715   : > { %v1828_v40 = vadd.f32 %v3636_v35, %v1808_v10  ;;  %2484 = vmatmul.mubr.bf16.vlgmr.msra.gmra.mrb[48].mxu0 %v1854_v6  ;;  %v1843_v50 = vmax.f32 %v1827_v57, 0.0 }
 0x716   : > { %v1826_v15 = vadd.f32 %v3636_v35, %v1806_v21  ;;  %v1841_v60 = vmax.f32 %v1825_v24, 0.0 }
 0x717   : > { %v1844_v11 = vmax.f32 %v1828_v40, 0.0 }
 0x718   : > { %v1842_v34 = vmax.f32 %v1826_v15, 0.0  ;;  %v2461_v19 = vpop.f32.mrb[40].mxu0 }
 0x719   : > { %v1856_v44 = vpack.c.bf16 %v1844_v11, %v1843_v50  ;;  %v1811_v47 = vadd.f32 %v2461_v19, %v3312_v37  ;;  %v1770_v61 = vpop.f32.mrb[41].mxu0 }
 0x71a   : > { %v1809_v1 = vadd.f32 %v1770_v61, %v3304_v55  ;;  %v2462_v32 = vpop.f32.mrb[42].mxu0  ;;  %v1855_v53 = vpack.c.bf16 %v1842_v34, %v1841_v60 }
 0x71b   : > { %v1831_v46 = vadd.f32 %v3636_v35, %v1811_v47  ;;  %v1812_v13 = vadd.f32 %v2462_v32, %v3315_v62  ;;  %v1773_v58 = vpop.f32.mrb[43].mxu0 }
 0x71c   : > { %v1829_v22 = vadd.f32 %v3636_v35, %v1809_v1  ;;  %v1810_v2 = vadd.f32 %v1773_v58, %v3795_v54  ;;  %2487 = vmatprep.mubr.bf16.mxu1 %v1855_v53 }
 0x71d   : > { %v1832_v20 = vadd.f32 %v3636_v35, %v1812_v13  ;;  %2488 = vmatmul.mubr.bf16.vlgmr.msra.gmra.mrb[32].mxu1 %v1856_v44  ;;  %v1847_v49 = vmax.f32 %v1831_v46, 0.0 }
 0x71e   : > { %v1830_v37 = vadd.f32 %v3636_v35, %v1810_v2  ;;  %v1845_v55 = vmax.f32 %v1829_v22, 0.0 }
 0x71f   : > { %v1848_v28 = vmax.f32 %v1832_v20, 0.0 }
 0x720   : > { %v1846_v17 = vmax.f32 %v1830_v37, 0.0  ;;  %v2465_v36 = vpop.f32.mrb[44].mxu0 }
 0x721   : > { %v1815_v41 = vadd.f32 %v2465_v36, %v3796_v23  ;;  %v1786_v8 = vpop.f32.mrb[45].mxu0  ;;  %v1858_v62 = vpack.c.bf16 %v1848_v28, %v1847_v49 }
 0x722   : > { %v1813_v52 = vadd.f32 %v1786_v8, %v3797_v5  ;;  %v2466_v9 = vpop.f32.mrb[46].mxu0  ;;  %v1857_v48 = vpack.c.bf16 %v1846_v17, %v1845_v55 }
 0x723   : > { %v1835_v45 = vadd.f32 %v3636_v35, %v1815_v41  ;;  %v1816_v27 = vadd.f32 %v2466_v9, %v3798_v31  ;;  %v1789_v12 = vpop.f32.mrb[47].mxu0 }
 0x724   : > { %v1833_v39 = vadd.f32 %v3636_v35, %v1813_v52  ;;  %v1814_v56 = vadd.f32 %v1789_v12, %v3799_v16  ;;  %2491 = vmatprep.mubr.bf16.mxu1 %v1857_v48 }
 0x725   : > { %v1836_v29 = vadd.f32 %v3636_v35, %v1816_v27  ;;  %2492 = vmatmul.mubr.bf16.gmra.mrb[36].mxu1 %v1858_v62  ;;  %v1851_v7 = vmax.f32 %v1835_v45, 0.0 }
 0x726   : > { %v1834_v38 = vadd.f32 %v3636_v35, %v1814_v56  ;;  %v1849_v14 = vmax.f32 %v1833_v39, 0.0 }
 0x727   : > { %v1852_v26 = vmax.f32 %v1836_v29, 0.0 }
 0x728   : > { %v1850_v25 = vmax.f32 %v1834_v38, 0.0 }
 0x729   : > { %v1860_v59 = vpack.c.bf16 %v1852_v26, %v1851_v7 }
 0x72a   : > { %v1859_v18 = vpack.c.bf16 %v1850_v25, %v1849_v14 }
 0x72c   : > { %2495 = vmatprep.mubr.bf16.mxu1 %v1859_v18 }
 0x72d   : > { %2496 = vmatmul.mubr.bf16.gmra.mrb[40].mxu1 %v1860_v59 }
 0x7e8   : > { %v2485_v0 = vpop.f32.mrb[48].mxu0 }
 0x7e9   : > { %v1975_v3 = vadd.f32 %v2485_v0, %v2217_v30  ;;  %v1966_v6 = vpop.f32.mrb[49].mxu0 }
 0x7ea   : > { %v1967_v51 = vadd.f32 %v2217_v30, %v1966_v6  ;;  %v2486_v35 = vpop.f32.mrb[50].mxu0 }
 0x7eb   : > { %2031 = vst [vmem:[%s3676_s20 + $0x10] sm:$0xff] %v1975_v3  ;;  %v1978_v4 = vadd.f32 %v2486_v35, %v2217_v30  ;;  %v1969_v42 = vpop.f32.mrb[51].mxu0 }
 0x7ec   : > { %2029 = vst [vmem:[%s3676_s20] sm:$0xff] %v1967_v51  ;;  %v1970_v63 = vadd.f32 %v2217_v30, %v1969_v42 }
 0x7ed   : > { %2032 = vst [vmem:[%s3676_s20 + $0x18] sm:$0xff] %v1978_v4 }
 0x7ee   : > { %2030 = vst [vmem:[%s3676_s20 + $0x8] sm:$0xff] %v1970_v63 }
 0x7f0   : > { %v2489_v43 = vpop.f32.mrb[32].mxu1 }
 0x7f1   : > { %v1991_v57 = vadd.f32 %v2489_v43, %v2217_v30  ;;  %v1982_v10 = vpop.f32.mrb[33].mxu1 }
 0x7f2   : > { %v1983_v33 = vadd.f32 %v2217_v30, %v1982_v10  ;;  %v2490_v24 = vpop.f32.mrb[34].mxu1 }
 0x7f3   : > { %2035 = vst [vmem:[%s3676_s20 + $0x30] sm:$0xff] %v1991_v57  ;;  %v1994_v21 = vadd.f32 %v2490_v24, %v2217_v30  ;;  %v1985_v40 = vpop.f32.mrb[35].mxu1 }
 0x7f4   : > { %2033 = vst [vmem:[%s3676_s20 + $0x20] sm:$0xff] %v1983_v33  ;;  %v1986_v15 = vadd.f32 %v2217_v30, %v1985_v40 }
 0x7f5   : > { %2036 = vst [vmem:[%s3676_s20 + $0x38] sm:$0xff] %v1994_v21 }
 0x7f6   : > { %2034 = vst [vmem:[%s3676_s20 + $0x28] sm:$0xff] %v1986_v15 }
 0x7f8   : > { %v2493_v50 = vpop.f32.mrb[36].mxu1 }
 0x7f9   : > { %v2007_v11 = vadd.f32 %v2493_v50, %v2217_v30  ;;  %v1998_v60 = vpop.f32.mrb[37].mxu1 }
 0x7fa   : > { %v1999_v34 = vadd.f32 %v2217_v30, %v1998_v60  ;;  %v2494_v19 = vpop.f32.mrb[38].mxu1 }
 0x7fb   : > { %2039 = vst [vmem:[%s3676_s20 + $0x50] sm:$0xff] %v2007_v11  ;;  %v2010_v44 = vadd.f32 %v2494_v19, %v2217_v30  ;;  %v2001_v47 = vpop.f32.mrb[39].mxu1 }
 0x7fc   : > { %2037 = vst [vmem:[%s3676_s20 + $0x40] sm:$0xff] %v1999_v34  ;;  %v2002_v61 = vadd.f32 %v2217_v30, %v2001_v47 }
 0x7fd   : > { %2040 = vst [vmem:[%s3676_s20 + $0x58] sm:$0xff] %v2010_v44 }
 0x7fe   : > { %2038 = vst [vmem:[%s3676_s20 + $0x48] sm:$0xff] %v2002_v61 }
 0x800   : > { %v2497_v1 = vpop.f32.mrb[40].mxu1 }
 0x801   : > { %v2023_v32 = vadd.f32 %v2497_v1, %v2217_v30  ;;  %v2014_v53 = vpop.f32.mrb[41].mxu1 }
 0x802   : > { %v2015_v46 = vadd.f32 %v2217_v30, %v2014_v53  ;;  %v2498_v13 = vpop.f32.mrb[42].mxu1 }
 0x803   : > { %2043 = vst [vmem:[%s3676_s20 + $0x70] sm:$0xff] %v2023_v32  ;;  %v2026_v58 = vadd.f32 %v2498_v13, %v2217_v30  ;;  %v2017_v22 = vpop.f32.mrb[43].mxu1 }
 0x804   : > { %2041 = vst [vmem:[%s3676_s20 + $0x60] sm:$0xff] %v2015_v46  ;;  %v2018_v54 = vadd.f32 %v2217_v30, %v2017_v22 }
 0x805   : > { %2044 = vst [vmem:[%s3676_s20 + $0x78] sm:$0xff] %v2026_v58 }
 0x806   : > { %2042 = vst [vmem:[%s3676_s20 + $0x68] sm:$0xff] %v2018_v54 }
 0x807   : > { %2715 = shalt.err (!%p2712_p7)
}
 0x808   : > { %s2716_s22 = scalar_lea.hbm %s3696_s12, 2048  ;;  %s2720_s20 = scalar_lea.hbm %s3754_s8, 4096 }
 0x809   : > { %p2717_p8 = scmp.ne.s32.totalorder %s3696_s12, %s2716_s22  ;;  %p2721_p1 = scmp.lt.u32.totalorder %s3696_s12, %s3754_s8 }
 0x80a   : > { %p2722_p0 = scmp.lt.u32.totalorder %s2720_s20, %s2716_s22  ;;  %p2724_p6 = scmp.lt.u32.totalorder %s2716_s22, %s3696_s12 }
 0x80b   : > { %p2718_p11 = pnand %p2717_p8, %p3800_p9 }
 0x80c   : > { %p2723_p5 = por %p2722_p0, %p2721_p1 }
 0x80d   : > { %p2719_p13 = pneg %p2718_p11 }
 0x80e   : > { %p2725_p10 = por %p2724_p6, %p2723_p5 }
 0x810   : > { %p2726_p12 = pnand %p2725_p10, %p2719_p13 }
 0x812   : > { %2729 = shalt.err (!%p2726_p12)
}
 0x813   : > { %s2774_s17 = smov 128   ;;  %s2775_s13 = smov 8  }
 0x814   : > { %2519 = dma.vmem_to_hbm [thread:$0]  (%p3800_p9), %s3698_s19, 2048, %s3696_s12, %s3705_s9, %s2774_s17, %s2774_s17, %s2775_s13  }
 0x815 PF: > { %p2531_p2 = scmp.ge.s32.totalorder %s2768_s30, 2  ;;  %s2074_s18 = sand.u32 1, %s2756_s27  }
 0x816   : > { %p3801_p3 = scmp.ne.s32.totalorder %s3772_s16, 0  ;;  %s2075_s21 = scalar_lea.sflag [#allocation4], %s2074_s18 }
 0x818   : > { %p2526_p4 = pnand %p2531_p2, %p3801_p3 }
 0x81a   : > { %2751 = dma.done.wait (!%p2526_p4), %s2075_s21, 2048  }
 0x81b   : > { %2753 = vsyncadd (!%p2526_p4), %s2075_s21, 4294965248  ;;  %p19_p7 = scmp.ge.s32.totalorder %s2846_s11, 4   ;;  %s3802_s27 = smov %s2760_s28 }
 0x81c   : > { %s3803_s28 = smov %s2764_s29  ;;  %s3804_s29 = smov %s2857_s14 }
 0x81d   : > { %s3805_s30 = smov %s2846_s11  ;;  %21 = sbr.rel (!%p19_p7) target bundleno = 4 (0x4), region = 95 }
 0x824   :  { %2080 = vsyncpa [#allocation3], 1 }
 0x825   :  { %2082 = vsyncpa [#allocation3 + $0x1], 1 }
 0x826   :  { %2083 = vsyncpa [#allocation4], 1 }
 0x827   :  { %2085 = vsyncpa [#allocation4 + $0x1], 1 }

</bundles_post_ra>
